<compile_context>
chip_gen: v7x
topology: tpu7x:2x2x1
jax: 0.10.0
libtpu: 0.0.40
codegen_flags: <defaults>
</compile_context>

<pallas_src>
import functools

import numpy as np

import jax
import jax.numpy as jnp
from jax.experimental import pallas as pl
from jax.experimental.pallas import tpu as pltpu


# ----------------------------- static layer config ---------------------------

def _round_up(n, m):
    return ((n + m - 1) // m) * m


def _layer_cfg(H0, W0, c_in):
    """Per-conv (H, W, Cin, Cout, halo_pad, pool_after).

    The module's first MaxPool2d(2) is applied in glue, so conv1 already sees
    spatial (H0//2, W0//2).
    """
    H, W = H0 // 2, W0 // 2
    chans = [(c_in, 32), (32, 64), (64, 128), (128, 64), (64, 32)]
    cfg = []
    for i, (ci, co) in enumerate(chans):
        pool = i < 3
        pad = _round_up(W + 1, 8)            # halo rows >= W+1, 8-aligned
        cfg.append((H, W, ci, co, pad, pool))
        if pool:
            H, W = H // 2, W // 2
    return tuple(cfg)


def _conv_mask_np(H, W, Cin):
    """Static [H*W, 9*Cin] 0/1 validity mask for the 9 shifted-window taps."""
    M = H * W
    ys, xs = np.divmod(np.arange(M), W)
    m = np.zeros((M, 9 * Cin), np.float32)
    for ky in range(3):
        for kx in range(3):
            dy, dx = ky - 1, kx - 1
            valid = ((ys + dy >= 0) & (ys + dy < H) &
                     (xs + dx >= 0) & (xs + dx < W))
            k = ky * 3 + kx
            m[:, k * Cin:(k + 1) * Cin] = valid[:, None].astype(np.float32)
    return m


def _pool_matrix_np(H, W):
    """Static stacked 2x2 maxpool selection matrix [4*Mo, H*W] (row-major out)."""
    H2, W2 = H // 2, W // 2
    Mo, M = H2 * W2, H * W
    q = np.arange(Mo)
    y2, x2 = np.divmod(q, W2)
    base = 2 * W * y2 + 2 * x2
    p = np.zeros((4 * Mo, M), np.float32)
    for j, (jy, jx) in enumerate(((0, 0), (0, 1), (1, 0), (1, 1))):
        p[j * Mo + q, base + jy * W + jx] = 1.0
    return p


# ----------------------------- in-kernel blocks -------------------------------

def _conv3x3(scr_ref, x, w_ref, b_ref, mask_ref, H, W, Cin, pad):
    """3x3 / stride 1 / pad 1 conv + bias + ReLU on flat row-major (y, x) rows.

    x: [M, Cin] f32.  w_ref: [9*Cin, Cout] bf16, row (ky*3+kx)*Cin + ci holds
    PyTorch weight[co, ci, ky, kx].  mask_ref: [M, 9*Cin] f32 precomputed
    validity.  scr_ref: [2*pad + M, Cin] f32 scratch with halo bands.
    """
    M = H * W
    # Zero only the halo bands (the data band is fully overwritten below).
    scr_ref[pl.ds(0, pad), :] = jnp.zeros((pad, Cin), jnp.float32)
    scr_ref[pl.ds(pad + M, pad), :] = jnp.zeros((pad, Cin), jnp.float32)
    scr_ref[pl.ds(pad, M), :] = x

    taps = []
    for ky in range(3):
        for kx in range(3):
            off = (ky - 1) * W + (kx - 1)
            taps.append(scr_ref[pl.ds(pad + off, M), :])
    slab = jnp.concatenate(taps, axis=1) * mask_ref[...]           # [M, 9*Cin] f32
    acc = jnp.dot(slab.astype(jnp.bfloat16), w_ref[...],
                  preferred_element_type=jnp.float32)              # one MXU dot
    return jnp.maximum(acc + b_ref[...], 0.0)


def _maxpool2x2(x, p_ref, H, W):
    """2x2 maxpool on flat rows: one selection dot + 3 row-block maxes."""
    Mo = (H // 2) * (W // 2)
    cand = jnp.dot(p_ref[...], x.astype(jnp.bfloat16),
                   preferred_element_type=jnp.float32)             # [4*Mo, C]
    out = cand[0:Mo]
    for j in range(1, 4):
        out = jnp.maximum(out, cand[j * Mo:(j + 1) * Mo])
    return out


def _policy_kernel(cfg, *refs):
    n = len(cfg)
    n_pool = sum(1 for c in cfg if c[5])
    it = iter(refs)
    x0_ref = next(it)
    emb_ref = next(it)
    conv_w = [next(it) for _ in range(n)]
    conv_b = [next(it) for _ in range(n)]
    conv_m = [next(it) for _ in range(n)]
    pool_p = [next(it) for _ in range(n_pool)]
    l1w, l1b, l2w, l2b, cw, cb = [next(it) for _ in range(6)]
    feat_ref = next(it)
    val_ref = next(it)
    scr = [next(it) for _ in range(n)]

    a = x0_ref[0]                       # [H1*W1, Cin] f32, flat NHWC rows
    pi = 0
    for li, (H, W, Cin, _Cout, pad, pool) in enumerate(cfg):
        a = _conv3x3(scr[li], a, conv_w[li], conv_b[li], conv_m[li],
                     H, W, Cin, pad)
        if pool:
            a = _maxpool2x2(a, pool_p[pi], H, W)
            pi += 1

    # MLP head: flatten conv5 output (NHWC order) + embeddings, then 3 dots.
    S = cfg[-1][0] * cfg[-1][1]
    pieces = [a[s:s + 1, :] for s in range(S)] + [emb_ref[0]]
    feat_in = jnp.concatenate(pieces, axis=1)                      # [1, S*C5 + 16]
    h1 = jnp.maximum(
        jnp.dot(feat_in.astype(jnp.bfloat16), l1w[...],
                preferred_element_type=jnp.float32) + l1b[...], 0.0)
    h2 = jnp.maximum(
        jnp.dot(h1.astype(jnp.bfloat16), l2w[...],
                preferred_element_type=jnp.float32) + l2b[...], 0.0)
    val = jnp.dot(h2.astype(jnp.bfloat16), cw[...],
                  preferred_element_type=jnp.float32) + cb[...]    # [1, 128] padded
    feat_ref[0] = h2
    val_ref[0] = val


# ------------------------------- JAX glue -------------------------------------

def _full_spec(a):
    nd = a.ndim

    def idx(b):
        return (0,) * nd

    return pl.BlockSpec(a.shape, idx)


def rl_policy_forward(params, inputs_nchw, rnn_hxs, masks, extras):
    """Returns (value, actor_features, rnn_hxs) like RL_Policy.forward (non-recurrent)."""
    del masks                                  # GRU branch unused (non-recurrent)
    B, C, H0, W0 = inputs_nchw.shape
    cfg = _layer_cfg(H0, W0, C)
    M1 = cfg[0][0] * cfg[0][1]

    # First MaxPool2d(2) on the raw input, in glue (4x less data into the kernel).
    x = inputs_nchw.astype(jnp.float32)
    x = jnp.maximum(jnp.maximum(x[:, :, 0::2, 0::2], x[:, :, 0::2, 1::2]),
                    jnp.maximum(x[:, :, 1::2, 0::2], x[:, :, 1::2, 1::2]))
    x0 = jnp.transpose(x, (0, 2, 3, 1)).reshape(B, M1, C)          # flat NHWC rows

    # TODO(synk): data-dependent embedding row gather kept in JAX glue (tiny).
    o_emb = jnp.take(params["orient_emb"], extras[:, 0], axis=0)
    g_emb = jnp.take(params["goal_emb"], extras[:, 1], axis=0)
    emb = jnp.concatenate([o_emb, g_emb], axis=1).reshape(B, 1, 16)

    conv_w = [w for (w, _b) in params["convs"]]
    conv_b = [b for (_w, b) in params["convs"]]
    full_ops = (conv_w + conv_b + list(params["conv_masks"]) +
                list(params["pool_mats"]) +
                [params["lin1_w"], params["lin1_b"],
                 params["lin2_w"], params["lin2_b"],
                 params["critic_w"], params["critic_b"]])

    in_specs = ([pl.BlockSpec((1, M1, C), lambda b: (b, 0, 0)),
                 pl.BlockSpec((1, 1, 16), lambda b: (b, 0, 0))] +
                [_full_spec(a) for a in full_ops])
    out_specs = (pl.BlockSpec((1, 1, 256), lambda b: (b, 0, 0)),
                 pl.BlockSpec((1, 1, 128), lambda b: (b, 0, 0)))
    scratch = [pltpu.VMEM((2 * pad + h * w, ci), jnp.float32)
               for (h, w, ci, _co, pad, _p) in cfg]

    feats, val_pad = pl.pallas_call(
        functools.partial(_policy_kernel, cfg),
        grid=(B,),
        out_shape=(jax.ShapeDtypeStruct((B, 1, 256), jnp.float32),
                   jax.ShapeDtypeStruct((B, 1, 128), jnp.float32)),
        in_specs=in_specs,
        out_specs=out_specs,
        scratch_shapes=scratch,
        compiler_params=pltpu.CompilerParams(
            dimension_semantics=("parallel",)),
    )(x0, emb, *full_ops)

    return val_pad[:, 0, 0], feats[:, 0, :], rnn_hxs


# --------------------------- parameters / init --------------------------------

def init_params(key, input_shape, num_sem_categories=16, hidden_size=128):
    c_in, H0, W0 = input_shape
    cfg = _layer_cfg(H0, W0, c_in)
    keys = jax.random.split(key, 16)
    params = {"convs": [], "conv_masks": [], "pool_mats": []}
    for i, (h, w, ci, co, _pad, pool) in enumerate(cfg):
        # Row (ky*3+kx)*ci + c of the weight == PyTorch conv weight[o, c, ky, kx].
        wgt = (0.05 * jax.random.normal(keys[i], (9 * ci, co), jnp.float32)
               ).astype(jnp.bfloat16)
        b = 0.01 * jax.random.normal(keys[5 + i], (1, co), jnp.float32)
        params["convs"].append((wgt, b))
        params["conv_masks"].append(jnp.asarray(_conv_mask_np(h, w, ci)))
        if pool:
            params["pool_mats"].append(
                jnp.asarray(_pool_matrix_np(h, w)).astype(jnp.bfloat16))
    out_size = (H0 // 16) * (W0 // 16)
    c5 = cfg[-1][3]
    # lin1 rows 0..out_size*c5-1 are in NHWC-flatten order (s*c5 + c); rows
    # out_size*c5.. hold orientation(8)+goal(8) embedding weights.
    # TODO(synk): a PyTorch checkpoint flattens NCHW (c*out_size + s); permute
    # the conv-feature rows accordingly at load time before use.
    params["lin1_w"] = (0.05 * jax.random.normal(
        keys[10], (out_size * c5 + 16, hidden_size), jnp.float32)
        ).astype(jnp.bfloat16)
    params["lin1_b"] = jnp.zeros((1, hidden_size), jnp.float32)
    params["lin2_w"] = (0.05 * jax.random.normal(
        keys[11], (hidden_size, 256), jnp.float32)).astype(jnp.bfloat16)
    params["lin2_b"] = jnp.zeros((1, 256), jnp.float32)
    # Critic head padded to 128 output lanes (lane 0 is the real critic value).
    wc = 0.05 * jax.random.normal(keys[12], (256, 1), jnp.float32)
    params["critic_w"] = jnp.pad(wc, ((0, 0), (0, 127))).astype(jnp.bfloat16)
    params["critic_b"] = jnp.zeros((1, 128), jnp.float32)
    params["orient_emb"] = 0.1 * jax.random.normal(keys[13], (72, 8), jnp.float32)
    params["goal_emb"] = 0.1 * jax.random.normal(
        keys[14], (num_sem_categories, 8), jnp.float32)
    return params


# ---------------------------------- main ---------------------------------------

if __name__ == "__main__":
    num_sem_categories = 16
    B, H, W = 2, 32, 32
    c_in = num_sem_categories + 8                     # 24 input channels
    hidden_size = 128

    key = jax.random.PRNGKey(0)
    kp, kx, ko, kg = jax.random.split(key, 4)
    params = init_params(kp, (c_in, H, W), num_sem_categories, hidden_size)

    inputs = jax.random.normal(kx, (B, c_in, H, W), jnp.float32)   # NCHW like PyTorch
    extras = jnp.stack([jax.random.randint(ko, (B,), 0, 72),
                        jax.random.randint(kg, (B,), 0, num_sem_categories)],
                       axis=1).astype(jnp.int32)
    rnn_hxs = jnp.zeros((B, 1), jnp.float32)          # non-recurrent: size-1 state
    masks = jnp.ones((B, 1), jnp.float32)

    fwd = jax.jit(rl_policy_forward)
    value, actor_features, rnn_out = fwd(params, inputs, rnn_hxs, masks, extras)
    jax.block_until_ready((value, actor_features, rnn_out))

    assert value.shape == (B,)
    assert actor_features.shape == (B, 256)
    assert rnn_out.shape == rnn_hxs.shape
    assert bool(jnp.all(jnp.isfinite(value)))
    assert bool(jnp.all(jnp.isfinite(actor_features)))
    print("KERNEL_OK")
</pallas_src>

<mosaic_0001>
module attributes {stable_mosaic.version = 11 : i64} {
  func.func @_policy_kernel(%arg0: i32, %arg1: memref<1x256x24xf32, #tpu.memory_space<vmem>>, %arg2: memref<1x1x16xf32, #tpu.memory_space<vmem>>, %arg3: memref<216x32xbf16, #tpu.memory_space<vmem>>, %arg4: memref<288x64xbf16, #tpu.memory_space<vmem>>, %arg5: memref<576x128xbf16, #tpu.memory_space<vmem>>, %arg6: memref<1152x64xbf16, #tpu.memory_space<vmem>>, %arg7: memref<576x32xbf16, #tpu.memory_space<vmem>>, %arg8: memref<1x32xf32, #tpu.memory_space<vmem>>, %arg9: memref<1x64xf32, #tpu.memory_space<vmem>>, %arg10: memref<1x128xf32, #tpu.memory_space<vmem>>, %arg11: memref<1x64xf32, #tpu.memory_space<vmem>>, %arg12: memref<1x32xf32, #tpu.memory_space<vmem>>, %arg13: memref<256x216xf32, #tpu.memory_space<vmem>>, %arg14: memref<64x288xf32, #tpu.memory_space<vmem>>, %arg15: memref<16x576xf32, #tpu.memory_space<vmem>>, %arg16: memref<4x1152xf32, #tpu.memory_space<vmem>>, %arg17: memref<4x576xf32, #tpu.memory_space<vmem>>, %arg18: memref<256x256xbf16, #tpu.memory_space<vmem>>, %arg19: memref<64x64xbf16, #tpu.memory_space<vmem>>, %arg20: memref<16x16xbf16, #tpu.memory_space<vmem>>, %arg21: memref<144x128xbf16, #tpu.memory_space<vmem>>, %arg22: memref<1x128xf32, #tpu.memory_space<vmem>>, %arg23: memref<128x256xbf16, #tpu.memory_space<vmem>>, %arg24: memref<1x256xf32, #tpu.memory_space<vmem>>, %arg25: memref<256x128xbf16, #tpu.memory_space<vmem>>, %arg26: memref<1x128xf32, #tpu.memory_space<vmem>>, %arg27: memref<1x1x256xf32, #tpu.memory_space<vmem>>, %arg28: memref<1x1x128xf32, #tpu.memory_space<vmem>>, %arg29: memref<304x24xf32, #tpu.memory_space<vmem>>, %arg30: memref<96x32xf32, #tpu.memory_space<vmem>>, %arg31: memref<32x64xf32, #tpu.memory_space<vmem>>, %arg32: memref<20x128xf32, #tpu.memory_space<vmem>>, %arg33: memref<20x64xf32, #tpu.memory_space<vmem>>) attributes {dimension_semantics = [#tpu.dimension_semantics<parallel>], iteration_bounds = array<i64: 2>, scalar_prefetch = 0 : i64, scratch_operands = 5 : i64, tpu.core_type = #tpu.core_type<tc>, window_params = [{transform_indices = @transform_0, window_bounds = array<i64: 1, 256, 24>}, {transform_indices = @transform_1, window_bounds = array<i64: 1, 1, 16>}, {pipeline_mode = #tpu.pipeline_mode<synchronous>, transform_indices = @transform_2, window_bounds = array<i64: 216, 32>}, {pipeline_mode = #tpu.pipeline_mode<synchronous>, transform_indices = @transform_3, window_bounds = array<i64: 288, 64>}, {pipeline_mode = #tpu.pipeline_mode<synchronous>, transform_indices = @transform_4, window_bounds = array<i64: 576, 128>}, {pipeline_mode = #tpu.pipeline_mode<synchronous>, transform_indices = @transform_5, window_bounds = array<i64: 1152, 64>}, {pipeline_mode = #tpu.pipeline_mode<synchronous>, transform_indices = @transform_6, window_bounds = array<i64: 576, 32>}, {pipeline_mode = #tpu.pipeline_mode<synchronous>, transform_indices = @transform_7, window_bounds = array<i64: 1, 32>}, {pipeline_mode = #tpu.pipeline_mode<synchronous>, transform_indices = @transform_8, window_bounds = array<i64: 1, 64>}, {pipeline_mode = #tpu.pipeline_mode<synchronous>, transform_indices = @transform_9, window_bounds = array<i64: 1, 128>}, {pipeline_mode = #tpu.pipeline_mode<synchronous>, transform_indices = @transform_10, window_bounds = array<i64: 1, 64>}, {pipeline_mode = #tpu.pipeline_mode<synchronous>, transform_indices = @transform_11, window_bounds = array<i64: 1, 32>}, {pipeline_mode = #tpu.pipeline_mode<synchronous>, transform_indices = @transform_12, window_bounds = array<i64: 256, 216>}, {pipeline_mode = #tpu.pipeline_mode<synchronous>, transform_indices = @transform_13, window_bounds = array<i64: 64, 288>}, {pipeline_mode = #tpu.pipeline_mode<synchronous>, transform_indices = @transform_14, window_bounds = array<i64: 16, 576>}, {pipeline_mode = #tpu.pipeline_mode<synchronous>, transform_indices = @transform_15, window_bounds = array<i64: 4, 1152>}, {pipeline_mode = #tpu.pipeline_mode<synchronous>, transform_indices = @transform_16, window_bounds = array<i64: 4, 576>}, {pipeline_mode = #tpu.pipeline_mode<synchronous>, transform_indices = @transform_17, window_bounds = array<i64: 256, 256>}, {pipeline_mode = #tpu.pipeline_mode<synchronous>, transform_indices = @transform_18, window_bounds = array<i64: 64, 64>}, {pipeline_mode = #tpu.pipeline_mode<synchronous>, transform_indices = @transform_19, window_bounds = array<i64: 16, 16>}, {pipeline_mode = #tpu.pipeline_mode<synchronous>, transform_indices = @transform_20, window_bounds = array<i64: 144, 128>}, {pipeline_mode = #tpu.pipeline_mode<synchronous>, transform_indices = @transform_21, window_bounds = array<i64: 1, 128>}, {pipeline_mode = #tpu.pipeline_mode<synchronous>, transform_indices = @transform_22, window_bounds = array<i64: 128, 256>}, {pipeline_mode = #tpu.pipeline_mode<synchronous>, transform_indices = @transform_23, window_bounds = array<i64: 1, 256>}, {pipeline_mode = #tpu.pipeline_mode<synchronous>, transform_indices = @transform_24, window_bounds = array<i64: 256, 128>}, {pipeline_mode = #tpu.pipeline_mode<synchronous>, transform_indices = @transform_25, window_bounds = array<i64: 1, 128>}, {transform_indices = @transform_26, window_bounds = array<i64: 1, 1, 256>}, {transform_indices = @transform_27, window_bounds = array<i64: 1, 1, 128>}]} {
    %c0 = arith.constant 0 : index
    %c0_0 = arith.constant 0 : index
    %c0_1 = arith.constant 0 : index
    %0 = vector.load %arg1[%c0, %c0_0, %c0_1] : memref<1x256x24xf32, #tpu.memory_space<vmem>>, vector<1x256x24xf32>
    %1 = vector.shape_cast %0 : vector<1x256x24xf32> to vector<256x24xf32>
    %cst = arith.constant 0.000000e+00 : f32
    %2 = vector.broadcast %cst : f32 to vector<24x24xf32>
    %c0_2 = arith.constant 0 : index
    %c0_3 = arith.constant 0 : index
    %3 = vector.load %arg29[%c0_2, %c0_3] : memref<304x24xf32, #tpu.memory_space<vmem>>, vector<24x24xf32>
    tpu.vector_store %arg29[%c0_2, %c0_3], %2 {strides = array<i32>} : memref<304x24xf32, #tpu.memory_space<vmem>>, vector<24x24xf32>,
    %cst_4 = arith.constant 0.000000e+00 : f32
    %4 = vector.broadcast %cst_4 : f32 to vector<24x24xf32>
    %c280 = arith.constant 280 : index
    %c0_5 = arith.constant 0 : index
    %5 = vector.load %arg29[%c280, %c0_5] : memref<304x24xf32, #tpu.memory_space<vmem>>, vector<24x24xf32>
    tpu.vector_store %arg29[%c280, %c0_5], %4 {strides = array<i32>} : memref<304x24xf32, #tpu.memory_space<vmem>>, vector<24x24xf32>,
    %c24 = arith.constant 24 : index
    %c0_6 = arith.constant 0 : index
    %6 = vector.load %arg29[%c24, %c0_6] : memref<304x24xf32, #tpu.memory_space<vmem>>, vector<256x24xf32>
    tpu.vector_store %arg29[%c24, %c0_6], %1 {strides = array<i32>} : memref<304x24xf32, #tpu.memory_space<vmem>>, vector<256x24xf32>,
    %c7 = arith.constant 7 : index
    %c0_7 = arith.constant 0 : index
    %7 = vector.load %arg29[%c7, %c0_7] : memref<304x24xf32, #tpu.memory_space<vmem>>, vector<256x24xf32>
    %c8 = arith.constant 8 : index
    %c0_8 = arith.constant 0 : index
    %8 = vector.load %arg29[%c8, %c0_8] : memref<304x24xf32, #tpu.memory_space<vmem>>, vector<256x24xf32>
    %c9 = arith.constant 9 : index
    %c0_9 = arith.constant 0 : index
    %9 = vector.load %arg29[%c9, %c0_9] : memref<304x24xf32, #tpu.memory_space<vmem>>, vector<256x24xf32>
    %c23 = arith.constant 23 : index
    %c0_10 = arith.constant 0 : index
    %10 = vector.load %arg29[%c23, %c0_10] : memref<304x24xf32, #tpu.memory_space<vmem>>, vector<256x24xf32>
    %c24_11 = arith.constant 24 : index
    %c0_12 = arith.constant 0 : index
    %11 = vector.load %arg29[%c24_11, %c0_12] : memref<304x24xf32, #tpu.memory_space<vmem>>, vector<256x24xf32>
    %c25 = arith.constant 25 : index
    %c0_13 = arith.constant 0 : index
    %12 = vector.load %arg29[%c25, %c0_13] : memref<304x24xf32, #tpu.memory_space<vmem>>, vector<256x24xf32>
    %c39 = arith.constant 39 : index
    %c0_14 = arith.constant 0 : index
    %13 = vector.load %arg29[%c39, %c0_14] : memref<304x24xf32, #tpu.memory_space<vmem>>, vector<256x24xf32>
    %c40 = arith.constant 40 : index
    %c0_15 = arith.constant 0 : index
    %14 = vector.load %arg29[%c40, %c0_15] : memref<304x24xf32, #tpu.memory_space<vmem>>, vector<256x24xf32>
    %c41 = arith.constant 41 : index
    %c0_16 = arith.constant 0 : index
    %15 = vector.load %arg29[%c41, %c0_16] : memref<304x24xf32, #tpu.memory_space<vmem>>, vector<256x24xf32>
    %16 = tpu.concatenate %7, %8, %9, %10, %11, %12, %13, %14, %15 in 1 : vector<256x24xf32>, vector<256x24xf32>, vector<256x24xf32>, vector<256x24xf32>, vector<256x24xf32>, vector<256x24xf32>, vector<256x24xf32>, vector<256x24xf32>, vector<256x24xf32> -> vector<256x216xf32>
    %c0_17 = arith.constant 0 : index
    %c0_18 = arith.constant 0 : index
    %17 = vector.load %arg13[%c0_17, %c0_18] : memref<256x216xf32, #tpu.memory_space<vmem>>, vector<256x216xf32>
    %18 = arith.mulf %16, %17 : vector<256x216xf32>
    %19 = arith.truncf %18 : vector<256x216xf32> to vector<256x216xbf16>
    %c0_19 = arith.constant 0 : index
    %c0_20 = arith.constant 0 : index
    %20 = vector.load %arg3[%c0_19, %c0_20] : memref<216x32xbf16, #tpu.memory_space<vmem>>, vector<216x32xbf16>
    %cst_21 = arith.constant dense<0.000000e+00> : vector<256x32xf32>
    %21 = tpu.matmul %19, %20, %cst_21 {dimension_numbers = #tpu.dot_dimension_numbers<[1], [0], [0], [1], [0, 0, 1, 1], [], []>} : vector<256x216xbf16>, vector<216x32xbf16>, vector<256x32xf32> -> vector<256x32xf32>
    %c0_22 = arith.constant 0 : index
    %c0_23 = arith.constant 0 : index
    %22 = vector.load %arg8[%c0_22, %c0_23] : memref<1x32xf32, #tpu.memory_space<vmem>>, vector<1x32xf32>
    %23 = vector.broadcast %22 : vector<1x32xf32> to vector<256x32xf32>
    %24 = arith.addf %21, %23 : vector<256x32xf32>
    %cst_24 = arith.constant 0.000000e+00 : f32
    %25 = vector.broadcast %cst_24 : f32 to vector<256x32xf32>
    %26 = arith.maximumf %24, %25 : vector<256x32xf32>
    %c0_25 = arith.constant 0 : index
    %c0_26 = arith.constant 0 : index
    %27 = vector.load %arg18[%c0_25, %c0_26] : memref<256x256xbf16, #tpu.memory_space<vmem>>, vector<256x256xbf16>
    %28 = arith.truncf %26 : vector<256x32xf32> to vector<256x32xbf16>
    %cst_27 = arith.constant dense<0.000000e+00> : vector<256x32xf32>
    %29 = tpu.matmul %27, %28, %cst_27 {dimension_numbers = #tpu.dot_dimension_numbers<[1], [0], [0], [1], [0, 0, 1, 1], [], []>} : vector<256x256xbf16>, vector<256x32xbf16>, vector<256x32xf32> -> vector<256x32xf32>
    %30 = vector.extract_strided_slice %29 {offsets = [0, 0], sizes = [64, 32], strides = [1, 1]} : vector<256x32xf32> to vector<64x32xf32>
    %31 = vector.extract_strided_slice %29 {offsets = [64, 0], sizes = [64, 32], strides = [1, 1]} : vector<256x32xf32> to vector<64x32xf32>
    %32 = arith.maximumf %30, %31 : vector<64x32xf32>
    %33 = vector.extract_strided_slice %29 {offsets = [128, 0], sizes = [64, 32], strides = [1, 1]} : vector<256x32xf32> to vector<64x32xf32>
    %34 = arith.maximumf %32, %33 : vector<64x32xf32>
    %35 = vector.extract_strided_slice %29 {offsets = [192, 0], sizes = [64, 32], strides = [1, 1]} : vector<256x32xf32> to vector<64x32xf32>
    %36 = arith.maximumf %34, %35 : vector<64x32xf32>
    %cst_28 = arith.constant 0.000000e+00 : f32
    %37 = vector.broadcast %cst_28 : f32 to vector<16x32xf32>
    %c0_29 = arith.constant 0 : index
    %c0_30 = arith.constant 0 : index
    %38 = vector.load %arg30[%c0_29, %c0_30] : memref<96x32xf32, #tpu.memory_space<vmem>>, vector<16x32xf32>
    tpu.vector_store %arg30[%c0_29, %c0_30], %37 {strides = array<i32>} : memref<96x32xf32, #tpu.memory_space<vmem>>, vector<16x32xf32>,
    %cst_31 = arith.constant 0.000000e+00 : f32
    %39 = vector.broadcast %cst_31 : f32 to vector<16x32xf32>
    %c80 = arith.constant 80 : index
    %c0_32 = arith.constant 0 : index
    %40 = vector.load %arg30[%c80, %c0_32] : memref<96x32xf32, #tpu.memory_space<vmem>>, vector<16x32xf32>
    tpu.vector_store %arg30[%c80, %c0_32], %39 {strides = array<i32>} : memref<96x32xf32, #tpu.memory_space<vmem>>, vector<16x32xf32>,
    %c16 = arith.constant 16 : index
    %c0_33 = arith.constant 0 : index
    %41 = vector.load %arg30[%c16, %c0_33] : memref<96x32xf32, #tpu.memory_space<vmem>>, vector<64x32xf32>
    tpu.vector_store %arg30[%c16, %c0_33], %36 {strides = array<i32>} : memref<96x32xf32, #tpu.memory_space<vmem>>, vector<64x32xf32>,
    %c7_34 = arith.constant 7 : index
    %c0_35 = arith.constant 0 : index
    %42 = vector.load %arg30[%c7_34, %c0_35] : memref<96x32xf32, #tpu.memory_space<vmem>>, vector<64x32xf32>
    %c8_36 = arith.constant 8 : index
    %c0_37 = arith.constant 0 : index
    %43 = vector.load %arg30[%c8_36, %c0_37] : memref<96x32xf32, #tpu.memory_space<vmem>>, vector<64x32xf32>
    %c9_38 = arith.constant 9 : index
    %c0_39 = arith.constant 0 : index
    %44 = vector.load %arg30[%c9_38, %c0_39] : memref<96x32xf32, #tpu.memory_space<vmem>>, vector<64x32xf32>
    %c15 = arith.constant 15 : index
    %c0_40 = arith.constant 0 : index
    %45 = vector.load %arg30[%c15, %c0_40] : memref<96x32xf32, #tpu.memory_space<vmem>>, vector<64x32xf32>
    %c16_41 = arith.constant 16 : index
    %c0_42 = arith.constant 0 : index
    %46 = vector.load %arg30[%c16_41, %c0_42] : memref<96x32xf32, #tpu.memory_space<vmem>>, vector<64x32xf32>
    %c17 = arith.constant 17 : index
    %c0_43 = arith.constant 0 : index
    %47 = vector.load %arg30[%c17, %c0_43] : memref<96x32xf32, #tpu.memory_space<vmem>>, vector<64x32xf32>
    %c23_44 = arith.constant 23 : index
    %c0_45 = arith.constant 0 : index
    %48 = vector.load %arg30[%c23_44, %c0_45] : memref<96x32xf32, #tpu.memory_space<vmem>>, vector<64x32xf32>
    %c24_46 = arith.constant 24 : index
    %c0_47 = arith.constant 0 : index
    %49 = vector.load %arg30[%c24_46, %c0_47] : memref<96x32xf32, #tpu.memory_space<vmem>>, vector<64x32xf32>
    %c25_48 = arith.constant 25 : index
    %c0_49 = arith.constant 0 : index
    %50 = vector.load %arg30[%c25_48, %c0_49] : memref<96x32xf32, #tpu.memory_space<vmem>>, vector<64x32xf32>
    %51 = tpu.concatenate %42, %43, %44, %45, %46, %47, %48, %49, %50 in 1 : vector<64x32xf32>, vector<64x32xf32>, vector<64x32xf32>, vector<64x32xf32>, vector<64x32xf32>, vector<64x32xf32>, vector<64x32xf32>, vector<64x32xf32>, vector<64x32xf32> -> vector<64x288xf32>
    %c0_50 = arith.constant 0 : index
    %c0_51 = arith.constant 0 : index
    %52 = vector.load %arg14[%c0_50, %c0_51] : memref<64x288xf32, #tpu.memory_space<vmem>>, vector<64x288xf32>
    %53 = arith.mulf %51, %52 : vector<64x288xf32>
    %54 = arith.truncf %53 : vector<64x288xf32> to vector<64x288xbf16>
    %c0_52 = arith.constant 0 : index
    %c0_53 = arith.constant 0 : index
    %55 = vector.load %arg4[%c0_52, %c0_53] : memref<288x64xbf16, #tpu.memory_space<vmem>>, vector<288x64xbf16>
    %cst_54 = arith.constant dense<0.000000e+00> : vector<64x64xf32>
    %56 = tpu.matmul %54, %55, %cst_54 {dimension_numbers = #tpu.dot_dimension_numbers<[1], [0], [0], [1], [0, 0, 1, 1], [], []>} : vector<64x288xbf16>, vector<288x64xbf16>, vector<64x64xf32> -> vector<64x64xf32>
    %c0_55 = arith.constant 0 : index
    %c0_56 = arith.constant 0 : index
    %57 = vector.load %arg9[%c0_55, %c0_56] : memref<1x64xf32, #tpu.memory_space<vmem>>, vector<1x64xf32>
    %58 = vector.broadcast %57 : vector<1x64xf32> to vector<64x64xf32>
    %59 = arith.addf %56, %58 : vector<64x64xf32>
    %cst_57 = arith.constant 0.000000e+00 : f32
    %60 = vector.broadcast %cst_57 : f32 to vector<64x64xf32>
    %61 = arith.maximumf %59, %60 : vector<64x64xf32>
    %c0_58 = arith.constant 0 : index
    %c0_59 = arith.constant 0 : index
    %62 = vector.load %arg19[%c0_58, %c0_59] : memref<64x64xbf16, #tpu.memory_space<vmem>>, vector<64x64xbf16>
    %63 = arith.truncf %61 : vector<64x64xf32> to vector<64x64xbf16>
    %cst_60 = arith.constant dense<0.000000e+00> : vector<64x64xf32>
    %64 = tpu.matmul %62, %63, %cst_60 {dimension_numbers = #tpu.dot_dimension_numbers<[1], [0], [0], [1], [0, 0, 1, 1], [], []>} : vector<64x64xbf16>, vector<64x64xbf16>, vector<64x64xf32> -> vector<64x64xf32>
    %65 = vector.extract_strided_slice %64 {offsets = [0, 0], sizes = [16, 64], strides = [1, 1]} : vector<64x64xf32> to vector<16x64xf32>
    %66 = vector.extract_strided_slice %64 {offsets = [16, 0], sizes = [16, 64], strides = [1, 1]} : vector<64x64xf32> to vector<16x64xf32>
    %67 = arith.maximumf %65, %66 : vector<16x64xf32>
    %68 = vector.extract_strided_slice %64 {offsets = [32, 0], sizes = [16, 64], strides = [1, 1]} : vector<64x64xf32> to vector<16x64xf32>
    %69 = arith.maximumf %67, %68 : vector<16x64xf32>
    %70 = vector.extract_strided_slice %64 {offsets = [48, 0], sizes = [16, 64], strides = [1, 1]} : vector<64x64xf32> to vector<16x64xf32>
    %71 = arith.maximumf %69, %70 : vector<16x64xf32>
    %cst_61 = arith.constant 0.000000e+00 : f32
    %72 = vector.broadcast %cst_61 : f32 to vector<8x64xf32>
    %c0_62 = arith.constant 0 : index
    %c0_63 = arith.constant 0 : index
    %73 = vector.load %arg31[%c0_62, %c0_63] : memref<32x64xf32, #tpu.memory_space<vmem>>, vector<8x64xf32>
    tpu.vector_store %arg31[%c0_62, %c0_63], %72 {strides = array<i32>} : memref<32x64xf32, #tpu.memory_space<vmem>>, vector<8x64xf32>,
    %cst_64 = arith.constant 0.000000e+00 : f32
    %74 = vector.broadcast %cst_64 : f32 to vector<8x64xf32>
    %c24_65 = arith.constant 24 : index
    %c0_66 = arith.constant 0 : index
    %75 = vector.load %arg31[%c24_65, %c0_66] : memref<32x64xf32, #tpu.memory_space<vmem>>, vector<8x64xf32>
    tpu.vector_store %arg31[%c24_65, %c0_66], %74 {strides = array<i32>} : memref<32x64xf32, #tpu.memory_space<vmem>>, vector<8x64xf32>,
    %c8_67 = arith.constant 8 : index
    %c0_68 = arith.constant 0 : index
    %76 = vector.load %arg31[%c8_67, %c0_68] : memref<32x64xf32, #tpu.memory_space<vmem>>, vector<16x64xf32>
    tpu.vector_store %arg31[%c8_67, %c0_68], %71 {strides = array<i32>} : memref<32x64xf32, #tpu.memory_space<vmem>>, vector<16x64xf32>,
    %c3 = arith.constant 3 : index
    %c0_69 = arith.constant 0 : index
    %77 = vector.load %arg31[%c3, %c0_69] : memref<32x64xf32, #tpu.memory_space<vmem>>, vector<16x64xf32>
    %c4 = arith.constant 4 : index
    %c0_70 = arith.constant 0 : index
    %78 = vector.load %arg31[%c4, %c0_70] : memref<32x64xf32, #tpu.memory_space<vmem>>, vector<16x64xf32>
    %c5 = arith.constant 5 : index
    %c0_71 = arith.constant 0 : index
    %79 = vector.load %arg31[%c5, %c0_71] : memref<32x64xf32, #tpu.memory_space<vmem>>, vector<16x64xf32>
    %c7_72 = arith.constant 7 : index
    %c0_73 = arith.constant 0 : index
    %80 = vector.load %arg31[%c7_72, %c0_73] : memref<32x64xf32, #tpu.memory_space<vmem>>, vector<16x64xf32>
    %c8_74 = arith.constant 8 : index
    %c0_75 = arith.constant 0 : index
    %81 = vector.load %arg31[%c8_74, %c0_75] : memref<32x64xf32, #tpu.memory_space<vmem>>, vector<16x64xf32>
    %c9_76 = arith.constant 9 : index
    %c0_77 = arith.constant 0 : index
    %82 = vector.load %arg31[%c9_76, %c0_77] : memref<32x64xf32, #tpu.memory_space<vmem>>, vector<16x64xf32>
    %c11 = arith.constant 11 : index
    %c0_78 = arith.constant 0 : index
    %83 = vector.load %arg31[%c11, %c0_78] : memref<32x64xf32, #tpu.memory_space<vmem>>, vector<16x64xf32>
    %c12 = arith.constant 12 : index
    %c0_79 = arith.constant 0 : index
    %84 = vector.load %arg31[%c12, %c0_79] : memref<32x64xf32, #tpu.memory_space<vmem>>, vector<16x64xf32>
    %c13 = arith.constant 13 : index
    %c0_80 = arith.constant 0 : index
    %85 = vector.load %arg31[%c13, %c0_80] : memref<32x64xf32, #tpu.memory_space<vmem>>, vector<16x64xf32>
    %86 = tpu.concatenate %77, %78, %79, %80, %81, %82, %83, %84, %85 in 1 : vector<16x64xf32>, vector<16x64xf32>, vector<16x64xf32>, vector<16x64xf32>, vector<16x64xf32>, vector<16x64xf32>, vector<16x64xf32>, vector<16x64xf32>, vector<16x64xf32> -> vector<16x576xf32>
    %c0_81 = arith.constant 0 : index
    %c0_82 = arith.constant 0 : index
    %87 = vector.load %arg15[%c0_81, %c0_82] : memref<16x576xf32, #tpu.memory_space<vmem>>, vector<16x576xf32>
    %88 = arith.mulf %86, %87 : vector<16x576xf32>
    %89 = arith.truncf %88 : vector<16x576xf32> to vector<16x576xbf16>
    %c0_83 = arith.constant 0 : index
    %c0_84 = arith.constant 0 : index
    %90 = vector.load %arg5[%c0_83, %c0_84] : memref<576x128xbf16, #tpu.memory_space<vmem>>, vector<576x128xbf16>
    %cst_85 = arith.constant dense<0.000000e+00> : vector<16x128xf32>
    %91 = tpu.matmul %89, %90, %cst_85 {dimension_numbers = #tpu.dot_dimension_numbers<[1], [0], [0], [1], [0, 0, 1, 1], [], []>} : vector<16x576xbf16>, vector<576x128xbf16>, vector<16x128xf32> -> vector<16x128xf32>
    %c0_86 = arith.constant 0 : index
    %c0_87 = arith.constant 0 : index
    %92 = vector.load %arg10[%c0_86, %c0_87] : memref<1x128xf32, #tpu.memory_space<vmem>>, vector<1x128xf32>
    %93 = vector.broadcast %92 : vector<1x128xf32> to vector<16x128xf32>
    %94 = arith.addf %91, %93 : vector<16x128xf32>
    %cst_88 = arith.constant 0.000000e+00 : f32
    %95 = vector.broadcast %cst_88 : f32 to vector<16x128xf32>
    %96 = arith.maximumf %94, %95 : vector<16x128xf32>
    %c0_89 = arith.constant 0 : index
    %c0_90 = arith.constant 0 : index
    %97 = vector.load %arg20[%c0_89, %c0_90] : memref<16x16xbf16, #tpu.memory_space<vmem>>, vector<16x16xbf16>
    %98 = arith.truncf %96 : vector<16x128xf32> to vector<16x128xbf16>
    %cst_91 = arith.constant dense<0.000000e+00> : vector<16x128xf32>
    %99 = tpu.matmul %97, %98, %cst_91 {dimension_numbers = #tpu.dot_dimension_numbers<[1], [0], [0], [1], [0, 0, 1, 1], [], []>} : vector<16x16xbf16>, vector<16x128xbf16>, vector<16x128xf32> -> vector<16x128xf32>
    %100 = vector.extract_strided_slice %99 {offsets = [0, 0], sizes = [4, 128], strides = [1, 1]} : vector<16x128xf32> to vector<4x128xf32>
    %101 = vector.extract_strided_slice %99 {offsets = [4, 0], sizes = [4, 128], strides = [1, 1]} : vector<16x128xf32> to vector<4x128xf32>
    %102 = arith.maximumf %100, %101 : vector<4x128xf32>
    %103 = vector.extract_strided_slice %99 {offsets = [8, 0], sizes = [4, 128], strides = [1, 1]} : vector<16x128xf32> to vector<4x128xf32>
    %104 = arith.maximumf %102, %103 : vector<4x128xf32>
    %105 = vector.extract_strided_slice %99 {offsets = [12, 0], sizes = [4, 128], strides = [1, 1]} : vector<16x128xf32> to vector<4x128xf32>
    %106 = arith.maximumf %104, %105 : vector<4x128xf32>
    %cst_92 = arith.constant 0.000000e+00 : f32
    %107 = vector.broadcast %cst_92 : f32 to vector<8x128xf32>
    %c0_93 = arith.constant 0 : index
    %c0_94 = arith.constant 0 : index
    %108 = vector.load %arg32[%c0_93, %c0_94] : memref<20x128xf32, #tpu.memory_space<vmem>>, vector<8x128xf32>
    tpu.vector_store %arg32[%c0_93, %c0_94], %107 {strides = array<i32>} : memref<20x128xf32, #tpu.memory_space<vmem>>, vector<8x128xf32>,
    %cst_95 = arith.constant 0.000000e+00 : f32
    %109 = vector.broadcast %cst_95 : f32 to vector<8x128xf32>
    %c12_96 = arith.constant 12 : index
    %c0_97 = arith.constant 0 : index
    %110 = vector.load %arg32[%c12_96, %c0_97] : memref<20x128xf32, #tpu.memory_space<vmem>>, vector<8x128xf32>
    tpu.vector_store %arg32[%c12_96, %c0_97], %109 {strides = array<i32>} : memref<20x128xf32, #tpu.memory_space<vmem>>, vector<8x128xf32>,
    %c8_98 = arith.constant 8 : index
    %c0_99 = arith.constant 0 : index
    %111 = vector.load %arg32[%c8_98, %c0_99] : memref<20x128xf32, #tpu.memory_space<vmem>>, vector<4x128xf32>
    tpu.vector_store %arg32[%c8_98, %c0_99], %106 {strides = array<i32>} : memref<20x128xf32, #tpu.memory_space<vmem>>, vector<4x128xf32>,
    %c5_100 = arith.constant 5 : index
    %c0_101 = arith.constant 0 : index
    %112 = vector.load %arg32[%c5_100, %c0_101] : memref<20x128xf32, #tpu.memory_space<vmem>>, vector<4x128xf32>
    %c6 = arith.constant 6 : index
    %c0_102 = arith.constant 0 : index
    %113 = vector.load %arg32[%c6, %c0_102] : memref<20x128xf32, #tpu.memory_space<vmem>>, vector<4x128xf32>
    %c7_103 = arith.constant 7 : index
    %c0_104 = arith.constant 0 : index
    %114 = vector.load %arg32[%c7_103, %c0_104] : memref<20x128xf32, #tpu.memory_space<vmem>>, vector<4x128xf32>
    %c7_105 = arith.constant 7 : index
    %c0_106 = arith.constant 0 : index
    %115 = vector.load %arg32[%c7_105, %c0_106] : memref<20x128xf32, #tpu.memory_space<vmem>>, vector<4x128xf32>
    %c8_107 = arith.constant 8 : index
    %c0_108 = arith.constant 0 : index
    %116 = vector.load %arg32[%c8_107, %c0_108] : memref<20x128xf32, #tpu.memory_space<vmem>>, vector<4x128xf32>
    %c9_109 = arith.constant 9 : index
    %c0_110 = arith.constant 0 : index
    %117 = vector.load %arg32[%c9_109, %c0_110] : memref<20x128xf32, #tpu.memory_space<vmem>>, vector<4x128xf32>
    %c9_111 = arith.constant 9 : index
    %c0_112 = arith.constant 0 : index
    %118 = vector.load %arg32[%c9_111, %c0_112] : memref<20x128xf32, #tpu.memory_space<vmem>>, vector<4x128xf32>
    %c10 = arith.constant 10 : index
    %c0_113 = arith.constant 0 : index
    %119 = vector.load %arg32[%c10, %c0_113] : memref<20x128xf32, #tpu.memory_space<vmem>>, vector<4x128xf32>
    %c11_114 = arith.constant 11 : index
    %c0_115 = arith.constant 0 : index
    %120 = vector.load %arg32[%c11_114, %c0_115] : memref<20x128xf32, #tpu.memory_space<vmem>>, vector<4x128xf32>
    %121 = tpu.concatenate %112, %113, %114, %115, %116, %117, %118, %119, %120 in 1 : vector<4x128xf32>, vector<4x128xf32>, vector<4x128xf32>, vector<4x128xf32>, vector<4x128xf32>, vector<4x128xf32>, vector<4x128xf32>, vector<4x128xf32>, vector<4x128xf32> -> vector<4x1152xf32>
    %c0_116 = arith.constant 0 : index
    %c0_117 = arith.constant 0 : index
    %122 = vector.load %arg16[%c0_116, %c0_117] : memref<4x1152xf32, #tpu.memory_space<vmem>>, vector<4x1152xf32>
    %123 = arith.mulf %121, %122 : vector<4x1152xf32>
    %124 = arith.truncf %123 : vector<4x1152xf32> to vector<4x1152xbf16>
    %c0_118 = arith.constant 0 : index
    %c0_119 = arith.constant 0 : index
    %125 = vector.load %arg6[%c0_118, %c0_119] : memref<1152x64xbf16, #tpu.memory_space<vmem>>, vector<1152x64xbf16>
    %cst_120 = arith.constant dense<0.000000e+00> : vector<4x64xf32>
    %126 = tpu.matmul %124, %125, %cst_120 {dimension_numbers = #tpu.dot_dimension_numbers<[1], [0], [0], [1], [0, 0, 1, 1], [], []>} : vector<4x1152xbf16>, vector<1152x64xbf16>, vector<4x64xf32> -> vector<4x64xf32>
    %c0_121 = arith.constant 0 : index
    %c0_122 = arith.constant 0 : index
    %127 = vector.load %arg11[%c0_121, %c0_122] : memref<1x64xf32, #tpu.memory_space<vmem>>, vector<1x64xf32>
    %128 = vector.broadcast %127 : vector<1x64xf32> to vector<4x64xf32>
    %129 = arith.addf %126, %128 : vector<4x64xf32>
    %cst_123 = arith.constant 0.000000e+00 : f32
    %130 = vector.broadcast %cst_123 : f32 to vector<4x64xf32>
    %131 = arith.maximumf %129, %130 : vector<4x64xf32>
    %cst_124 = arith.constant 0.000000e+00 : f32
    %132 = vector.broadcast %cst_124 : f32 to vector<8x64xf32>
    %c0_125 = arith.constant 0 : index
    %c0_126 = arith.constant 0 : index
    %133 = vector.load %arg33[%c0_125, %c0_126] : memref<20x64xf32, #tpu.memory_space<vmem>>, vector<8x64xf32>
    tpu.vector_store %arg33[%c0_125, %c0_126], %132 {strides = array<i32>} : memref<20x64xf32, #tpu.memory_space<vmem>>, vector<8x64xf32>,
    %cst_127 = arith.constant 0.000000e+00 : f32
    %134 = vector.broadcast %cst_127 : f32 to vector<8x64xf32>
    %c12_128 = arith.constant 12 : index
    %c0_129 = arith.constant 0 : index
    %135 = vector.load %arg33[%c12_128, %c0_129] : memref<20x64xf32, #tpu.memory_space<vmem>>, vector<8x64xf32>
    tpu.vector_store %arg33[%c12_128, %c0_129], %134 {strides = array<i32>} : memref<20x64xf32, #tpu.memory_space<vmem>>, vector<8x64xf32>,
    %c8_130 = arith.constant 8 : index
    %c0_131 = arith.constant 0 : index
    %136 = vector.load %arg33[%c8_130, %c0_131] : memref<20x64xf32, #tpu.memory_space<vmem>>, vector<4x64xf32>
    tpu.vector_store %arg33[%c8_130, %c0_131], %131 {strides = array<i32>} : memref<20x64xf32, #tpu.memory_space<vmem>>, vector<4x64xf32>,
    %c5_132 = arith.constant 5 : index
    %c0_133 = arith.constant 0 : index
    %137 = vector.load %arg33[%c5_132, %c0_133] : memref<20x64xf32, #tpu.memory_space<vmem>>, vector<4x64xf32>
    %c6_134 = arith.constant 6 : index
    %c0_135 = arith.constant 0 : index
    %138 = vector.load %arg33[%c6_134, %c0_135] : memref<20x64xf32, #tpu.memory_space<vmem>>, vector<4x64xf32>
    %c7_136 = arith.constant 7 : index
    %c0_137 = arith.constant 0 : index
    %139 = vector.load %arg33[%c7_136, %c0_137] : memref<20x64xf32, #tpu.memory_space<vmem>>, vector<4x64xf32>
    %c7_138 = arith.constant 7 : index
    %c0_139 = arith.constant 0 : index
    %140 = vector.load %arg33[%c7_138, %c0_139] : memref<20x64xf32, #tpu.memory_space<vmem>>, vector<4x64xf32>
    %c8_140 = arith.constant 8 : index
    %c0_141 = arith.constant 0 : index
    %141 = vector.load %arg33[%c8_140, %c0_141] : memref<20x64xf32, #tpu.memory_space<vmem>>, vector<4x64xf32>
    %c9_142 = arith.constant 9 : index
    %c0_143 = arith.constant 0 : index
    %142 = vector.load %arg33[%c9_142, %c0_143] : memref<20x64xf32, #tpu.memory_space<vmem>>, vector<4x64xf32>
    %c9_144 = arith.constant 9 : index
    %c0_145 = arith.constant 0 : index
    %143 = vector.load %arg33[%c9_144, %c0_145] : memref<20x64xf32, #tpu.memory_space<vmem>>, vector<4x64xf32>
    %c10_146 = arith.constant 10 : index
    %c0_147 = arith.constant 0 : index
    %144 = vector.load %arg33[%c10_146, %c0_147] : memref<20x64xf32, #tpu.memory_space<vmem>>, vector<4x64xf32>
    %c11_148 = arith.constant 11 : index
    %c0_149 = arith.constant 0 : index
    %145 = vector.load %arg33[%c11_148, %c0_149] : memref<20x64xf32, #tpu.memory_space<vmem>>, vector<4x64xf32>
    %146 = tpu.concatenate %137, %138, %139, %140, %141, %142, %143, %144, %145 in 1 : vector<4x64xf32>, vector<4x64xf32>, vector<4x64xf32>, vector<4x64xf32>, vector<4x64xf32>, vector<4x64xf32>, vector<4x64xf32>, vector<4x64xf32>, vector<4x64xf32> -> vector<4x576xf32>
    %c0_150 = arith.constant 0 : index
    %c0_151 = arith.constant 0 : index
    %147 = vector.load %arg17[%c0_150, %c0_151] : memref<4x576xf32, #tpu.memory_space<vmem>>, vector<4x576xf32>
    %148 = arith.mulf %146, %147 : vector<4x576xf32>
    %149 = arith.truncf %148 : vector<4x576xf32> to vector<4x576xbf16>
    %c0_152 = arith.constant 0 : index
    %c0_153 = arith.constant 0 : index
    %150 = vector.load %arg7[%c0_152, %c0_153] : memref<576x32xbf16, #tpu.memory_space<vmem>>, vector<576x32xbf16>
    %cst_154 = arith.constant dense<0.000000e+00> : vector<4x32xf32>
    %151 = tpu.matmul %149, %150, %cst_154 {dimension_numbers = #tpu.dot_dimension_numbers<[1], [0], [0], [1], [0, 0, 1, 1], [], []>} : vector<4x576xbf16>, vector<576x32xbf16>, vector<4x32xf32> -> vector<4x32xf32>
    %c0_155 = arith.constant 0 : index
    %c0_156 = arith.constant 0 : index
    %152 = vector.load %arg12[%c0_155, %c0_156] : memref<1x32xf32, #tpu.memory_space<vmem>>, vector<1x32xf32>
    %153 = vector.broadcast %152 : vector<1x32xf32> to vector<4x32xf32>
    %154 = arith.addf %151, %153 : vector<4x32xf32>
    %cst_157 = arith.constant 0.000000e+00 : f32
    %155 = vector.broadcast %cst_157 : f32 to vector<4x32xf32>
    %156 = arith.maximumf %154, %155 : vector<4x32xf32>
    %157 = vector.extract_strided_slice %156 {offsets = [0, 0], sizes = [1, 32], strides = [1, 1]} : vector<4x32xf32> to vector<1x32xf32>
    %158 = vector.extract_strided_slice %156 {offsets = [1, 0], sizes = [1, 32], strides = [1, 1]} : vector<4x32xf32> to vector<1x32xf32>
    %159 = vector.extract_strided_slice %156 {offsets = [2, 0], sizes = [1, 32], strides = [1, 1]} : vector<4x32xf32> to vector<1x32xf32>
    %160 = vector.extract_strided_slice %156 {offsets = [3, 0], sizes = [1, 32], strides = [1, 1]} : vector<4x32xf32> to vector<1x32xf32>
    %c0_158 = arith.constant 0 : index
    %c0_159 = arith.constant 0 : index
    %c0_160 = arith.constant 0 : index
    %161 = vector.load %arg2[%c0_158, %c0_159, %c0_160] : memref<1x1x16xf32, #tpu.memory_space<vmem>>, vector<1x1x16xf32>
    %162 = vector.shape_cast %161 : vector<1x1x16xf32> to vector<1x16xf32>
    %163 = tpu.concatenate %157, %158, %159, %160, %162 in 1 : vector<1x32xf32>, vector<1x32xf32>, vector<1x32xf32>, vector<1x32xf32>, vector<1x16xf32> -> vector<1x144xf32>
    %164 = arith.truncf %163 : vector<1x144xf32> to vector<1x144xbf16>
    %c0_161 = arith.constant 0 : index
    %c0_162 = arith.constant 0 : index
    %165 = vector.load %arg21[%c0_161, %c0_162] : memref<144x128xbf16, #tpu.memory_space<vmem>>, vector<144x128xbf16>
    %cst_163 = arith.constant dense<0.000000e+00> : vector<1x128xf32>
    %166 = tpu.matmul %164, %165, %cst_163 {dimension_numbers = #tpu.dot_dimension_numbers<[1], [0], [0], [1], [0, 0, 1, 1], [], []>} : vector<1x144xbf16>, vector<144x128xbf16>, vector<1x128xf32> -> vector<1x128xf32>
    %c0_164 = arith.constant 0 : index
    %c0_165 = arith.constant 0 : index
    %167 = vector.load %arg22[%c0_164, %c0_165] : memref<1x128xf32, #tpu.memory_space<vmem>>, vector<1x128xf32>
    %168 = arith.addf %166, %167 : vector<1x128xf32>
    %cst_166 = arith.constant 0.000000e+00 : f32
    %169 = vector.broadcast %cst_166 : f32 to vector<1x128xf32>
    %170 = arith.maximumf %168, %169 : vector<1x128xf32>
    %171 = arith.truncf %170 : vector<1x128xf32> to vector<1x128xbf16>
    %c0_167 = arith.constant 0 : index
    %c0_168 = arith.constant 0 : index
    %172 = vector.load %arg23[%c0_167, %c0_168] : memref<128x256xbf16, #tpu.memory_space<vmem>>, vector<128x256xbf16>
    %cst_169 = arith.constant dense<0.000000e+00> : vector<1x256xf32>
    %173 = tpu.matmul %171, %172, %cst_169 {dimension_numbers = #tpu.dot_dimension_numbers<[1], [0], [0], [1], [0, 0, 1, 1], [], []>} : vector<1x128xbf16>, vector<128x256xbf16>, vector<1x256xf32> -> vector<1x256xf32>
    %c0_170 = arith.constant 0 : index
    %c0_171 = arith.constant 0 : index
    %174 = vector.load %arg24[%c0_170, %c0_171] : memref<1x256xf32, #tpu.memory_space<vmem>>, vector<1x256xf32>
    %175 = arith.addf %173, %174 : vector<1x256xf32>
    %cst_172 = arith.constant 0.000000e+00 : f32
    %176 = vector.broadcast %cst_172 : f32 to vector<1x256xf32>
    %177 = arith.maximumf %175, %176 : vector<1x256xf32>
    %178 = arith.truncf %177 : vector<1x256xf32> to vector<1x256xbf16>
    %c0_173 = arith.constant 0 : index
    %c0_174 = arith.constant 0 : index
    %179 = vector.load %arg25[%c0_173, %c0_174] : memref<256x128xbf16, #tpu.memory_space<vmem>>, vector<256x128xbf16>
    %cst_175 = arith.constant dense<0.000000e+00> : vector<1x128xf32>
    %180 = tpu.matmul %178, %179, %cst_175 {dimension_numbers = #tpu.dot_dimension_numbers<[1], [0], [0], [1], [0, 0, 1, 1], [], []>} : vector<1x256xbf16>, vector<256x128xbf16>, vector<1x128xf32> -> vector<1x128xf32>
    %c0_176 = arith.constant 0 : index
    %c0_177 = arith.constant 0 : index
    %181 = vector.load %arg26[%c0_176, %c0_177] : memref<1x128xf32, #tpu.memory_space<vmem>>, vector<1x128xf32>
    %182 = arith.addf %180, %181 : vector<1x128xf32>
    %c0_178 = arith.constant 0 : index
    %c0_179 = arith.constant 0 : index
    %c0_180 = arith.constant 0 : index
    %183 = vector.load %arg27[%c0_178, %c0_179, %c0_180] : memref<1x1x256xf32, #tpu.memory_space<vmem>>, vector<1x1x256xf32>
    %184 = vector.shape_cast %183 : vector<1x1x256xf32> to vector<1x256xf32>
    %185 = vector.shape_cast %177 : vector<1x256xf32> to vector<1x1x256xf32>
    tpu.vector_store %arg27[%c0_178, %c0_179, %c0_180], %185 {strides = array<i32>} : memref<1x1x256xf32, #tpu.memory_space<vmem>>, vector<1x1x256xf32>,
    %c0_181 = arith.constant 0 : index
    %c0_182 = arith.constant 0 : index
    %c0_183 = arith.constant 0 : index
    %186 = vector.load %arg28[%c0_181, %c0_182, %c0_183] : memref<1x1x128xf32, #tpu.memory_space<vmem>>, vector<1x1x128xf32>
    %187 = vector.shape_cast %186 : vector<1x1x128xf32> to vector<1x128xf32>
    %188 = vector.shape_cast %182 : vector<1x128xf32> to vector<1x1x128xf32>
    tpu.vector_store %arg28[%c0_181, %c0_182, %c0_183], %188 {strides = array<i32>} : memref<1x1x128xf32, #tpu.memory_space<vmem>>, vector<1x1x128xf32>,
    return
  }
  func.func @transform_0(%arg0: i32) -> (i32, i32, i32) {
    %c0_i32 = arith.constant 0 : i32
    %c0_i32_0 = arith.constant 0 : i32
    %c0_i32_1 = arith.constant 0 : i32
    return %arg0, %c0_i32, %c0_i32_0 : i32, i32, i32
  }
  func.func @transform_1(%arg0: i32) -> (i32, i32, i32) {
    %c0_i32 = arith.constant 0 : i32
    %c0_i32_0 = arith.constant 0 : i32
    %c0_i32_1 = arith.constant 0 : i32
    return %arg0, %c0_i32, %c0_i32_0 : i32, i32, i32
  }
  func.func @transform_2(%arg0: i32) -> (i32, i32) {
    %c0_i32 = arith.constant 0 : i32
    %c0_i32_0 = arith.constant 0 : i32
    %c0_i32_1 = arith.constant 0 : i32
    return %c0_i32, %c0_i32_0 : i32, i32
  }
  func.func @transform_3(%arg0: i32) -> (i32, i32) {
    %c0_i32 = arith.constant 0 : i32
    %c0_i32_0 = arith.constant 0 : i32
    %c0_i32_1 = arith.constant 0 : i32
    return %c0_i32, %c0_i32_0 : i32, i32
  }
  func.func @transform_4(%arg0: i32) -> (i32, i32) {
    %c0_i32 = arith.constant 0 : i32
    %c0_i32_0 = arith.constant 0 : i32
    %c0_i32_1 = arith.constant 0 : i32
    return %c0_i32, %c0_i32_0 : i32, i32
  }
  func.func @transform_5(%arg0: i32) -> (i32, i32) {
    %c0_i32 = arith.constant 0 : i32
    %c0_i32_0 = arith.constant 0 : i32
    %c0_i32_1 = arith.constant 0 : i32
    return %c0_i32, %c0_i32_0 : i32, i32
  }
  func.func @transform_6(%arg0: i32) -> (i32, i32) {
    %c0_i32 = arith.constant 0 : i32
    %c0_i32_0 = arith.constant 0 : i32
    %c0_i32_1 = arith.constant 0 : i32
    return %c0_i32, %c0_i32_0 : i32, i32
  }
  func.func @transform_7(%arg0: i32) -> (i32, i32) {
    %c0_i32 = arith.constant 0 : i32
    %c0_i32_0 = arith.constant 0 : i32
    %c0_i32_1 = arith.constant 0 : i32
    return %c0_i32, %c0_i32_0 : i32, i32
  }
  func.func @transform_8(%arg0: i32) -> (i32, i32) {
    %c0_i32 = arith.constant 0 : i32
    %c0_i32_0 = arith.constant 0 : i32
    %c0_i32_1 = arith.constant 0 : i32
    return %c0_i32, %c0_i32_0 : i32, i32
  }
  func.func @transform_9(%arg0: i32) -> (i32, i32) {
    %c0_i32 = arith.constant 0 : i32
    %c0_i32_0 = arith.constant 0 : i32
    %c0_i32_1 = arith.constant 0 : i32
    return %c0_i32, %c0_i32_0 : i32, i32
  }
  func.func @transform_10(%arg0: i32) -> (i32, i32) {
    %c0_i32 = arith.constant 0 : i32
    %c0_i32_0 = arith.constant 0 : i32
    %c0_i32_1 = arith.constant 0 : i32
    return %c0_i32, %c0_i32_0 : i32, i32
  }
  func.func @transform_11(%arg0: i32) -> (i32, i32) {
    %c0_i32 = arith.constant 0 : i32
    %c0_i32_0 = arith.constant 0 : i32
    %c0_i32_1 = arith.constant 0 : i32
    return %c0_i32, %c0_i32_0 : i32, i32
  }
  func.func @transform_12(%arg0: i32) -> (i32, i32) {
    %c0_i32 = arith.constant 0 : i32
    %c0_i32_0 = arith.constant 0 : i32
    %c0_i32_1 = arith.constant 0 : i32
    return %c0_i32, %c0_i32_0 : i32, i32
  }
  func.func @transform_13(%arg0: i32) -> (i32, i32) {
    %c0_i32 = arith.constant 0 : i32
    %c0_i32_0 = arith.constant 0 : i32
    %c0_i32_1 = arith.constant 0 : i32
    return %c0_i32, %c0_i32_0 : i32, i32
  }
  func.func @transform_14(%arg0: i32) -> (i32, i32) {
    %c0_i32 = arith.constant 0 : i32
    %c0_i32_0 = arith.constant 0 : i32
    %c0_i32_1 = arith.constant 0 : i32
    return %c0_i32, %c0_i32_0 : i32, i32
  }
  func.func @transform_15(%arg0: i32) -> (i32, i32) {
    %c0_i32 = arith.constant 0 : i32
    %c0_i32_0 = arith.constant 0 : i32
    %c0_i32_1 = arith.constant 0 : i32
    return %c0_i32, %c0_i32_0 : i32, i32
  }
  func.func @transform_16(%arg0: i32) -> (i32, i32) {
    %c0_i32 = arith.constant 0 : i32
    %c0_i32_0 = arith.constant 0 : i32
    %c0_i32_1 = arith.constant 0 : i32
    return %c0_i32, %c0_i32_0 : i32, i32
  }
  func.func @transform_17(%arg0: i32) -> (i32, i32) {
    %c0_i32 = arith.constant 0 : i32
    %c0_i32_0 = arith.constant 0 : i32
    %c0_i32_1 = arith.constant 0 : i32
    return %c0_i32, %c0_i32_0 : i32, i32
  }
  func.func @transform_18(%arg0: i32) -> (i32, i32) {
    %c0_i32 = arith.constant 0 : i32
    %c0_i32_0 = arith.constant 0 : i32
    %c0_i32_1 = arith.constant 0 : i32
    return %c0_i32, %c0_i32_0 : i32, i32
  }
  func.func @transform_19(%arg0: i32) -> (i32, i32) {
    %c0_i32 = arith.constant 0 : i32
    %c0_i32_0 = arith.constant 0 : i32
    %c0_i32_1 = arith.constant 0 : i32
    return %c0_i32, %c0_i32_0 : i32, i32
  }
  func.func @transform_20(%arg0: i32) -> (i32, i32) {
    %c0_i32 = arith.constant 0 : i32
    %c0_i32_0 = arith.constant 0 : i32
    %c0_i32_1 = arith.constant 0 : i32
    return %c0_i32, %c0_i32_0 : i32, i32
  }
  func.func @transform_21(%arg0: i32) -> (i32, i32) {
    %c0_i32 = arith.constant 0 : i32
    %c0_i32_0 = arith.constant 0 : i32
    %c0_i32_1 = arith.constant 0 : i32
    return %c0_i32, %c0_i32_0 : i32, i32
  }
  func.func @transform_22(%arg0: i32) -> (i32, i32) {
    %c0_i32 = arith.constant 0 : i32
    %c0_i32_0 = arith.constant 0 : i32
    %c0_i32_1 = arith.constant 0 : i32
    return %c0_i32, %c0_i32_0 : i32, i32
  }
  func.func @transform_23(%arg0: i32) -> (i32, i32) {
    %c0_i32 = arith.constant 0 : i32
    %c0_i32_0 = arith.constant 0 : i32
    %c0_i32_1 = arith.constant 0 : i32
    return %c0_i32, %c0_i32_0 : i32, i32
  }
  func.func @transform_24(%arg0: i32) -> (i32, i32) {
    %c0_i32 = arith.constant 0 : i32
    %c0_i32_0 = arith.constant 0 : i32
    %c0_i32_1 = arith.constant 0 : i32
    return %c0_i32, %c0_i32_0 : i32, i32
  }
  func.func @transform_25(%arg0: i32) -> (i32, i32) {
    %c0_i32 = arith.constant 0 : i32
    %c0_i32_0 = arith.constant 0 : i32
    %c0_i32_1 = arith.constant 0 : i32
    return %c0_i32, %c0_i32_0 : i32, i32
  }
  func.func @transform_26(%arg0: i32) -> (i32, i32, i32) {
    %c0_i32 = arith.constant 0 : i32
    %c0_i32_0 = arith.constant 0 : i32
    %c0_i32_1 = arith.constant 0 : i32
    return %arg0, %c0_i32, %c0_i32_0 : i32, i32, i32
  }
  func.func @transform_27(%arg0: i32) -> (i32, i32, i32) {
    %c0_i32 = arith.constant 0 : i32
    %c0_i32_0 = arith.constant 0 : i32
    %c0_i32_1 = arith.constant 0 : i32
    return %arg0, %c0_i32, %c0_i32_0 : i32, i32, i32
  }
}

</mosaic_0001>

<bundles_post_ra>
// kernel: rl_policy_forward.1
= control target key start
LH: loop header
LB: loop body
LE: loop exit
PB: predicated region body
PF: predicated region fallthrough
CT: control target
= control target key end

     0   :  { %s10010_s0 = inlined_call_operand.vmem [shape: f32[2,256,24], index: 0, kind: input, shape index: {}]   ;;  %s10011_s1 = inlined_call_operand.vmem [shape: f32[2,1,16], index: 1, kind: input, shape index: {}]   ;;  %s10012_s2 = inlined_call_operand.vmem [shape: bf16[216,32], index: 2, kind: input, shape index: {}]   ;;  %s10013_s3 = inlined_call_operand.vmem [shape: bf16[288,64], index: 3, kind: input, shape index: {}]   ;;  %s10014_s4 = inlined_call_operand.vmem [shape: bf16[576,128], index: 4, kind: input, shape index: {}]   ;;  %s10015_s5 = inlined_call_operand.vmem [shape: bf16[1152,64], index: 5, kind: input, shape index: {}]   ;;  %s10016_s6 = inlined_call_operand.vmem [shape: bf16[576,32], index: 6, kind: input, shape index: {}]   ;;  %s10017_s7 = inlined_call_operand.vmem [shape: f32[1,32], index: 7, kind: input, shape index: {}]   ;;  %s10018_s8 = inlined_call_operand.vmem [shape: f32[1,64], index: 8, kind: input, shape index: {}]   ;;  %s10019_s9 = inlined_call_operand.vmem [shape: f32[1,128], index: 9, kind: input, shape index: {}]   ;;  %s10020_s10 = inlined_call_operand.vmem [shape: f32[1,64], index: 10, kind: input, shape index: {}]   ;;  %s10021_s11 = inlined_call_operand.vmem [shape: f32[1,32], index: 11, kind: input, shape index: {}]   ;;  %s10022_s12 = inlined_call_operand.vmem [shape: f32[256,216], index: 12, kind: input, shape index: {}]   ;;  %s10023_s13 = inlined_call_operand.vmem [shape: f32[64,288], index: 13, kind: input, shape index: {}]   ;;  %s10024_s14 = inlined_call_operand.vmem [shape: f32[16,576], index: 14, kind: input, shape index: {}]   ;;  %s10025_s15 = inlined_call_operand.vmem [shape: f32[4,1152], index: 15, kind: input, shape index: {}]   ;;  %s10026_s16 = inlined_call_operand.vmem [shape: f32[4,576], index: 16, kind: input, shape index: {}]   ;;  %s10027_s17 = inlined_call_operand.vmem [shape: bf16[256,256], index: 17, kind: input, shape index: {}]   ;;  %s10028_s18 = inlined_call_operand.vmem [shape: bf16[64,64], index: 18, kind: input, shape index: {}]   ;;  %s10029_s19 = inlined_call_operand.vmem [shape: bf16[16,16], index: 19, kind: input, shape index: {}]   ;;  %s10030_s20 = inlined_call_operand.vmem [shape: bf16[144,128], index: 20, kind: input, shape index: {}]   ;;  %s10031_s21 = inlined_call_operand.vmem [shape: f32[1,128], index: 21, kind: input, shape index: {}]   ;;  %s10032_s22 = inlined_call_operand.vmem [shape: bf16[128,256], index: 22, kind: input, shape index: {}]   ;;  %s10033_s23 = inlined_call_operand.vmem [shape: f32[1,256], index: 23, kind: input, shape index: {}]   ;;  %s10034_s24 = inlined_call_operand.vmem [shape: bf16[256,128], index: 24, kind: input, shape index: {}]   ;;  %s10035_s25 = inlined_call_operand.vmem [shape: f32[1,128], index: 25, kind: input, shape index: {}]   ;;  %s10036_s26 = inlined_call_operand.vmem [shape: f32[2,1,256], index: 26, kind: output, shape index: {0}]   ;;  %s10037_s27 = inlined_call_operand.vmem [shape: f32[2,1,128], index: 27, kind: output, shape index: {1}]  }
   0x1   :  { %10065 = sst [smem:[#allocation8_spill]] %s10010_s0 }
   0x2   :  { %10066 = sst [smem:[#allocation9_spill]] %s10011_s1 }
   0x3   :  { %10067 = sst [smem:[#allocation10_spill]] %s10012_s2 }
   0x4   :  { %10068 = sst [smem:[#allocation11_spill]] %s10013_s3 }
   0x5   :  { %10069 = sst [smem:[#allocation12_spill]] %s10014_s4 }
   0x6   :  { %10070 = sst [smem:[#allocation13_spill]] %s10015_s5 }
   0x7   :  { %10071 = sst [smem:[#allocation14_spill]] %s10016_s6 }
   0x8   :  { %10072 = sst [smem:[#allocation15_spill]] %s10017_s7  ;;  %s7499_s7 = smov 0  }
   0x9   :  { %10073 = sst [smem:[#allocation16_spill]] %s10018_s8 }
   0xa   :  { %10074 = sst [smem:[#allocation17_spill]] %s10019_s9 }
   0xb   :  { %10075 = sst [smem:[#allocation18_spill]] %s10020_s10 }
   0xc   :  { %10076 = sst [smem:[#allocation19_spill]] %s10021_s11 }
   0xd   :  { %10077 = sst [smem:[#allocation20_spill]] %s10022_s12 }
   0xe   :  { %10078 = sst [smem:[#allocation21_spill]] %s10037_s27 }
   0xf LB: > { %10079 = sst [smem:[#allocation7_spill]] %s7344_s7  ;;  %s6241_s4 = sadd.s32 4294967295, %s7344_s7   ;;  %s7344_s7 = sphi %s7499_s7, %s38_s7  }
  0x10   : > { %p6245_p0 = scmp.ge.s32.totalorder %s7344_s7, 1  ;;  %p748_p1 = scmp.lt.s32.totalorder %s7344_s7, 3 }
  0x12   : > { %p749_p2 = pnand %p6245_p0, %p748_p1 }
  0x13   : > { %vm873_vm0 = vcmask (!%p749_p2), 195584   ;;  %s10080_s9 = sld [smem:[#allocation10_spill]] (!%p749_p2)  ;;  %v7346_v1 = vmov (!%p749_p2), 0.0   ;;  %p825_p3 = scmp.lt.s32.totalorder (!%p749_p2), %s6241_s4, 1  ;;  %v7347_v2 = vmov (!%p749_p2), 0   ;;  %vm2124_vm1 = vcmask (!%p749_p2), 523264  }
  0x14   : > { %752 = sbr.rel (%p749_p2) target bundleno = 3892 (0xf34), region = 124  ;;  %875 = vst.msk [vmem:[#allocation2 + $0x8] sm:$0xff] (!%p749_p2), %vm873_vm0, %v7346_v1  ;;  %874 = vst.msk [vmem:[#allocation2] sm:$0xff] (!%p749_p2), %vm873_vm0, %v7346_v1  ;;  %2485 = vmatprep.subr.bf16.mxu0 (!%p749_p2), %v7347_v2  ;;  %s10081_s1 = sld [smem:[#allocation8_spill]] (!%p749_p2)  ;;  %vm2481_vm2 = vcmask (!%p749_p2), 1043456   ;;  %vm1926_vm3 = vcmask (!%p749_p2), 392192  }
  0x15   : > { %876 = vst.msk [vmem:[#allocation2 + $0x10] sm:$0xff] (!%p749_p2), %vm873_vm0, %v7346_v1  ;;  %877 = vst.msk [vmem:[#allocation2 + $0x118] sm:$0xff] (!%p749_p2), %vm873_vm0, %v7346_v1  ;;  %s10054_s30 = smov (!%p749_p2), 24   ;;  %s10052_s5 = smov (!%p749_p2), 48   ;;  %vm1959_vm4 = vcmask (!%p749_p2), 588800   ;;  %vm2058_vm5 = vcmask (!%p749_p2), 130048  }
  0x16   : > { %878 = vst.msk [vmem:[#allocation2 + $0x120] sm:$0xff] (!%p749_p2), %vm873_vm0, %v7346_v1  ;;  %879 = vst.msk [vmem:[#allocation2 + $0x128] sm:$0xff] (!%p749_p2), %vm873_vm0, %v7346_v1  ;;  %s10050_s10 = smov (!%p749_p2), 120   ;;  %s10058_s11 = smov (!%p749_p2), 16   ;;  %vm1992_vm6 = vcmask (!%p749_p2), 785408   ;;  %vm2091_vm7 = vcmask (!%p749_p2), 326656  }
  0x17   : > { %4373 = vst [vmem:[#allocation5] sm:$0xff] (!%p749_p2), %v7346_v1  ;;  %4374 = vst [vmem:[#allocation5 + $0xc] sm:$0xff] (!%p749_p2), %v7346_v1  ;;  %s10044_s29 = smov (!%p749_p2), 40   ;;  %s10046_s3 = smov (!%p749_p2), 96   ;;  %vm2025_vm8 = vcmask (!%p749_p2), 982016   ;;  %vm2432_vm9 = vcmask (!%p749_p2), 719872  }
  0x18   : > { %3810 = vst.msk [vmem:[#allocation4] sm:$0xff] (!%p749_p2), %vm2124_vm1, %v7346_v1  ;;  %3811 = vst.msk [vmem:[#allocation4 + $0x18] sm:$0xff] (!%p749_p2), %vm2124_vm1, %v7346_v1  ;;  %s10084_s8 = smov (!%p749_p2), 96   ;;  %s10085_s12 = sld [smem:[#allocation20_spill]] (!%p749_p2)  ;;  %vm3071_vm10 = vcmask (!%p749_p2), 261120   ;;  %vm7357_vm11 = vmmov (!%p749_p2), 0  }
  0x19   : > { %v7039_v0 = vld [vmem:[%s10080_s9] sm:$0xff] (!%p749_p2)   ;;  %v7040_v3 = vld [vmem:[%s10080_s9 + $0x8] sm:$0xff] (!%p749_p2)   ;;  %v7041_v4 = vld [vmem:[%s10080_s9 + $0x10] sm:$0xff] (!%p749_p2)   ;;  %5202 = vst.msk [vmem:[#allocation6] sm:$0xff] (!%p749_p2), %vm2124_vm1, %v7346_v1  ;;  %s10089_s2 = smov (!%p749_p2), 16   ;;  %s10090_s7 = smov (!%p749_p2), 64  }
  0x1a   : > { %2486 = vmatpush1.bf16.msra.mxu0 (!%p749_p2), %v7039_v0  ;;  %v7042_v10 = vld [vmem:[%s10080_s9 + $0x18] sm:$0xff] (!%p749_p2)   ;;  %v7043_v19 = vld [vmem:[%s10080_s9 + $0x20] sm:$0xff] (!%p749_p2)   ;;  %v7044_v25 = vld [vmem:[%s10080_s9 + $0x28] sm:$0xff] (!%p749_p2)   ;;  %5203 = vst.msk [vmem:[#allocation6 + $0xc] sm:$0xff] (!%p749_p2), %vm2124_vm1, %v7346_v1  ;;  %s10062_s28 = smov (!%p749_p2), 32   ;;  %vm5204_vm12 = vcmask (!%p749_p2), 519168  }
  0x1b   : > { %s10105_s4 = smov (!%p825_p3, %s6241_s4), 1  ;;  %2487 = vmatprep.subr.bf16.mxu0 %v7347_v2  ;;  %v944_v8 = vld [vmem:[#allocation2 + $0x8] sm:$0xff]  ;;  %v7045_v28 = vld [vmem:[%s10080_s9 + $0x30] sm:$0xff]   ;;  %v7046_v29 = vld [vmem:[%s10080_s9 + $0x38] sm:$0xff]  }
  0x1c   : > { %s6538_s0 = sshll.u32 %s10105_s4, 8  ;;  %v976_v9 = vld [vmem:[#allocation2 + $0x9] sm:$0xff]  ;;  %1052 = vrot.lane.b32.xlu0 %v944_v8, %s10054_s30  ;;  %v7047_v34 = vld [vmem:[%s10080_s9 + $0x40] sm:$0xff]   ;;  %v7050_v42 = vld [vmem:[%s10080_s9 + $0x58] sm:$0xff]  }
  0x1d   : > { %s7535_s6 = scalar_lea.vmem %s10081_s1, %s6538_s0  ;;  %1180 = vrot.lane.b32.xlu1 %v976_v9, %s10052_s5  ;;  %v945_v11 = vld [vmem:[#allocation2 + $0x10] sm:$0xff]  ;;  %s10048_s0 = smov 72   ;;  %v7048_v38 = vld [vmem:[%s10080_s9 + $0x48] sm:$0xff]   ;;  %v7051_v44 = vld [vmem:[%s10080_s9 + $0x60] sm:$0xff]  }
  0x1e   : > { %2488 = vmatpush1.bf16.msra.mxu0 %v7040_v3  ;;  %v841_v5 = vld [vmem:[%s7535_s6] sm:$0xff]  ;;  %v842_v6 = vld [vmem:[%s7535_s6 + $0x8] sm:$0xff]  ;;  %v843_v7 = vld [vmem:[%s7535_s6 + $0x10] sm:$0xff]  ;;  %s10056_s1 = smov 64  }
  0x1f   : > { %2489 = vmatprep.subr.bf16.mxu0 %v7347_v2  ;;  %880 = vst.msk [vmem:[#allocation2 + $0x18] sm:$0xff] %vm873_vm0, %v841_v5  ;;  %881 = vst.msk [vmem:[#allocation2 + $0x20] sm:$0xff] %vm873_vm0, %v842_v6  ;;  %v844_v12 = vld [vmem:[%s7535_s6 + $0x18] sm:$0xff]  ;;  %v845_v13 = vld [vmem:[%s7535_s6 + $0x20] sm:$0xff] }
  0x20   : > { %882 = vst.msk [vmem:[#allocation2 + $0x28] sm:$0xff] %vm873_vm0, %v843_v7  ;;  %883 = vst.msk [vmem:[#allocation2 + $0x30] sm:$0xff] %vm873_vm0, %v844_v12  ;;  %v846_v14 = vld [vmem:[%s7535_s6 + $0x28] sm:$0xff]  ;;  %v847_v15 = vld [vmem:[%s7535_s6 + $0x30] sm:$0xff]  ;;  %1054 = vrot.lane.b32.xlu0 %v945_v11, %s10054_s30 }
  0x21   : > { %884 = vst.msk [vmem:[#allocation2 + $0x38] sm:$0xff] %vm873_vm0, %v845_v13  ;;  %v848_v16 = vld [vmem:[%s7535_s6 + $0x38] sm:$0xff]  ;;  %885 = vst.msk [vmem:[#allocation2 + $0x40] sm:$0xff] %vm873_vm0, %v846_v14  ;;  %v849_v17 = vld [vmem:[%s7535_s6 + $0x40] sm:$0xff] }
  0x22   : > { %2490 = vmatpush1.bf16.msra.mxu0 %v7041_v4  ;;  %886 = vst.msk [vmem:[#allocation2 + $0x48] sm:$0xff] %vm873_vm0, %v847_v15  ;;  %887 = vst.msk [vmem:[#allocation2 + $0x50] sm:$0xff] %vm873_vm0, %v848_v16  ;;  %v850_v18 = vld [vmem:[%s7535_s6 + $0x48] sm:$0xff]  ;;  %v851_v20 = vld [vmem:[%s7535_s6 + $0x50] sm:$0xff] }
  0x23   : > { %2491 = vmatprep.subr.bf16.mxu0 %v7347_v2  ;;  %888 = vst.msk [vmem:[#allocation2 + $0x58] sm:$0xff] %vm873_vm0, %v849_v17  ;;  %889 = vst.msk [vmem:[#allocation2 + $0x60] sm:$0xff] %vm873_vm0, %v850_v18  ;;  %v852_v35 = vld [vmem:[%s7535_s6 + $0x58] sm:$0xff]  ;;  %v853_v39 = vld [vmem:[%s7535_s6 + $0x60] sm:$0xff] }
  0x24   : > { %890 = vst.msk [vmem:[#allocation2 + $0x68] sm:$0xff] %vm873_vm0, %v851_v20  ;;  %891 = vst.msk [vmem:[#allocation2 + $0x70] sm:$0xff] %vm873_vm0, %v852_v35  ;;  %v7049_v41 = vld [vmem:[%s10080_s9 + $0x50] sm:$0xff]   ;;  %v7052_v43 = vld [vmem:[%s10080_s9 + $0x68] ss:$0 sps:$4 sm:$0xff]   ;;  %s10098_s9 = sld [smem:[#allocation18_spill]] }
  0x25   : > { %892 = vst.msk [vmem:[#allocation2 + $0x78] sm:$0xff] %vm873_vm0, %v853_v39  ;;  %v2483_v45 = vsel %vm2481_vm2, %v7052_v43, 0  ;;  %v854_v46 = vld [vmem:[%s7535_s6 + $0x68] sm:$0xff]  ;;  %v855_v51 = vld [vmem:[%s7535_s6 + $0x70] sm:$0xff]  ;;  %v856_v54 = vld [vmem:[%s7535_s6 + $0x78] sm:$0xff] }
  0x26   : > { %2492 = vmatpush1.bf16.msra.mxu0 %v7042_v10  ;;  %v977_v21 = vld [vmem:[#allocation2 + $0x11] sm:$0xff]  ;;  %v7572_v22 = vld [vmem:[#allocation2 + $0x19] sm:$0xff]  ;;  %893 = vst.msk [vmem:[#allocation2 + $0x80] sm:$0xff] %vm873_vm0, %v854_v46  ;;  %894 = vst.msk [vmem:[#allocation2 + $0x88] sm:$0xff] %vm873_vm0, %v855_v51 }
  0x27   : > { %2493 = vmatprep.subr.bf16.mxu0 %v7347_v2  ;;  %1182 = vrot.lane.b32.xlu1 %v977_v21, %s10052_s5  ;;  %v7579_v23 = vld [vmem:[#allocation2 + $0x21] sm:$0xff]  ;;  %v7591_v26 = vld [vmem:[#allocation2 + $0x2f] sm:$0xff]  ;;  %v914_v27 = vld [vmem:[#allocation2 + $0x17] sm:$0xff]  ;;  %895 = vst.msk [vmem:[#allocation2 + $0x90] sm:$0xff] %vm873_vm0, %v856_v54 }
  0x28   : > { %1504 = vrot.lane.b32.xlu0 %v7572_v22, %s10050_s10  ;;  %v7581_v24 = vld [vmem:[#allocation2 + $0x27] sm:$0xff]  ;;  %v915_v30 = vld [vmem:[#allocation2 + $0x1f] sm:$0xff]  ;;  %v7617_v32 = vld [vmem:[#allocation2 + $0x30] sm:$0xff] }
  0x29   : > { %v7611_v31 = vld [vmem:[#allocation2 + $0x28] sm:$0xff]  ;;  %v946_v33 = vld [vmem:[#allocation2 + $0x18] sm:$0xff]  ;;  %v947_v36 = vld [vmem:[#allocation2 + $0x20] sm:$0xff] }
  0x2a   : > { %2494 = vmatpush1.bf16.msra.mxu0 %v7043_v19  ;;  %v980_v37 = vld [vmem:[#allocation2 + $0x29] sm:$0xff]  ;;  %v981_v40 = vld [vmem:[#allocation2 + $0x31] sm:$0xff]  ;;  %v919_v48 = vld [vmem:[#allocation2 + $0x3f] sm:$0xff] }
  0x2b   : > { %2495 = vmatprep.subr.bf16.mxu0 %v7347_v2  ;;  %1506 = vrot.lane.b32.xlu1 %v7579_v23, %s10050_s10  ;;  %v918_v47 = vld [vmem:[#allocation2 + $0x37] sm:$0xff]  ;;  %v951_v50 = vld [vmem:[#allocation2 + $0x40] sm:$0xff]  ;;  %v921_v56 = vld [vmem:[#allocation2 + $0x4f] sm:$0xff] }
  0x2c   : > { %1602 = vrot.lane.b32.xlu0 %v7581_v24, %s10058_s11  ;;  %v950_v49 = vld [vmem:[#allocation2 + $0x38] sm:$0xff]  ;;  %v983_v53 = vld [vmem:[#allocation2 + $0x41] sm:$0xff]  ;;  %v953_v58 = vld [vmem:[#allocation2 + $0x50] sm:$0xff] }
  0x2d   : > { %v982_v52 = vld [vmem:[#allocation2 + $0x39] sm:$0xff]  ;;  %v920_v55 = vld [vmem:[#allocation2 + $0x47] sm:$0xff]  ;;  %v985_v61 = vld [vmem:[#allocation2 + $0x51] sm:$0xff] }
  0x2e   : > { %2496 = vmatpush1.bf16.msra.mxu0 %v7044_v25  ;;  %v952_v57 = vld [vmem:[#allocation2 + $0x48] sm:$0xff]  ;;  %v857_v59 = vld [vmem:[%s7535_s6 + $0x80] sm:$0xff]  ;;  %v7706_v63 = vld [vmem:[#allocation2 + $0x57] sm:$0xff] }
  0x2f   : > { %2497 = vmatprep.subr.bf16.mxu0 %v7347_v2  ;;  %1604 = vrot.lane.b32.xlu1 %v7591_v26, %s10058_s11  ;;  %v984_v60 = vld [vmem:[#allocation2 + $0x49] sm:$0xff]  ;;  %896 = vst.msk [vmem:[#allocation2 + $0x98] sm:$0xff] %vm873_vm0, %v857_v59  ;;  %v7713_v0 = vld [vmem:[#allocation2 + $0x5f] sm:$0xff] }
  0x30   : > { %1308 = vrot.lane.b32.xlu0 %v914_v27, %s10048_s0  ;;  %v858_v62 = vld [vmem:[%s7535_s6 + $0x88] sm:$0xff]  ;;  %v7718_v1 = vld [vmem:[#allocation2 + $0x58] sm:$0xff]  ;;  %v7723_v5 = vld [vmem:[#allocation2 + $0x60] sm:$0xff] }
  0x31   : > { %897 = vst.msk [vmem:[#allocation2 + $0xa0] sm:$0xff] %vm873_vm0, %v858_v62  ;;  %v859_v7 = vld [vmem:[%s7535_s6 + $0x90] sm:$0xff]  ;;  %v7728_v8 = vld [vmem:[#allocation2 + $0x59] sm:$0xff]  ;;  %v7735_v11 = vld [vmem:[#allocation2 + $0x61] sm:$0xff] }
  0x32   : > { %2498 = vmatpush1.bf16.msra.mxu0 %v7045_v28  ;;  %898 = vst.msk [vmem:[#allocation2 + $0xa8] sm:$0xff] %vm873_vm0, %v859_v7  ;;  %v912_v16 = vld [vmem:[#allocation2 + $0x7] sm:$0xff]  ;;  %v913_v17 = vld [vmem:[#allocation2 + $0xf] sm:$0xff]  ;;  %v860_v20 = vld [vmem:[%s7535_s6 + $0x98] sm:$0xff] }
  0x33   : > { %2499 = vmatprep.subr.bf16.mxu0 %v7347_v2  ;;  %1310 = vrot.lane.b32.xlu1 %v915_v30, %s10048_s0  ;;  %s10082_s0 = smov 72   ;;  %v7744_v21 = vld [vmem:[#allocation2 + $0x67] sm:$0xff]  ;;  %899 = vst.msk [vmem:[#allocation2 + $0xb0] sm:$0xff] %vm873_vm0, %v860_v20  ;;  %v7757_v28 = vld [vmem:[#allocation2 + $0x6f] sm:$0xff]  ;;  %v2160_v43 = vld [vmem:[%s10085_s12 + $0x18] sm:$0xff] }
  0x34   : > { %1700 = vrot.lane.b32.xlu0 %v7611_v31, %s10044_s29  ;;  %v2157_v39 = vld [vmem:[%s10085_s12] sm:$0xff]  ;;  %v7793_v54 = vld [vmem:[#allocation2 + $0x70] sm:$0xff] }
  0x35   : > { %v861_v59 = vld [vmem:[%s7535_s6 + $0xa0] sm:$0xff]  ;;  %v2163_v20 = vld [vmem:[%s10085_s12 + $0x30] sm:$0xff] }
  0x36   : > { %2500 = vmatpush1.bf16.msra.mxu0 %v7046_v29  ;;  %900 = vst.msk [vmem:[#allocation2 + $0xb8] sm:$0xff] %vm873_vm0, %v861_v59 }
  0x37   : > { %2501 = vmatprep.subr.bf16.mxu0 %v7347_v2  ;;  %1702 = vrot.lane.b32.xlu1 %v7617_v32, %s10044_s29  ;;  %s10091_s29 = sld [smem:[#allocation15_spill]] }
  0x38   : > { %1406 = vrot.lane.b32.xlu0 %v946_v33, %s10046_s3 }
  0x3a   : > { %2502 = vmatpush1.bf16.msra.mxu0 %v7047_v34 }
  0x3b   : > { %2503 = vmatprep.subr.bf16.mxu0 %v7347_v2  ;;  %1408 = vrot.lane.b32.xlu1 %v947_v36, %s10046_s3  ;;  %s10083_s3 = smov 40  }
  0x3c   : > { %1798 = vrot.lane.b32.xlu0 %v980_v37, %s10056_s1 }
  0x3e   : > { %2504 = vmatpush1.bf16.msra.mxu0 %v7048_v38 }
  0x3f   : > { %2505 = vmatprep.subr.bf16.mxu0 %v7347_v2  ;;  %1800 = vrot.lane.b32.xlu1 %v981_v40, %s10056_s1 }
  0x40   : > { %1056 = vrot.lane.b32.xlu0 %v946_v33, %s10054_s30 }
  0x42   : > { %2506 = vmatpush1.bf16.msra.mxu0 %v7049_v41 }
  0x43   : > { %2507 = vmatprep.subr.bf16.mxu0 %v7347_v2  ;;  %1058 = vrot.lane.b32.xlu1 %v947_v36, %s10054_s30  ;;  %v2158_v36 = vld [vmem:[%s10085_s12 + $0x8] sm:$0xff] }
  0x44   : > { %1184 = vrot.lane.b32.xlu0 %v7572_v22, %s10052_s5 }
  0x46   : > { %2508 = vmatpush1.bf16.msra.mxu0 %v7050_v42 }
  0x47   : > { %2509 = vmatprep.subr.bf16.mxu0 %v7347_v2  ;;  %1186 = vrot.lane.b32.xlu1 %v7579_v23, %s10052_s5 }
  0x48   : > { %1508 = vrot.lane.b32.xlu0 %v980_v37, %s10050_s10 }
  0x4a   : > { %2510 = vmatpush1.bf16.msra.mxu0 %v7051_v44  ;;  %v7784_v44 = vld [vmem:[#allocation2 + $0x68] sm:$0xff] }
  0x4b   : > { %2511 = vmatprep.subr.bf16.mxu0 %v7347_v2  ;;  %1510 = vrot.lane.b32.xlu1 %v981_v40, %s10050_s10 }
  0x4c   : > { %1606 = vrot.lane.b32.xlu0 %v918_v47, %s10058_s11 }
  0x4e   : > { %2512 = vmatpush1.bf16.msra.mxu0 %v2483_v45 }
  0x4f   : > { %1608 = vrot.lane.b32.xlu1 %v919_v48, %s10058_s11 }
  0x50   : > { %1312 = vrot.lane.b32.xlu0 %v7581_v24, %s10082_s0 }
  0x53   : > { %1314 = vrot.lane.b32.xlu1 %v7591_v26, %s10082_s0 }
  0x54   : > { %1704 = vrot.lane.b32.xlu0 %v950_v49, %s10083_s3 }
  0x57   : > { %1706 = vrot.lane.b32.xlu1 %v951_v50, %s10083_s3 }
  0x58   : > { %1410 = vrot.lane.b32.xlu0 %v7611_v31, %s10084_s8 }
  0x5b   : > { %1412 = vrot.lane.b32.xlu1 %v7617_v32, %s10084_s8 }
  0x5c   : > { %1802 = vrot.lane.b32.xlu0 %v982_v52, %s10056_s1 }
  0x5f   : > { %1804 = vrot.lane.b32.xlu1 %v983_v53, %s10056_s1 }
  0x60   : > { %1060 = vrot.lane.b32.xlu0 %v7611_v31, %s10054_s30  ;;  %v2159_v31 = vld [vmem:[%s10085_s12 + $0x10] sm:$0xff] }
  0x63   : > { %1062 = vrot.lane.b32.xlu1 %v7617_v32, %s10054_s30 }
  0x64   : > { %1188 = vrot.lane.b32.xlu0 %v980_v37, %s10052_s5 }
  0x67   : > { %1190 = vrot.lane.b32.xlu1 %v981_v40, %s10052_s5 }
  0x68   : > { %1512 = vrot.lane.b32.xlu0 %v982_v52, %s10050_s10 }
  0x6b   : > { %1514 = vrot.lane.b32.xlu1 %v983_v53, %s10050_s10 }
  0x6c   : > { %1610 = vrot.lane.b32.xlu0 %v920_v55, %s10058_s11 }
  0x6f   : > { %1612 = vrot.lane.b32.xlu1 %v921_v56, %s10058_s11 }
  0x70   : > { %1316 = vrot.lane.b32.xlu0 %v918_v47, %s10082_s0 }
  0x73   : > { %1318 = vrot.lane.b32.xlu1 %v919_v48, %s10082_s0 }
  0x74   : > { %1708 = vrot.lane.b32.xlu0 %v952_v57, %s10083_s3 }
  0x77   : > { %1710 = vrot.lane.b32.xlu1 %v953_v58, %s10083_s3 }
  0x78   : > { %1414 = vrot.lane.b32.xlu0 %v950_v49, %s10084_s8 }
  0x7b   : > { %1416 = vrot.lane.b32.xlu1 %v951_v50, %s10084_s8 }
  0x7c   : > { %1806 = vrot.lane.b32.xlu0 %v984_v60, %s10056_s1 }
  0x7f   : > { %1808 = vrot.lane.b32.xlu1 %v985_v61, %s10056_s1 }
  0x80   : > { %1064 = vrot.lane.b32.xlu0 %v950_v49, %s10054_s30 }
  0x83   : > { %1066 = vrot.lane.b32.xlu1 %v951_v50, %s10054_s30 }
  0x84   : > { %1192 = vrot.lane.b32.xlu0 %v982_v52, %s10052_s5 }
  0x87   : > { %1194 = vrot.lane.b32.xlu1 %v983_v53, %s10052_s5 }
  0x88   : > { %1516 = vrot.lane.b32.xlu0 %v984_v60, %s10050_s10 }
  0x8b   : > { %1518 = vrot.lane.b32.xlu1 %v985_v61, %s10050_s10 }
  0x8c   : > { %1614 = vrot.lane.b32.xlu0 %v7706_v63, %s10058_s11 }
  0x8e   : > { %v1053_v3 = vpop.permute.xlu0 %1052 }
  0x8f   : > { %1616 = vrot.lane.b32.xlu1 %v7713_v0, %s10058_s11  ;;  %v1181_v4 = vpop.permute.xlu1 %1180  ;;  %v1894_v22 = vsel %vm873_vm0, %v912_v16, %v1053_v3 }
  0x90   : > { %1320 = vrot.lane.b32.xlu0 %v920_v55, %s10082_s0  ;;  %v1927_v26 = vsel %vm1926_vm3, %v1894_v22, %v1181_v4 }
  0x92   : > { %v1055_v6 = vpop.permute.xlu0 %1054 }
  0x93   : > { %1322 = vrot.lane.b32.xlu1 %v921_v56, %s10082_s0  ;;  %v1895_v23 = vsel %vm873_vm0, %v913_v17, %v1055_v6  ;;  %v7834_v17 = vld [vmem:[#allocation2 + $0x7f] sm:$0xff] }
  0x94   : > { %1712 = vrot.lane.b32.xlu0 %v7718_v1, %s10083_s3 }
  0x97   : > { %1714 = vrot.lane.b32.xlu1 %v7723_v5, %s10083_s3 }
  0x98   : > { %1418 = vrot.lane.b32.xlu0 %v952_v57, %s10084_s8 }
  0x99   : > { %v1183_v9 = vpop.permute.xlu1 %1182 }
  0x9a   : > { %v1505_v10 = vpop.permute.xlu0 %1504  ;;  %v1928_v27 = vsel %vm1926_vm3, %v1895_v23, %v1183_v9 }
  0x9b   : > { %1420 = vrot.lane.b32.xlu1 %v953_v58, %s10084_s8 }
  0x9c   : > { %1810 = vrot.lane.b32.xlu0 %v7728_v8, %s10056_s1 }
  0x9d   : > { %v1507_v12 = vpop.permute.xlu1 %1506 }
  0x9e   : > { %v1603_v13 = vpop.permute.xlu0 %1602 }
  0x9f   : > { %1812 = vrot.lane.b32.xlu1 %v7735_v11, %s10056_s1  ;;  %v2059_v33 = vsel %vm2058_vm5, %v1505_v10, %v1603_v13 }
  0xa0   : > { %1068 = vrot.lane.b32.xlu0 %v952_v57, %s10054_s30 }
  0xa1   : > { %v1605_v14 = vpop.permute.xlu1 %1604 }
  0xa2   : > { %v1309_v15 = vpop.permute.xlu0 %1308  ;;  %v2060_v41 = vsel %vm2058_vm5, %v1507_v12, %v1605_v14 }
  0xa3   : > { %1070 = vrot.lane.b32.xlu1 %v953_v58, %s10054_s30  ;;  %v1960_v29 = vsel %vm1959_vm4, %v1927_v26, %v1309_v15  ;;  %s10086_s30 = smov 24   ;;  %v7324_v15 = vld [vmem:[#allocation2 + $0x1f] sm:$0xff]  ;;  %v2162_v26 = vld [vmem:[%s10085_s12 + $0x28] sm:$0xff] }
  0xa4   : > { %1196 = vrot.lane.b32.xlu0 %v984_v60, %s10052_s5  ;;  %v7799_v60 = vld [vmem:[#allocation2 + $0x69] sm:$0xff] }
  0xa5   : > { %v1311_v18 = vpop.permute.xlu1 %1310 }
  0xa6   : > { %v1701_v19 = vpop.permute.xlu0 %1700  ;;  %v1961_v30 = vsel %vm1959_vm4, %v1928_v27, %v1311_v18 }
  0xa7   : > { %1198 = vrot.lane.b32.xlu1 %v985_v61, %s10052_s5  ;;  %v2092_v38 = vsel %vm2091_vm7, %v2059_v33, %v1701_v19  ;;  %s10087_s5 = smov 48  }
  0xa8   : > { %1520 = vrot.lane.b32.xlu0 %v7728_v8, %s10050_s10 }
  0xa9   : > { %v1703_v24 = vpop.permute.xlu1 %1702 }
  0xaa   : > { %v1407_v25 = vpop.permute.xlu0 %1406  ;;  %v2093_v45 = vsel %vm2091_vm7, %v2060_v41, %v1703_v24 }
  0xab   : > { %1522 = vrot.lane.b32.xlu1 %v7735_v11, %s10050_s10  ;;  %v1993_v34 = vsel %vm1992_vm6, %v1960_v29, %v1407_v25  ;;  %s10088_s10 = smov 120  }
  0xac   : > { %1618 = vrot.lane.b32.xlu0 %v7744_v21, %s10058_s11  ;;  %v2026_v46 = vsel %vm2025_vm8, %v1993_v34, %v1505_v10  ;;  %v862_v10 = vld [vmem:[%s7535_s6 + $0xa8] sm:$0xff]  ;;  %v2164_v34 = vld [vmem:[%s10085_s12 + $0x38] sm:$0xff] }
  0xad   : > { %v1409_v32 = vpop.permute.xlu1 %1408  ;;  %v2221_v53 = vmul.f32 %v2157_v39, %v2026_v46  ;;  %901 = vst.msk [vmem:[#allocation2 + $0xc0] sm:$0xff] %vm873_vm0, %v862_v10 }
  0xae   : > { %v1994_v35 = vsel %vm1992_vm6, %v1961_v30, %v1409_v32  ;;  %v1799_v37 = vpop.permute.xlu0 %1798  ;;  %v2161_v30 = vld [vmem:[%s10085_s12 + $0x20] sm:$0xff] }
  0xaf   : > { %v2027_v40 = vsel %vm2025_vm8, %v1994_v35, %v1507_v12  ;;  %1620 = vrot.lane.b32.xlu1 %v7757_v28, %s10058_s11  ;;  %v2125_v42 = vsel %vm2124_vm1, %v2092_v38, %v1799_v37  ;;  %v7821_v12 = vld [vmem:[#allocation2 + $0x77] sm:$0xff] }
  0xb0   : > { %1324 = vrot.lane.b32.xlu0 %v7706_v63, %s10082_s0  ;;  %v2223_v48 = vmul.f32 %v2159_v31, %v2027_v40  ;;  %v2222_v51 = vmul.f32 %v2158_v36, %v2125_v42  ;;  %v7808_v63 = vld [vmem:[#allocation2 + $0x71] sm:$0xff] }
  0xb1   : > { %v1801_v47 = vpop.permute.xlu1 %1800  ;;  %v7861_v35 = vld [vmem:[#allocation2 + $0x78] sm:$0xff] }
  0xb2   : > { %v2126_v49 = vsel %vm2124_vm1, %v2093_v45, %v1801_v47  ;;  %v1057_v50 = vpop.permute.xlu0 %1056  ;;  %v2285_v58 = vpack.c.bf16 %v2223_v48, %v2221_v53  ;;  %v7885_v53 = vld [vmem:[#allocation2 + $0x81] sm:$0xff] }
  0xb3   : > { %v2224_v52 = vmul.f32 %v2160_v43, %v2126_v49  ;;  %1326 = vrot.lane.b32.xlu1 %v7713_v0, %s10082_s0 }
  0xb4   : > { %1716 = vrot.lane.b32.xlu0 %v7784_v44, %s10083_s3 }
  0xb5   : > { %v1059_v55 = vpop.permute.xlu1 %1058  ;;  %v2286_v56 = vpack.c.bf16 %v2224_v52, %v2222_v51  ;;  %v7876_v51 = vld [vmem:[#allocation2 + $0x79] sm:$0xff] }
  0xb6   : > { %v1185_v57 = vpop.permute.xlu0 %1184 }
  0xb7   : > { %1718 = vrot.lane.b32.xlu1 %v7793_v54, %s10083_s3  ;;  %6264 = vmatprep.mubr.msk.bf16.mxu0 %vm2432_vm9, %v2286_v56 }
  0xb8   : > { %2518 = vmatmul.mubr.bf16.vlgmr.msra.gmra.mrb[0].mxu0 %v2285_v58  ;;  %1422 = vrot.lane.b32.xlu0 %v7718_v1, %s10084_s8 }
  0xb9   : > { %v1187_v61 = vpop.permute.xlu1 %1186 }
  0xba   : > { %v1509_v62 = vpop.permute.xlu0 %1508 }
  0xbb   : > { %1424 = vrot.lane.b32.xlu1 %v7723_v5, %s10084_s8 }
  0xbc   : > { %1814 = vrot.lane.b32.xlu0 %v7799_v60, %s10056_s1 }
  0xbd   : > { %v1511_v0 = vpop.permute.xlu1 %1510 }
  0xbe   : > { %v1607_v3 = vpop.permute.xlu0 %1606 }
  0xbf   : > { %1816 = vrot.lane.b32.xlu1 %v7808_v63, %s10056_s1  ;;  %v2061_v23 = vsel %vm2058_vm5, %v1509_v62, %v1607_v3  ;;  %s10094_s1 = sld [smem:[#allocation12_spill]] }
  0xc0   : > { %1072 = vrot.lane.b32.xlu0 %v7718_v1, %s10086_s30  ;;  %v7323_v1 = vld [vmem:[#allocation2 + $0x17] sm:$0xff] }
  0xc1   : > { %v1609_v4 = vpop.permute.xlu1 %1608  ;;  %v1896_v13 = vsel %vm873_vm0, %v7323_v1, %v1057_v50  ;;  %v863_v50 = vld [vmem:[%s7535_s6 + $0xb0] sm:$0xff] }
  0xc2   : > { %v1313_v6 = vpop.permute.xlu0 %1312  ;;  %v2062_v32 = vsel %vm2058_vm5, %v1511_v0, %v1609_v4  ;;  %902 = vst.msk [vmem:[#allocation2 + $0xc8] sm:$0xff] %vm873_vm0, %v863_v50  ;;  %v7902_v4 = vld [vmem:[#allocation2 + $0x87] sm:$0xff] }
  0xc3   : > { %1074 = vrot.lane.b32.xlu1 %v7723_v5, %s10086_s30 }
  0xc4   : > { %1200 = vrot.lane.b32.xlu0 %v7728_v8, %s10087_s5  ;;  %v1897_v8 = vsel %vm873_vm0, %v7324_v15, %v1059_v55 }
  0xc5   : > { %v1315_v7 = vpop.permute.xlu1 %1314  ;;  %v1930_v16 = vsel %vm1926_vm3, %v1897_v8, %v1187_v61 }
  0xc6   : > { %v1705_v9 = vpop.permute.xlu0 %1704  ;;  %v1963_v19 = vsel %vm1959_vm4, %v1930_v16, %v1315_v7  ;;  %v2167_v16 = vld [vmem:[%s10085_s12 + $0x50] sm:$0xff] }
  0xc7   : > { %1202 = vrot.lane.b32.xlu1 %v7735_v11, %s10087_s5  ;;  %v1929_v11 = vsel %vm1926_vm3, %v1896_v13, %v1185_v57  ;;  %v2094_v29 = vsel %vm2091_vm7, %v2061_v23, %v1705_v9  ;;  %v7911_v9 = vld [vmem:[#allocation2 + $0x8f] sm:$0xff]  ;;  %v2168_v23 = vld [vmem:[%s10085_s12 + $0x58] sm:$0xff] }
  0xc8   : > { %1524 = vrot.lane.b32.xlu0 %v7799_v60, %s10088_s10  ;;  %v1962_v18 = vsel %vm1959_vm4, %v1929_v11, %v1313_v6  ;;  %v7326_v6 = vld [vmem:[#allocation2 + $0x2f] sm:$0xff] }
  0xc9   : > { %v1707_v5 = vpop.permute.xlu1 %1706 }
  0xca   : > { %v1411_v14 = vpop.permute.xlu0 %1410  ;;  %v2095_v36 = vsel %vm2091_vm7, %v2062_v32, %v1707_v5 }
  0xcb   : > { %1526 = vrot.lane.b32.xlu1 %v7808_v63, %s10088_s10  ;;  %v1995_v24 = vsel %vm1992_vm6, %v1962_v18, %v1411_v14 }
  0xcc   : > { %1622 = vrot.lane.b32.xlu0 %v7821_v12, %s10058_s11  ;;  %v2028_v37 = vsel %vm2025_vm8, %v1995_v24, %v1509_v62  ;;  %v864_v62 = vld [vmem:[%s7535_s6 + $0xb8] sm:$0xff]  ;;  %s10096_s11 = sld [smem:[#allocation17_spill]] }
  0xcd   : > { %v1413_v22 = vpop.permute.xlu1 %1412  ;;  %v2225_v45 = vmul.f32 %v2161_v30, %v2028_v37  ;;  %903 = vst.msk [vmem:[#allocation2 + $0xd0] sm:$0xff] %vm873_vm0, %v864_v62  ;;  %v7947_v37 = vld [vmem:[#allocation2 + $0x90] sm:$0xff] }
  0xce   : > { %v1996_v25 = vsel %vm1992_vm6, %v1963_v19, %v1413_v22  ;;  %v1803_v27 = vpop.permute.xlu0 %1802 }
  0xcf   : > { %v2029_v31 = vsel %vm2025_vm8, %v1996_v25, %v1511_v0  ;;  %1624 = vrot.lane.b32.xlu1 %v7834_v17, %s10089_s2  ;;  %v2127_v33 = vsel %vm2124_vm1, %v2094_v29, %v1803_v27  ;;  %v2165_v25 = vld [vmem:[%s10085_s12 + $0x40] sm:$0xff]  ;;  %v7940_v29 = vld [vmem:[#allocation2 + $0x88] sm:$0xff] }
  0xd0   : > { %1328 = vrot.lane.b32.xlu0 %v7744_v21, %s10082_s0  ;;  %v2227_v39 = vmul.f32 %v2163_v20, %v2029_v31  ;;  %v2226_v42 = vmul.f32 %v2162_v26, %v2127_v33  ;;  %v7870_v21 = vld [vmem:[#allocation2 + $0x80] sm:$0xff]  ;;  %v2166_v20 = vld [vmem:[%s10085_s12 + $0x48] sm:$0xff] }
  0xd1   : > { %v1805_v38 = vpop.permute.xlu1 %1804 }
  0xd2   : > { %v2128_v40 = vsel %vm2124_vm1, %v2095_v36, %v1805_v38  ;;  %v1061_v41 = vpop.permute.xlu0 %1060  ;;  %v2287_v49 = vpack.c.bf16 %v2227_v39, %v2225_v45  ;;  %v7956_v45 = vld [vmem:[#allocation2 + $0x89] sm:$0xff] }
  0xd3   : > { %v2228_v43 = vmul.f32 %v2164_v34, %v2128_v40  ;;  %1330 = vrot.lane.b32.xlu1 %v7757_v28, %s10082_s0 }
  0xd4   : > { %1720 = vrot.lane.b32.xlu0 %v7861_v35, %s10083_s3 }
  0xd5   : > { %v2288_v46 = vpack.c.bf16 %v2228_v43, %v2226_v42  ;;  %v1063_v47 = vpop.permute.xlu1 %1062  ;;  %v865_v42 = vld [vmem:[%s7535_s6 + $0xc0] sm:$0xff] }
  0xd6   : > { %v1189_v48 = vpop.permute.xlu0 %1188  ;;  %904 = vst.msk [vmem:[#allocation2 + $0xd8] sm:$0xff] %vm873_vm0, %v865_v42 }
  0xd7   : > { %1722 = vrot.lane.b32.xlu1 %v7870_v21, %s10083_s3  ;;  %6265 = vmatprep.mubr.msk.bf16.mxu0 %vm2432_vm9, %v2288_v46 }
  0xd8   : > { %2526 = vmatmul.mubr.bf16.gmra.mrb[4].mxu0 %v2287_v49  ;;  %1426 = vrot.lane.b32.xlu0 %v7784_v44, %s10084_s8 }
  0xd9   : > { %v1191_v28 = vpop.permute.xlu1 %1190 }
  0xda   : > { %v1513_v52 = vpop.permute.xlu0 %1512 }
  0xdb   : > { %1428 = vrot.lane.b32.xlu1 %v7793_v54, %s10084_s8 }
  0xdc   : > { %1818 = vrot.lane.b32.xlu0 %v7876_v51, %s10090_s7 }
  0xdd   : > { %v1515_v55 = vpop.permute.xlu1 %1514 }
  0xde   : > { %v1611_v56 = vpop.permute.xlu0 %1610 }
  0xdf   : > { %1820 = vrot.lane.b32.xlu1 %v7885_v53, %s10090_s7  ;;  %v2063_v5 = vsel %vm2058_vm5, %v1513_v52, %v1611_v56  ;;  %v866_v56 = vld [vmem:[%s7535_s6 + $0xc8] sm:$0xff] }
  0xe0   : > { %1076 = vrot.lane.b32.xlu0 %v7784_v44, %s10086_s30  ;;  %v7325_v44 = vld [vmem:[#allocation2 + $0x27] sm:$0xff]  ;;  %905 = vst.msk [vmem:[#allocation2 + $0xe0] sm:$0xff] %vm873_vm0, %v866_v56 }
  0xe1   : > { %v1613_v57 = vpop.permute.xlu1 %1612  ;;  %v1898_v0 = vsel %vm873_vm0, %v7325_v44, %v1061_v41  ;;  %v7988_v44 = vld [vmem:[#allocation2 + $0x9f] sm:$0xff]  ;;  %v8056_v56 = vld [vmem:[#allocation2 + $0xa7] sm:$0xff] }
  0xe2   : > { %v1317_v58 = vpop.permute.xlu0 %1316  ;;  %v2064_v19 = vsel %vm2058_vm5, %v1515_v55, %v1613_v57 }
  0xe3   : > { %1078 = vrot.lane.b32.xlu1 %v7793_v54, %s10086_s30 }
  0xe4   : > { %1204 = vrot.lane.b32.xlu0 %v7799_v60, %s10087_s5  ;;  %v1899_v60 = vsel %vm873_vm0, %v7326_v6, %v1063_v47  ;;  %v7962_v47 = vld [vmem:[#allocation2 + $0x91] sm:$0xff] }
  0xe5   : > { %v1319_v59 = vpop.permute.xlu1 %1318  ;;  %v1932_v7 = vsel %vm1926_vm3, %v1899_v60, %v1191_v28 }
  0xe6   : > { %v1709_v61 = vpop.permute.xlu0 %1708  ;;  %v1965_v1 = vsel %vm1959_vm4, %v1932_v7, %v1319_v59  ;;  %v7979_v59 = vld [vmem:[#allocation2 + $0x97] sm:$0xff] }
  0xe7   : > { %1206 = vrot.lane.b32.xlu1 %v7808_v63, %s10087_s5  ;;  %v1931_v63 = vsel %vm1926_vm3, %v1898_v0, %v1189_v48  ;;  %v2096_v11 = vsel %vm2091_vm7, %v2063_v5, %v1709_v61  ;;  %v7328_v61 = vld [vmem:[#allocation2 + $0x3f] sm:$0xff] }
  0xe8   : > { %1528 = vrot.lane.b32.xlu0 %v7876_v51, %s10088_s10  ;;  %v1964_v10 = vsel %vm1959_vm4, %v1931_v63, %v1317_v58 }
  0xe9   : > { %v1711_v3 = vpop.permute.xlu1 %1710 }
  0xea   : > { %v1415_v54 = vpop.permute.xlu0 %1414  ;;  %v2097_v24 = vsel %vm2091_vm7, %v2064_v19, %v1711_v3 }
  0xeb   : > { %1530 = vrot.lane.b32.xlu1 %v7885_v53, %s10088_s10  ;;  %v1997_v14 = vsel %vm1992_vm6, %v1964_v10, %v1415_v54 }
  0xec   : > { %1626 = vrot.lane.b32.xlu0 %v7902_v4, %s10089_s2  ;;  %v2030_v26 = vsel %vm2025_vm8, %v1997_v14, %v1513_v52  ;;  %v2170_v14 = vld [vmem:[%s10085_s12 + $0x68] sm:$0xff] }
  0xed   : > { %v1417_v13 = vpop.permute.xlu1 %1416  ;;  %v2229_v36 = vmul.f32 %v2165_v25, %v2030_v26 }
  0xee   : > { %v1998_v15 = vsel %vm1992_vm6, %v1965_v1, %v1417_v13  ;;  %v1807_v8 = vpop.permute.xlu0 %1806  ;;  %v2171_v1 = vld [vmem:[%s10085_s12 + $0x70] sm:$0xff] }
  0xef   : > { %v2031_v18 = vsel %vm2025_vm8, %v1998_v15, %v1515_v55  ;;  %1628 = vrot.lane.b32.xlu1 %v7911_v9, %s10089_s2  ;;  %v2129_v22 = vsel %vm2124_vm1, %v2096_v11, %v1807_v8  ;;  %v2172_v8 = vld [vmem:[%s10085_s12 + $0x78] sm:$0xff] }
  0xf0   : > { %1332 = vrot.lane.b32.xlu0 %v7821_v12, %s10082_s0  ;;  %v2231_v30 = vmul.f32 %v2167_v16, %v2031_v18  ;;  %v2230_v33 = vmul.f32 %v2166_v20, %v2129_v22  ;;  %v2169_v16 = vld [vmem:[%s10085_s12 + $0x60] sm:$0xff]  ;;  %v8017_v20 = vld [vmem:[#allocation2 + $0x98] sm:$0xff] }
  0xf1   : > { %v1809_v27 = vpop.permute.xlu1 %1808 }
  0xf2   : > { %v2130_v31 = vsel %vm2124_vm1, %v2097_v24, %v1809_v27  ;;  %v1065_v32 = vpop.permute.xlu0 %1064  ;;  %v2289_v41 = vpack.c.bf16 %v2231_v30, %v2229_v36  ;;  %v8024_v30 = vld [vmem:[#allocation2 + $0xa0] sm:$0xff]  ;;  %v867_v36 = vld [vmem:[%s7535_s6 + $0xd0] sm:$0xff] }
  0xf3   : > { %v2232_v34 = vmul.f32 %v2168_v23, %v2130_v31  ;;  %1334 = vrot.lane.b32.xlu1 %v7834_v17, %s10082_s0  ;;  %906 = vst.msk [vmem:[#allocation2 + $0xe8] sm:$0xff] %vm873_vm0, %v867_v36 }
  0xf4   : > { %1724 = vrot.lane.b32.xlu0 %v7940_v29, %s10083_s3 }
  0xf5   : > { %v2290_v38 = vpack.c.bf16 %v2232_v34, %v2230_v33  ;;  %v1067_v39 = vpop.permute.xlu1 %1066 }
  0xf6   : > { %v1193_v40 = vpop.permute.xlu0 %1192 }
  0xf7   : > { %1726 = vrot.lane.b32.xlu1 %v7947_v37, %s10083_s3  ;;  %6266 = vmatprep.mubr.msk.bf16.mxu0 %vm2432_vm9, %v2290_v38 }
  0xf8   : > { %2534 = vmatmul.mubr.bf16.gmra.mrb[8].mxu0 %v2289_v41  ;;  %1430 = vrot.lane.b32.xlu0 %v7861_v35, %s10084_s8  ;;  %v8039_v41 = vld [vmem:[#allocation2 + $0xa1] sm:$0xff] }
  0xf9   : > { %v1195_v43 = vpop.permute.xlu1 %1194 }
  0xfa   : > { %v1517_v46 = vpop.permute.xlu0 %1516 }
  0xfb   : > { %1432 = vrot.lane.b32.xlu1 %v7870_v21, %s10084_s8 }
  0xfc   : > { %1822 = vrot.lane.b32.xlu0 %v7956_v45, %s10090_s7 }
  0xfd   : > { %v1519_v48 = vpop.permute.xlu1 %1518 }
  0xfe   : > { %v1615_v49 = vpop.permute.xlu0 %1614 }
  0xff   : > { %1824 = vrot.lane.b32.xlu1 %v7962_v47, %s10090_s7  ;;  %v2065_v6 = vsel %vm2058_vm5, %v1517_v46, %v1615_v49 }
 0x100   : > { %1080 = vrot.lane.b32.xlu0 %v7861_v35, %s10086_s30  ;;  %v7327_v35 = vld [vmem:[#allocation2 + $0x37] sm:$0xff] }
 0x101   : > { %v1617_v50 = vpop.permute.xlu1 %1616  ;;  %v1900_v57 = vsel %vm873_vm0, %v7327_v35, %v1065_v32  ;;  %v7330_v35 = vld [vmem:[#allocation2 + $0x4f] sm:$0xff] }
 0x102   : > { %v1321_v28 = vpop.permute.xlu0 %1320  ;;  %v2066_v5 = vsel %vm2058_vm5, %v1519_v48, %v1617_v50 }
 0x103   : > { %1082 = vrot.lane.b32.xlu1 %v7870_v21, %s10086_s30 }
 0x104   : > { %1208 = vrot.lane.b32.xlu0 %v7876_v51, %s10087_s5  ;;  %v1901_v51 = vsel %vm873_vm0, %v7328_v61, %v1067_v39  ;;  %v8033_v39 = vld [vmem:[#allocation2 + $0x99] sm:$0xff] }
 0x105   : > { %v1323_v52 = vpop.permute.xlu1 %1322  ;;  %v1934_v62 = vsel %vm1926_vm3, %v1901_v51, %v1195_v43 }
 0x106   : > { %v1713_v55 = vpop.permute.xlu0 %1712  ;;  %v1967_v3 = vsel %vm1959_vm4, %v1934_v62, %v1323_v52 }
 0x107   : > { %1210 = vrot.lane.b32.xlu1 %v7885_v53, %s10087_s5  ;;  %v1933_v53 = vsel %vm1926_vm3, %v1900_v57, %v1193_v40  ;;  %v2098_v10 = vsel %vm2091_vm7, %v2065_v6, %v1713_v55  ;;  %v2175_v6 = vld [vmem:[%s10085_s12 + $0x90] sm:$0xff] }
 0x108   : > { %1532 = vrot.lane.b32.xlu0 %v7956_v45, %s10088_s10  ;;  %v1966_v0 = vsel %vm1959_vm4, %v1933_v53, %v1321_v28  ;;  %v868_v28 = vld [vmem:[%s7535_s6 + $0xd8] sm:$0xff] }
 0x109   : > { %v1715_v58 = vpop.permute.xlu1 %1714  ;;  %907 = vst.msk [vmem:[#allocation2 + $0xf0] sm:$0xff] %vm873_vm0, %v868_v28 }
 0x10a   : > { %v1419_v21 = vpop.permute.xlu0 %1418  ;;  %v2099_v11 = vsel %vm2091_vm7, %v2066_v5, %v1715_v58  ;;  %v8065_v58 = vld [vmem:[#allocation2 + $0xaf] sm:$0xff]  ;;  %v2173_v5 = vld [vmem:[%s10085_s12 + $0x80] sm:$0xff] }
 0x10b   : > { %1534 = vrot.lane.b32.xlu1 %v7962_v47, %s10088_s10  ;;  %v1999_v60 = vsel %vm1992_vm6, %v1966_v0, %v1419_v21 }
 0x10c   : > { %1630 = vrot.lane.b32.xlu0 %v7979_v59, %s10089_s2  ;;  %v2032_v18 = vsel %vm2025_vm8, %v1999_v60, %v1517_v46 }
 0x10d   : > { %v1421_v54 = vpop.permute.xlu1 %1420  ;;  %v2233_v27 = vmul.f32 %v2169_v16, %v2032_v18 }
 0x10e   : > { %v2000_v63 = vsel %vm1992_vm6, %v1967_v3, %v1421_v54  ;;  %v1811_v7 = vpop.permute.xlu0 %1810 }
 0x10f   : > { %v2033_v13 = vsel %vm2025_vm8, %v2000_v63, %v1519_v48  ;;  %1632 = vrot.lane.b32.xlu1 %v7988_v44, %s10089_s2  ;;  %v2131_v15 = vsel %vm2124_vm1, %v2098_v10, %v1811_v7  ;;  %v2174_v7 = vld [vmem:[%s10085_s12 + $0x88] sm:$0xff] }
 0x110   : > { %1336 = vrot.lane.b32.xlu0 %v7902_v4, %s10082_s0  ;;  %v2235_v22 = vmul.f32 %v2171_v1, %v2033_v13  ;;  %v2234_v25 = vmul.f32 %v2170_v14, %v2131_v15  ;;  %v2176_v1 = vld [vmem:[%s10085_s12 + $0x98] sm:$0xff] }
 0x111   : > { %v1813_v19 = vpop.permute.xlu1 %1812 }
 0x112   : > { %v2132_v23 = vsel %vm2124_vm1, %v2099_v11, %v1813_v19  ;;  %v1069_v24 = vpop.permute.xlu0 %1068  ;;  %v2291_v34 = vpack.c.bf16 %v2235_v22, %v2233_v27 }
 0x113   : > { %v2236_v26 = vmul.f32 %v2172_v8, %v2132_v23  ;;  %1338 = vrot.lane.b32.xlu1 %v7911_v9, %s10082_s0  ;;  %v8094_v8 = vld [vmem:[#allocation2 + $0xa8] sm:$0xff] }
 0x114   : > { %1728 = vrot.lane.b32.xlu0 %v8017_v20, %s10083_s3 }
 0x115   : > { %v2292_v31 = vpack.c.bf16 %v2236_v26, %v2234_v25  ;;  %v1071_v32 = vpop.permute.xlu1 %1070 }
 0x116   : > { %v1197_v33 = vpop.permute.xlu0 %1196 }
 0x117   : > { %1730 = vrot.lane.b32.xlu1 %v8024_v30, %s10083_s3  ;;  %6267 = vmatprep.mubr.msk.bf16.mxu0 %vm2432_vm9, %v2292_v31 }
 0x118   : > { %2542 = vmatmul.mubr.bf16.gmra.mrb[12].mxu0 %v2291_v34  ;;  %1434 = vrot.lane.b32.xlu0 %v7940_v29, %s10084_s8  ;;  %v8110_v34 = vld [vmem:[#allocation2 + $0xa9] sm:$0xff] }
 0x119   : > { %v1199_v38 = vpop.permute.xlu1 %1198 }
 0x11a   : > { %v1521_v40 = vpop.permute.xlu0 %1520 }
 0x11b   : > { %1436 = vrot.lane.b32.xlu1 %v7947_v37, %s10084_s8 }
 0x11c   : > { %1826 = vrot.lane.b32.xlu0 %v8033_v39, %s10090_s7 }
 0x11d   : > { %v1523_v42 = vpop.permute.xlu1 %1522 }
 0x11e   : > { %v1619_v43 = vpop.permute.xlu0 %1618 }
 0x11f   : > { %1828 = vrot.lane.b32.xlu1 %v8039_v41, %s10090_s7  ;;  %v2067_v53 = vsel %vm2058_vm5, %v1521_v40, %v1619_v43 }
 0x120   : > { %1084 = vrot.lane.b32.xlu0 %v7940_v29, %s10086_s30  ;;  %v7329_v29 = vld [vmem:[#allocation2 + $0x47] sm:$0xff] }
 0x121   : > { %v1621_v46 = vpop.permute.xlu1 %1620  ;;  %v1902_v52 = vsel %vm873_vm0, %v7329_v29, %v1069_v24  ;;  %v8101_v24 = vld [vmem:[#allocation2 + $0xb0] sm:$0xff] }
 0x122   : > { %v1325_v48 = vpop.permute.xlu0 %1324  ;;  %v2068_v63 = vsel %vm2058_vm5, %v1523_v42, %v1621_v46 }
 0x123   : > { %1086 = vrot.lane.b32.xlu1 %v7947_v37, %s10086_s30 }
 0x124   : > { %1212 = vrot.lane.b32.xlu0 %v7956_v45, %s10087_s5  ;;  %v1903_v45 = vsel %vm873_vm0, %v7330_v35, %v1071_v32  ;;  %v869_v32 = vld [vmem:[%s7535_s6 + $0xe0] sm:$0xff] }
 0x125   : > { %v1327_v49 = vpop.permute.xlu1 %1326  ;;  %v1936_v57 = vsel %vm1926_vm3, %v1903_v45, %v1199_v38  ;;  %908 = vst.msk [vmem:[#allocation2 + $0xf8] sm:$0xff] %vm873_vm0, %v869_v32  ;;  %v8116_v38 = vld [vmem:[#allocation2 + $0xb1] sm:$0xff]  ;;  %v8142_v35 = vld [vmem:[#allocation2 + $0xbf] sm:$0xff] }
 0x126   : > { %v1717_v50 = vpop.permute.xlu0 %1716  ;;  %v1969_v61 = vsel %vm1959_vm4, %v1936_v57, %v1327_v49 }
 0x127   : > { %1214 = vrot.lane.b32.xlu1 %v7962_v47, %s10087_s5  ;;  %v1935_v47 = vsel %vm1926_vm3, %v1902_v52, %v1197_v33  ;;  %v2100_v54 = vsel %vm2091_vm7, %v2067_v53, %v1717_v50  ;;  %v870_v50 = vld [vmem:[%s7535_s6 + $0xe8] sm:$0xff]  ;;  %v8133_v52 = vld [vmem:[#allocation2 + $0xb7] sm:$0xff] }
 0x128   : > { %1536 = vrot.lane.b32.xlu0 %v8033_v39, %s10088_s10  ;;  %v1968_v21 = vsel %vm1959_vm4, %v1935_v47, %v1325_v48  ;;  %909 = vst.msk [vmem:[#allocation2 + $0x100] sm:$0xff] %vm873_vm0, %v870_v50 }
 0x129   : > { %v1719_v55 = vpop.permute.xlu1 %1718 }
 0x12a   : > { %v1423_v37 = vpop.permute.xlu0 %1422  ;;  %v2101_v13 = vsel %vm2091_vm7, %v2068_v63, %v1719_v55  ;;  %v7332_v55 = vld [vmem:[#allocation2 + $0x5f] sm:$0xff] }
 0x12b   : > { %1538 = vrot.lane.b32.xlu1 %v8039_v41, %s10088_s10  ;;  %v2001_v62 = vsel %vm1992_vm6, %v1968_v21, %v1423_v37  ;;  %v2180_v63 = vld [vmem:[%s10085_s12 + $0xb8] sm:$0xff] }
 0x12c   : > { %1634 = vrot.lane.b32.xlu0 %v8056_v56, %s10089_s2  ;;  %v2034_v14 = vsel %vm2025_vm8, %v2001_v62, %v1521_v40 }
 0x12d   : > { %v1425_v51 = vpop.permute.xlu1 %1424  ;;  %v2237_v23 = vmul.f32 %v2173_v5, %v2034_v14  ;;  %v8171_v5 = vld [vmem:[#allocation2 + $0xb8] sm:$0xff] }
 0x12e   : > { %v2002_v0 = vsel %vm1992_vm6, %v1969_v61, %v1425_v51  ;;  %v1815_v3 = vpop.permute.xlu0 %1814 }
 0x12f   : > { %v2035_v60 = vsel %vm2025_vm8, %v2002_v0, %v1523_v42  ;;  %1636 = vrot.lane.b32.xlu1 %v8065_v58, %s10089_s2  ;;  %v2133_v10 = vsel %vm2124_vm1, %v2100_v54, %v1815_v3  ;;  %v2179_v0 = vld [vmem:[%s10085_s12 + $0xb0] sm:$0xff] }
 0x130   : > { %1340 = vrot.lane.b32.xlu0 %v7979_v59, %s10082_s0  ;;  %v2239_v11 = vmul.f32 %v2175_v6, %v2035_v60  ;;  %v2238_v19 = vmul.f32 %v2174_v7, %v2133_v10  ;;  %v2178_v6 = vld [vmem:[%s10085_s12 + $0xa8] sm:$0xff]  ;;  %v2177_v10 = vld [vmem:[%s10085_s12 + $0xa0] sm:$0xff] }
 0x131   : > { %v1817_v15 = vpop.permute.xlu1 %1816 }
 0x132   : > { %v2134_v16 = vsel %vm2124_vm1, %v2101_v13, %v1817_v15  ;;  %v1073_v18 = vpop.permute.xlu0 %1072  ;;  %v2293_v31 = vpack.c.bf16 %v2239_v11, %v2237_v23 }
 0x133   : > { %v2240_v22 = vmul.f32 %v2176_v1, %v2134_v16  ;;  %1342 = vrot.lane.b32.xlu1 %v7988_v44, %s10082_s0 }
 0x134   : > { %1732 = vrot.lane.b32.xlu0 %v8094_v8, %s10083_s3 }
 0x135   : > { %v2294_v25 = vpack.c.bf16 %v2240_v22, %v2238_v19  ;;  %v1075_v26 = vpop.permute.xlu1 %1074  ;;  %v8178_v22 = vld [vmem:[#allocation2 + $0xc0] sm:$0xff] }
 0x136   : > { %v1201_v27 = vpop.permute.xlu0 %1200 }
 0x137   : > { %1734 = vrot.lane.b32.xlu1 %v8101_v24, %s10083_s3  ;;  %6268 = vmatprep.mubr.msk.bf16.mxu0 %vm2432_vm9, %v2294_v25 }
 0x138   : > { %2550 = vmatmul.mubr.bf16.gmra.mrb[16].mxu0 %v2293_v31  ;;  %1438 = vrot.lane.b32.xlu0 %v8017_v20, %s10084_s8  ;;  %v871_v31 = vld [vmem:[%s7535_s6 + $0xf0] sm:$0xff] }
 0x139   : > { %v1203_v33 = vpop.permute.xlu1 %1202  ;;  %910 = vst.msk [vmem:[#allocation2 + $0x108] sm:$0xff] %vm873_vm0, %v871_v31 }
 0x13a   : > { %v1525_v36 = vpop.permute.xlu0 %1524 }
 0x13b   : > { %1440 = vrot.lane.b32.xlu1 %v8024_v30, %s10084_s8 }
 0x13c   : > { %1830 = vrot.lane.b32.xlu0 %v8110_v34, %s10090_s7 }
 0x13d   : > { %v1527_v40 = vpop.permute.xlu1 %1526 }
 0x13e   : > { %v1623_v42 = vpop.permute.xlu0 %1622 }
 0x13f   : > { %1832 = vrot.lane.b32.xlu1 %v8116_v38, %s10090_s7  ;;  %v2069_v21 = vsel %vm2058_vm5, %v1525_v36, %v1623_v42 }
 0x140   : > { %1088 = vrot.lane.b32.xlu0 %v8017_v20, %s10086_s30  ;;  %v7331_v20 = vld [vmem:[#allocation2 + $0x57] sm:$0xff] }
 0x141   : > { %v1625_v43 = vpop.permute.xlu1 %1624  ;;  %v1904_v28 = vsel %vm873_vm0, %v7331_v20, %v1073_v18  ;;  %v872_v20 = vld [vmem:[%s7535_s6 + $0xf8] sm:$0xff]  ;;  %s10100_s6 = sld [smem:[#allocation9_spill]] }
 0x142   : > { %v1329_v46 = vpop.permute.xlu0 %1328  ;;  %v2070_v54 = vsel %vm2058_vm5, %v1527_v40, %v1625_v43  ;;  %911 = vst.msk [vmem:[#allocation2 + $0x110] sm:$0xff] %vm873_vm0, %v872_v20 }
 0x143   : > { %1090 = vrot.lane.b32.xlu1 %v8024_v30, %s10086_s30 }
 0x144   : > { %1216 = vrot.lane.b32.xlu0 %v8033_v39, %s10087_s5  ;;  %v1905_v39 = vsel %vm873_vm0, %v7332_v55, %v1075_v26  ;;  %v7334_v55 = vld [vmem:[#allocation2 + $0x6f] sm:$0xff] }
 0x145   : > { %v1331_v48 = vpop.permute.xlu1 %1330  ;;  %v1938_v37 = vsel %vm1926_vm3, %v1905_v39, %v1203_v33  ;;  %v8187_v33 = vld [vmem:[#allocation2 + $0xb9] sm:$0xff] }
 0x146   : > { %v1721_v49 = vpop.permute.xlu0 %1720  ;;  %v1971_v47 = vsel %vm1959_vm4, %v1938_v37, %v1331_v48 }
 0x147   : > { %1218 = vrot.lane.b32.xlu1 %v8039_v41, %s10087_s5  ;;  %v1937_v41 = vsel %vm1926_vm3, %v1904_v28, %v1201_v27  ;;  %v2102_v62 = vsel %vm2091_vm7, %v2069_v21, %v1721_v49  ;;  %s832_s27 = scalar_lea.vmem %s10100_s6, %s10105_s4 }
 0x148   : > { %1540 = vrot.lane.b32.xlu0 %v8110_v34, %s10088_s10  ;;  %v1970_v45 = vsel %vm1959_vm4, %v1937_v41, %v1329_v46  ;;  %v8219_v41 = vld [vmem:[#allocation2 + $0xcf] sm:$0xff] }
 0x149   : > { %v1723_v29 = vpop.permute.xlu1 %1722 }
 0x14a   : > { %v1427_v30 = vpop.permute.xlu0 %1426  ;;  %v2103_v7 = vsel %vm2091_vm7, %v2070_v54, %v1723_v29  ;;  %v2182_v54 = vld [vmem:[%s10085_s12 + $0xc8] sm:$0xff] }
 0x14b   : > { %1542 = vrot.lane.b32.xlu1 %v8116_v38, %s10088_s10  ;;  %v2003_v61 = vsel %vm1992_vm6, %v1970_v45, %v1427_v30  ;;  %v8210_v30 = vld [vmem:[#allocation2 + $0xc7] sm:$0xff] }
 0x14c   : > { %1638 = vrot.lane.b32.xlu0 %v8133_v52, %s10089_s2  ;;  %v2036_v1 = vsel %vm2025_vm8, %v2003_v61, %v1525_v36 }
 0x14d   : > { %v1429_v57 = vpop.permute.xlu1 %1428  ;;  %v2241_v19 = vmul.f32 %v2177_v10, %v2036_v1 }
 0x14e   : > { %v2004_v51 = vsel %vm1992_vm6, %v1971_v47, %v1429_v57  ;;  %v1819_v53 = vpop.permute.xlu0 %1818 }
 0x14f   : > { %v2037_v3 = vsel %vm2025_vm8, %v2004_v51, %v1527_v40  ;;  %1640 = vrot.lane.b32.xlu1 %v8142_v35, %s10089_s2  ;;  %v2135_v60 = vsel %vm2124_vm1, %v2102_v62, %v1819_v53  ;;  %v8193_v40 = vld [vmem:[#allocation2 + $0xc1] sm:$0xff]  ;;  %v2183_v62 = vld [vmem:[%s10085_s12 + $0xd0] sm:$0xff] }
 0x150   : > { %1344 = vrot.lane.b32.xlu0 %v8056_v56, %s10082_s0  ;;  %v2243_v14 = vmul.f32 %v2179_v0, %v2037_v3  ;;  %v2242_v16 = vmul.f32 %v2178_v6, %v2135_v60  ;;  %v2184_v60 = vld [vmem:[%s10085_s12 + $0xd8] sm:$0xff] }
 0x151   : > { %v1821_v13 = vpop.permute.xlu1 %1820 }
 0x152   : > { %v2136_v15 = vsel %vm2124_vm1, %v2103_v7, %v1821_v13  ;;  %v1077_v11 = vpop.permute.xlu0 %1076  ;;  %v2295_v27 = vpack.c.bf16 %v2243_v14, %v2241_v19  ;;  %v2181_v7 = vld [vmem:[%s10085_s12 + $0xc0] sm:$0xff]  ;;  %v8248_v13 = vld [vmem:[#allocation2 + $0xc8] sm:$0xff] }
 0x153   : > { %v2244_v18 = vmul.f32 %v2180_v63, %v2136_v15  ;;  %1346 = vrot.lane.b32.xlu1 %v8065_v58, %s10082_s0 }
 0x154   : > { %1736 = vrot.lane.b32.xlu0 %v8171_v5, %s10083_s3 }
 0x155   : > { %v2296_v23 = vpack.c.bf16 %v2244_v18, %v2242_v16  ;;  %v1079_v25 = vpop.permute.xlu1 %1078 }
 0x156   : > { %v1205_v26 = vpop.permute.xlu0 %1204 }
 0x157   : > { %1738 = vrot.lane.b32.xlu1 %v8178_v22, %s10083_s3  ;;  %6269 = vmatprep.mubr.msk.bf16.mxu0 %vm2432_vm9, %v2296_v23  ;;  %v8255_v23 = vld [vmem:[#allocation2 + $0xd0] sm:$0xff] }
 0x158   : > { %2558 = vmatmul.mubr.bf16.gmra.mrb[20].mxu0 %v2295_v27  ;;  %1442 = vrot.lane.b32.xlu0 %v8094_v8, %s10084_s8 }
 0x159   : > { %v1207_v32 = vpop.permute.xlu1 %1206 }
 0x15a   : > { %v1529_v36 = vpop.permute.xlu0 %1528 }
 0x15b   : > { %1444 = vrot.lane.b32.xlu1 %v8101_v24, %s10084_s8 }
 0x15c   : > { %1834 = vrot.lane.b32.xlu0 %v8187_v33, %s10090_s7 }
 0x15d   : > { %v1531_v42 = vpop.permute.xlu1 %1530 }
 0x15e   : > { %v1627_v43 = vpop.permute.xlu0 %1626 }
 0x15f   : > { %1836 = vrot.lane.b32.xlu1 %v8193_v40, %s10090_s7  ;;  %v2071_v57 = vsel %vm2058_vm5, %v1529_v36, %v1627_v43  ;;  %v8268_v43 = vld [vmem:[#allocation2 + $0xd1] sm:$0xff] }
 0x160   : > { %1092 = vrot.lane.b32.xlu0 %v8094_v8, %s10086_s30  ;;  %v7333_v8 = vld [vmem:[#allocation2 + $0x67] sm:$0xff] }
 0x161   : > { %v1629_v46 = vpop.permute.xlu1 %1628  ;;  %v1906_v28 = vsel %vm873_vm0, %v7333_v8, %v1077_v11 }
 0x162   : > { %v1333_v48 = vpop.permute.xlu0 %1332  ;;  %v2072_v3 = vsel %vm2058_vm5, %v1531_v42, %v1629_v46 }
 0x163   : > { %1094 = vrot.lane.b32.xlu1 %v8101_v24, %s10086_s30 }
 0x164   : > { %1220 = vrot.lane.b32.xlu0 %v8110_v34, %s10087_s5  ;;  %v1907_v34 = vsel %vm873_vm0, %v7334_v55, %v1079_v25 }
 0x165   : > { %v1335_v49 = vpop.permute.xlu1 %1334  ;;  %v1940_v39 = vsel %vm1926_vm3, %v1907_v34, %v1207_v32 }
 0x166   : > { %v1725_v50 = vpop.permute.xlu0 %1724  ;;  %v1973_v45 = vsel %vm1959_vm4, %v1940_v39, %v1335_v49  ;;  %v8300_v39 = vld [vmem:[#allocation2 + $0xdf] sm:$0xff] }
 0x167   : > { %1222 = vrot.lane.b32.xlu1 %v8116_v38, %s10087_s5  ;;  %v1939_v38 = vsel %vm1926_vm3, %v1906_v28, %v1205_v26  ;;  %v2104_v53 = vsel %vm2091_vm7, %v2071_v57, %v1725_v50 }
 0x168   : > { %1544 = vrot.lane.b32.xlu0 %v8187_v33, %s10088_s10  ;;  %v1972_v37 = vsel %vm1959_vm4, %v1939_v38, %v1333_v48 }
 0x169   : > { %v1727_v29 = vpop.permute.xlu1 %1726 }
 0x16a   : > { %v1431_v24 = vpop.permute.xlu0 %1430  ;;  %v2105_v63 = vsel %vm2091_vm7, %v2072_v3, %v1727_v29  ;;  %v8287_v29 = vld [vmem:[%s10091_s29] ss:$0 sm:$0xff]  ;;  %v2187_v3 = vld [vmem:[%s10085_s12 + $0xf0] sm:$0xff] }
 0x16b   : > { %1546 = vrot.lane.b32.xlu1 %v8193_v40, %s10088_s10  ;;  %v2005_v21 = vsel %vm1992_vm6, %v1972_v37, %v1431_v24 }
 0x16c   : > { %1642 = vrot.lane.b32.xlu0 %v8210_v30, %s10089_s2  ;;  %v2038_v10 = vsel %vm2025_vm8, %v2005_v21, %v1529_v36  ;;  %v8262_v36 = vld [vmem:[#allocation2 + $0xc9] sm:$0xff] }
 0x16d   : > { %v1433_v47 = vpop.permute.xlu1 %1432  ;;  %v2245_v19 = vmul.f32 %v2181_v7, %v2038_v10  ;;  %v2186_v7 = vld [vmem:[%s10085_s12 + $0xe8] sm:$0xff] }
 0x16e   : > { %v2006_v61 = vsel %vm1992_vm6, %v1973_v45, %v1433_v47  ;;  %v1823_v51 = vpop.permute.xlu0 %1822 }
 0x16f   : > { %v2039_v0 = vsel %vm2025_vm8, %v2006_v61, %v1531_v42  ;;  %1644 = vrot.lane.b32.xlu1 %v8219_v41, %s10089_s2  ;;  %v2137_v6 = vsel %vm2124_vm1, %v2104_v53, %v1823_v51 }
 0x170   : > { %1348 = vrot.lane.b32.xlu0 %v8133_v52, %s10082_s0  ;;  %v2247_v14 = vmul.f32 %v2183_v62, %v2039_v0  ;;  %v2246_v16 = vmul.f32 %v2182_v54, %v2137_v6 }
 0x171   : > { %v1825_v1 = vpop.permute.xlu1 %1824 }
 0x172   : > { %v2138_v15 = vsel %vm2124_vm1, %v2105_v63, %v1825_v1  ;;  %v1081_v11 = vpop.permute.xlu0 %1080  ;;  %v2297_v31 = vpack.c.bf16 %v2247_v14, %v2245_v19  ;;  %v2188_v1 = vld [vmem:[%s10085_s12 + $0xf8] sm:$0xff] }
 0x173   : > { %v2248_v18 = vmul.f32 %v2184_v60, %v2138_v15  ;;  %1350 = vrot.lane.b32.xlu1 %v8142_v35, %s10082_s0  ;;  %v1908_v28 = vsel %vm873_vm0, %v7821_v12, %v1081_v11  ;;  %v2185_v15 = vld [vmem:[%s10085_s12 + $0xe0] sm:$0xff] }
 0x174   : > { %1740 = vrot.lane.b32.xlu0 %v8248_v13, %s10083_s3 }
 0x175   : > { %v2298_v25 = vpack.c.bf16 %v2248_v18, %v2246_v16  ;;  %v1083_v26 = vpop.permute.xlu1 %1082  ;;  %v8330_v18 = vld [vmem:[#allocation2 + $0xd8] sm:$0xff] }
 0x176   : > { %v1209_v27 = vpop.permute.xlu0 %1208  ;;  %v1909_v24 = vsel %vm873_vm0, %v7834_v17, %v1083_v26 }
 0x177   : > { %1742 = vrot.lane.b32.xlu1 %v8255_v23, %s10083_s3  ;;  %6270 = vmatprep.mubr.msk.bf16.mxu0 %vm2432_vm9, %v2298_v25  ;;  %v1941_v55 = vsel %vm1926_vm3, %v1908_v28, %v1209_v27  ;;  %v8346_v28 = vld [vmem:[#allocation2 + $0xd9] sm:$0xff] }
 0x178   : > { %2566 = vmatmul.mubr.bf16.gmra.mrb[24].mxu0 %v2297_v31  ;;  %1446 = vrot.lane.b32.xlu0 %v8171_v5, %s10084_s8 }
 0x179   : > { %v1211_v32 = vpop.permute.xlu1 %1210 }
 0x17a   : > { %v1533_v42 = vpop.permute.xlu0 %1532  ;;  %v1942_v12 = vsel %vm1926_vm3, %v1909_v24, %v1211_v32 }
 0x17b   : > { %1448 = vrot.lane.b32.xlu1 %v8178_v22, %s10084_s8 }
 0x17c   : > { %1838 = vrot.lane.b32.xlu0 %v8262_v36, %s10090_s7 }
 0x17d   : > { %v1535_v46 = vpop.permute.xlu1 %1534 }
 0x17e   : > { %v1631_v48 = vpop.permute.xlu0 %1630 }
 0x17f   : > { %1840 = vrot.lane.b32.xlu1 %v8268_v43, %s10090_s7  ;;  %v2073_v57 = vsel %vm2058_vm5, %v1533_v42, %v1631_v48  ;;  %v8339_v48 = vld [vmem:[#allocation2 + $0xe0] sm:$0xff] }
 0x180   : > { %1096 = vrot.lane.b32.xlu0 %v8171_v5, %s10086_s30 }
 0x181   : > { %v1633_v49 = vpop.permute.xlu1 %1632 }
 0x182   : > { %v1337_v50 = vpop.permute.xlu0 %1336  ;;  %v2074_v6 = vsel %vm2058_vm5, %v1535_v46, %v1633_v49 }
 0x183   : > { %1098 = vrot.lane.b32.xlu1 %v8178_v22, %s10086_s30  ;;  %v8289_v22 = vld [vmem:[#allocation2 + $0xd7] sm:$0xff]  ;;  %v1974_v37 = vsel %vm1959_vm4, %v1941_v55, %v1337_v50 }
 0x184   : > { %1224 = vrot.lane.b32.xlu0 %v8187_v33, %s10087_s5 }
 0x185   : > { %v1339_v20 = vpop.permute.xlu1 %1338 }
 0x186   : > { %v1729_v8 = vpop.permute.xlu0 %1728  ;;  %v1975_v17 = vsel %vm1959_vm4, %v1942_v12, %v1339_v20 }
 0x187   : > { %1226 = vrot.lane.b32.xlu1 %v8193_v40, %s10087_s5  ;;  %v2106_v0 = vsel %vm2091_vm7, %v2073_v57, %v1729_v8 }
 0x188   : > { %1548 = vrot.lane.b32.xlu0 %v8262_v36, %s10088_s10 }
 0x189   : > { %v1731_v5 = vpop.permute.xlu1 %1730 }
 0x18a   : > { %v1435_v33 = vpop.permute.xlu0 %1434  ;;  %v2107_v14 = vsel %vm2091_vm7, %v2074_v6, %v1731_v5 }
 0x18b   : > { %1550 = vrot.lane.b32.xlu1 %v8268_v43, %s10088_s10  ;;  %v2519_v40 = vpop.f32.mrb[0].mxu0  ;;  %v2007_v21 = vsel %vm1992_vm6, %v1974_v37, %v1435_v33  ;;  %v8352_v33 = vld [vmem:[#allocation2 + $0xe1] sm:$0xff] }
 0x18c   : > { %v2520_v34 = vadd.f32 %v8287_v29, %v2519_v40  ;;  %v2521_v38 = vpop.f32.mrb[1].mxu0  ;;  %1646 = vrot.lane.b32.xlu0 %v8289_v22, %s10089_s2  ;;  %v2040_v11 = vsel %vm2025_vm8, %v2007_v21, %v1533_v42 }
 0x18d   : > { %v1437_v45 = vpop.permute.xlu1 %1436  ;;  %v2522_v47 = vpop.f32.mrb[2].mxu0 }
 0x18e   : > { %v2008_v61 = vsel %vm1992_vm6, %v1975_v17, %v1437_v45  ;;  %v2523_v51 = vadd.f32 %v8287_v29, %v2522_v47  ;;  %v2524_v53 = vpop.f32.mrb[3].mxu0  ;;  %v1827_v62 = vpop.permute.xlu0 %1826  ;;  %v2646_v60 = vmax.f32 %v2520_v34, 0.0  ;;  %v8368_v17 = vld [vmem:[#allocation2 + $0xe7] sm:$0xff] }
 0x18f   : > { %v2041_v54 = vsel %vm2025_vm8, %v2008_v61, %v1535_v46  ;;  %1648 = vrot.lane.b32.xlu1 %v8300_v39, %s10089_s2  ;;  %v2139_v10 = vsel %vm2124_vm1, %v2106_v0, %v1827_v62  ;;  %v2249_v46 = vmul.f32 %v2185_v15, %v2040_v11  ;;  %v2190_v11 = vld [vmem:[%s10085_s12 + $0x108] sm:$0xff] }
 0x190   : > { %v2647_v63 = vmax.f32 %v2523_v51, 0.0  ;;  %1352 = vrot.lane.b32.xlu0 %v8210_v30, %s10082_s0  ;;  %v2251_v19 = vmul.f32 %v2187_v3, %v2041_v54  ;;  %v2250_v31 = vmul.f32 %v2186_v7, %v2139_v10  ;;  %v2191_v7 = vld [vmem:[%s10085_s12 + $0x110] sm:$0xff] }
 0x191   : > { %v1829_v16 = vpop.permute.xlu1 %1828 }
 0x192   : > { %v8332_v25 = vpack.c.bf16 %v2647_v63, %v2646_v60  ;;  %v2140_v26 = vsel %vm2124_vm1, %v2107_v14, %v1829_v16  ;;  %v1085_v27 = vpop.permute.xlu0 %1084  ;;  %v2299_v20 = vpack.c.bf16 %v2251_v19, %v2249_v46  ;;  %v2192_v19 = vld [vmem:[%s10085_s12 + $0x118] sm:$0xff]  ;;  %v8409_v46 = vld [vmem:[#allocation2 + $0xe8] sm:$0xff] }
 0x193   : > { %v2252_v32 = vmul.f32 %v2188_v1, %v2140_v26  ;;  %1354 = vrot.lane.b32.xlu1 %v8219_v41, %s10082_s0  ;;  %v1910_v37 = vsel %vm873_vm0, %v7902_v4, %v1085_v27  ;;  %v8379_v4 = vld [vmem:[#allocation2 + $0xef] sm:$0xff]  ;;  %v2189_v27 = vld [vmem:[%s10085_s12 + $0x100] sm:$0xff] }
 0x194   : > { %1744 = vrot.lane.b32.xlu0 %v8330_v18, %s10083_s3 }
 0x195   : > { %v2300_v42 = vpack.c.bf16 %v2252_v32, %v2250_v31  ;;  %v1087_v49 = vpop.permute.xlu1 %1086 }
 0x196   : > { %v1213_v50 = vpop.permute.xlu0 %1212 }
 0x197   : > { %1746 = vrot.lane.b32.xlu1 %v8339_v48, %s10083_s3  ;;  %6271 = vmatprep.mubr.msk.bf16.mxu0 %vm2432_vm9, %v2300_v42  ;;  %v1943_v47 = vsel %vm1926_vm3, %v1910_v37, %v1213_v50 }
 0x198   : > { %2574 = vmatmul.mubr.bf16.gmra.mrb[28].mxu0 %v2299_v20  ;;  %1450 = vrot.lane.b32.xlu0 %v8248_v13, %s10084_s8 }
 0x199   : > { %v1215_v8 = vpop.permute.xlu1 %1214 }
 0x19a   : > { %v1537_v5 = vpop.permute.xlu0 %1536 }
 0x19b   : > { %1452 = vrot.lane.b32.xlu1 %v8255_v23, %s10084_s8 }
 0x19c   : > { %1842 = vrot.lane.b32.xlu0 %v8346_v28, %s10090_s7 }
 0x19d   : > { %v1539_v24 = vpop.permute.xlu1 %1538 }
 0x19e   : > { %v1635_v40 = vpop.permute.xlu0 %1634 }
 0x19f   : > { %1844 = vrot.lane.b32.xlu1 %v8352_v33, %s10090_s7  ;;  %v2075_v62 = vsel %vm2058_vm5, %v1537_v5, %v1635_v40 }
 0x1a0   : > { %1100 = vrot.lane.b32.xlu0 %v8248_v13, %s10086_s30 }
 0x1a1   : > { %v1637_v55 = vpop.permute.xlu1 %1636 }
 0x1a2   : > { %v1341_v12 = vpop.permute.xlu0 %1340  ;;  %v2076_v1 = vsel %vm2058_vm5, %v1539_v24, %v1637_v55  ;;  %v8418_v55 = vld [vmem:[#allocation2 + $0xf0] sm:$0xff] }
 0x1a3   : > { %1102 = vrot.lane.b32.xlu1 %v8255_v23, %s10086_s30  ;;  %v1911_v23 = vsel %vm873_vm0, %v7911_v9, %v1087_v49  ;;  %v1976_v61 = vsel %vm1959_vm4, %v1943_v47, %v1341_v12 }
 0x1a4   : > { %1228 = vrot.lane.b32.xlu0 %v8262_v36, %s10087_s5 }
 0x1a5   : > { %v1343_v34 = vpop.permute.xlu1 %1342 }
 0x1a6   : > { %v1733_v38 = vpop.permute.xlu0 %1732 }
 0x1a7   : > { %1230 = vrot.lane.b32.xlu1 %v8268_v43, %s10087_s5  ;;  %v1944_v43 = vsel %vm1926_vm3, %v1911_v23, %v1215_v8  ;;  %v2108_v63 = vsel %vm2091_vm7, %v2075_v62, %v1733_v38  ;;  %v8431_v23 = vld [vmem:[#allocation2 + $0xf1] sm:$0xff] }
 0x1a8   : > { %1552 = vrot.lane.b32.xlu0 %v8346_v28, %s10088_s10  ;;  %v1977_v9 = vsel %vm1959_vm4, %v1944_v43, %v1343_v34 }
 0x1a9   : > { %v1735_v13 = vpop.permute.xlu1 %1734 }
 0x1aa   : > { %v1439_v45 = vpop.permute.xlu0 %1438  ;;  %v2109_v26 = vsel %vm2091_vm7, %v2076_v1, %v1735_v13  ;;  %v8425_v13 = vld [vmem:[#allocation2 + $0xe9] sm:$0xff] }
 0x1ab   : > { %1554 = vrot.lane.b32.xlu1 %v8352_v33, %s10088_s10  ;;  %v2527_v36 = vpop.f32.mrb[4].mxu0  ;;  %v2009_v0 = vsel %vm1992_vm6, %v1976_v61, %v1439_v45 }
 0x1ac   : > { %v2528_v57 = vadd.f32 %v8287_v29, %v2527_v36  ;;  %v2529_v21 = vpop.f32.mrb[5].mxu0  ;;  %1650 = vrot.lane.b32.xlu0 %v8368_v17, %s10089_s2  ;;  %v2042_v31 = vsel %vm2025_vm8, %v2009_v0, %v1537_v5 }
 0x1ad   : > { %v1441_v51 = vpop.permute.xlu1 %1440  ;;  %v2530_v53 = vpop.f32.mrb[6].mxu0  ;;  %v2253_v40 = vmul.f32 %v2189_v27, %v2042_v31 }
 0x1ae   : > { %v2010_v3 = vsel %vm1992_vm6, %v1977_v9, %v1441_v51  ;;  %v2531_v54 = vadd.f32 %v8287_v29, %v2530_v53  ;;  %v2532_v6 = vpop.f32.mrb[7].mxu0  ;;  %v1831_v60 = vpop.permute.xlu0 %1830  ;;  %v2648_v14 = vmax.f32 %v2528_v57, 0.0  ;;  %v8447_v51 = vld [vmem:[#allocation2 + $0xf7] sm:$0xff] }
 0x1af   : > { %v2043_v10 = vsel %vm2025_vm8, %v2010_v3, %v1539_v24  ;;  %1652 = vrot.lane.b32.xlu1 %v8379_v4, %s10089_s2  ;;  %v2141_v16 = vsel %vm2124_vm1, %v2108_v63, %v1831_v60 }
 0x1b0   : > { %v2649_v15 = vmax.f32 %v2531_v54, 0.0  ;;  %1356 = vrot.lane.b32.xlu0 %v8289_v22, %s10082_s0  ;;  %v2255_v42 = vmul.f32 %v2191_v7, %v2043_v10  ;;  %v2254_v8 = vmul.f32 %v2190_v11, %v2141_v16  ;;  %v2195_v16 = vld [vmem:[%s10085_s12 + $0x130] sm:$0xff] }
 0x1b1   : > { %v1833_v32 = vpop.permute.xlu1 %1832 }
 0x1b2   : > { %v8411_v49 = vpack.c.bf16 %v2649_v15, %v2648_v14  ;;  %v2142_v50 = vsel %vm2124_vm1, %v2109_v26, %v1833_v32  ;;  %v1089_v20 = vpop.permute.xlu0 %1088  ;;  %v2301_v38 = vpack.c.bf16 %v2255_v42, %v2253_v40  ;;  %v2194_v32 = vld [vmem:[%s10085_s12 + $0x128] sm:$0xff] }
 0x1b3   : > { %v2256_v24 = vmul.f32 %v2192_v19, %v2142_v50  ;;  %1358 = vrot.lane.b32.xlu1 %v8300_v39, %s10082_s0  ;;  %v1912_v9 = vsel %vm873_vm0, %v7979_v59, %v1089_v20  ;;  %v8458_v59 = vld [vmem:[#allocation2 + $0xff] sm:$0xff] }
 0x1b4   : > { %1748 = vrot.lane.b32.xlu0 %v8409_v46, %s10083_s3  ;;  %v2196_v50 = vld [vmem:[%s10085_s12 + $0x138] sm:$0xff] }
 0x1b5   : > { %v2302_v5 = vpack.c.bf16 %v2256_v24, %v2254_v8  ;;  %v1091_v12 = vpop.permute.xlu1 %1090  ;;  %v2193_v8 = vld [vmem:[%s10085_s12 + $0x120] sm:$0xff] }
 0x1b6   : > { %v1217_v34 = vpop.permute.xlu0 %1216 }
 0x1b7   : > { %1750 = vrot.lane.b32.xlu1 %v8418_v55, %s10083_s3  ;;  %6272 = vmatprep.mubr.msk.bf16.mxu0 %vm2432_vm9, %v2302_v5  ;;  %v1945_v62 = vsel %vm1926_vm3, %v1912_v9, %v1217_v34  ;;  %v8488_v5 = vld [vmem:[#allocation2 + $0xf8] sm:$0xff] }
 0x1b8   : > { %2582 = vmatmul.mubr.bf16.gmra.mrb[32].mxu0 %v2301_v38  ;;  %1454 = vrot.lane.b32.xlu0 %v8330_v18, %s10084_s8 }
 0x1b9   : > { %v1219_v37 = vpop.permute.xlu1 %1218 }
 0x1ba   : > { %v1541_v45 = vpop.permute.xlu0 %1540 }
 0x1bb   : > { %1456 = vrot.lane.b32.xlu1 %v8339_v48, %s10084_s8 }
 0x1bc   : > { %1846 = vrot.lane.b32.xlu0 %v8425_v13, %s10090_s7 }
 0x1bd   : > { %v1543_v36 = vpop.permute.xlu1 %1542 }
 0x1be   : > { %v1639_v47 = vpop.permute.xlu0 %1638 }
 0x1bf   : > { %1848 = vrot.lane.b32.xlu1 %v8431_v23, %s10090_s7  ;;  %v2077_v63 = vsel %vm2058_vm5, %v1541_v45, %v1639_v47 }
 0x1c0   : > { %1104 = vrot.lane.b32.xlu0 %v8330_v18, %s10086_s30 }
 0x1c1   : > { %v1641_v43 = vpop.permute.xlu1 %1640 }
 0x1c2   : > { %v1345_v57 = vpop.permute.xlu0 %1344  ;;  %v2078_v26 = vsel %vm2058_vm5, %v1543_v36, %v1641_v43 }
 0x1c3   : > { %1106 = vrot.lane.b32.xlu1 %v8339_v48, %s10086_s30  ;;  %v1913_v48 = vsel %vm873_vm0, %v7988_v44, %v1091_v12  ;;  %v1978_v54 = vsel %vm1959_vm4, %v1945_v62, %v1345_v57  ;;  %v8497_v57 = vld [vmem:[#allocation2 + $0x100] sm:$0xff] }
 0x1c4   : > { %1232 = vrot.lane.b32.xlu0 %v8346_v28, %s10087_s5 }
 0x1c5   : > { %v1347_v21 = vpop.permute.xlu1 %1346 }
 0x1c6   : > { %v1737_v61 = vpop.permute.xlu0 %1736 }
 0x1c7   : > { %1234 = vrot.lane.b32.xlu1 %v8352_v33, %s10087_s5  ;;  %v1946_v33 = vsel %vm1926_vm3, %v1913_v48, %v1219_v37  ;;  %v2110_v11 = vsel %vm2091_vm7, %v2077_v63, %v1737_v61 }
 0x1c8   : > { %1556 = vrot.lane.b32.xlu0 %v8425_v13, %s10088_s10  ;;  %v1979_v44 = vsel %vm1959_vm4, %v1946_v33, %v1347_v21 }
 0x1c9   : > { %v1739_v18 = vpop.permute.xlu1 %1738 }
 0x1ca   : > { %v1443_v53 = vpop.permute.xlu0 %1442  ;;  %v2111_v20 = vsel %vm2091_vm7, %v2078_v26, %v1739_v18 }
 0x1cb   : > { %1558 = vrot.lane.b32.xlu1 %v8431_v23, %s10088_s10  ;;  %v2535_v28 = vpop.f32.mrb[8].mxu0  ;;  %v2011_v7 = vsel %vm1992_vm6, %v1978_v54, %v1443_v53  ;;  %v8504_v53 = vld [vmem:[#allocation2 + $0xf9] sm:$0xff] }
 0x1cc   : > { %v2536_v0 = vadd.f32 %v8287_v29, %v2535_v28  ;;  %v2537_v3 = vpop.f32.mrb[9].mxu0  ;;  %1654 = vrot.lane.b32.xlu0 %v8447_v51, %s10089_s2  ;;  %v2044_v24 = vsel %vm2025_vm8, %v2011_v7, %v1541_v45  ;;  %v8510_v28 = vld [vmem:[#allocation2 + $0x101] sm:$0xff] }
 0x1cd   : > { %v1445_v6 = vpop.permute.xlu1 %1444  ;;  %v2538_v60 = vpop.f32.mrb[10].mxu0  ;;  %v2257_v43 = vmul.f32 %v2193_v8, %v2044_v24 }
 0x1ce   : > { %v2012_v10 = vsel %vm1992_vm6, %v1979_v44, %v1445_v6  ;;  %v2539_v1 = vadd.f32 %v8287_v29, %v2538_v60  ;;  %v2540_v14 = vpop.f32.mrb[11].mxu0  ;;  %v1835_v15 = vpop.permute.xlu0 %1834  ;;  %v2650_v27 = vmax.f32 %v2536_v0, 0.0  ;;  %v8526_v60 = vld [vmem:[#allocation2 + $0x107] sm:$0xff] }
 0x1cf   : > { %v2045_v19 = vsel %vm2025_vm8, %v2012_v10, %v1543_v36  ;;  %1656 = vrot.lane.b32.xlu1 %v8458_v59, %s10089_s2  ;;  %v2143_v42 = vsel %vm2124_vm1, %v2110_v11, %v1835_v15 }
 0x1d0   : > { %v2651_v31 = vmax.f32 %v2539_v1, 0.0  ;;  %1360 = vrot.lane.b32.xlu0 %v8368_v17, %s10082_s0  ;;  %v2259_v12 = vmul.f32 %v2195_v16, %v2045_v19  ;;  %v2258_v36 = vmul.f32 %v2194_v32, %v2143_v42 }
 0x1d1   : > { %v1837_v40 = vpop.permute.xlu1 %1836 }
 0x1d2   : > { %v8490_v34 = vpack.c.bf16 %v2651_v31, %v2650_v27  ;;  %v2144_v38 = vsel %vm2124_vm1, %v2111_v20, %v1837_v40  ;;  %v1093_v37 = vpop.permute.xlu0 %1092  ;;  %v2303_v9 = vpack.c.bf16 %v2259_v12, %v2257_v43  ;;  %v2198_v12 = vld [vmem:[%s10085_s12 + $0x148] sm:$0xff] }
 0x1d3   : > { %v2260_v47 = vmul.f32 %v2196_v50, %v2144_v38  ;;  %1362 = vrot.lane.b32.xlu1 %v8379_v4, %s10082_s0  ;;  %v1914_v6 = vsel %vm873_vm0, %v8056_v56, %v1093_v37  ;;  %v8537_v56 = vld [vmem:[#allocation2 + $0x10f] sm:$0xff]  ;;  %v2200_v37 = vld [vmem:[%s10085_s12 + $0x158] sm:$0xff] }
 0x1d4   : > { %1752 = vrot.lane.b32.xlu0 %v8488_v5, %s10083_s3  ;;  %v2199_v50 = vld [vmem:[%s10085_s12 + $0x150] sm:$0xff] }
 0x1d5   : > { %v2304_v45 = vpack.c.bf16 %v2260_v47, %v2258_v36  ;;  %v1095_v21 = vpop.permute.xlu1 %1094  ;;  %v2197_v47 = vld [vmem:[%s10085_s12 + $0x140] sm:$0xff] }
 0x1d6   : > { %v1221_v61 = vpop.permute.xlu0 %1220 }
 0x1d7   : > { %1754 = vrot.lane.b32.xlu1 %v8497_v57, %s10083_s3  ;;  %6273 = vmatprep.mubr.msk.bf16.mxu0 %vm2432_vm9, %v2304_v45  ;;  %v1947_v7 = vsel %vm1926_vm3, %v1914_v6, %v1221_v61 }
 0x1d8   : > { %2590 = vmatmul.mubr.bf16.gmra.mrb[36].mxu0 %v2303_v9  ;;  %1458 = vrot.lane.b32.xlu0 %v8409_v46, %s10084_s8 }
 0x1d9   : > { %v1223_v18 = vpop.permute.xlu1 %1222 }
 0x1da   : > { %v1545_v48 = vpop.permute.xlu0 %1544 }
 0x1db   : > { %1460 = vrot.lane.b32.xlu1 %v8418_v55, %s10084_s8 }
 0x1dc   : > { %1850 = vrot.lane.b32.xlu0 %v8504_v53, %s10090_s7 }
 0x1dd   : > { %v1547_v62 = vpop.permute.xlu1 %1546 }
 0x1de   : > { %v1643_v33 = vpop.permute.xlu0 %1642 }
 0x1df   : > { %1852 = vrot.lane.b32.xlu1 %v8510_v28, %s10090_s7  ;;  %v2079_v16 = vsel %vm2058_vm5, %v1545_v48, %v1643_v33 }
 0x1e0   : > { %1108 = vrot.lane.b32.xlu0 %v8409_v46, %s10086_s30 }
 0x1e1   : > { %v1645_v0 = vpop.permute.xlu1 %1644 }
 0x1e2   : > { %v1349_v3 = vpop.permute.xlu0 %1348  ;;  %v2080_v8 = vsel %vm2058_vm5, %v1547_v62, %v1645_v0 }
 0x1e3   : > { %1110 = vrot.lane.b32.xlu1 %v8418_v55, %s10086_s30  ;;  %v1915_v55 = vsel %vm873_vm0, %v8065_v58, %v1095_v21  ;;  %v1980_v14 = vsel %vm1959_vm4, %v1947_v7, %v1349_v3  ;;  %v8567_v21 = vld [vmem:[#allocation2 + $0x108] sm:$0xff]  ;;  %v1013_v7 = vld [vmem:[#allocation2 + $0x111] sm:$0xff] }
 0x1e4   : > { %1236 = vrot.lane.b32.xlu0 %v8425_v13, %s10087_s5 }
 0x1e5   : > { %v1351_v54 = vpop.permute.xlu1 %1350 }
 0x1e6   : > { %v1741_v44 = vpop.permute.xlu0 %1740 }
 0x1e7   : > { %1238 = vrot.lane.b32.xlu1 %v8431_v23, %s10087_s5  ;;  %v1948_v23 = vsel %vm1926_vm3, %v1915_v55, %v1223_v18  ;;  %v2112_v42 = vsel %vm2091_vm7, %v2079_v16, %v1741_v44  ;;  %v1012_v55 = vld [vmem:[#allocation2 + $0x109] sm:$0xff] }
 0x1e8   : > { %1560 = vrot.lane.b32.xlu0 %v8504_v53, %s10088_s10  ;;  %v1981_v58 = vsel %vm1959_vm4, %v1948_v23, %v1351_v54  ;;  %v8576_v54 = vld [vmem:[#allocation2 + $0x110] sm:$0xff] }
 0x1e9   : > { %v1743_v46 = vpop.permute.xlu1 %1742 }
 0x1ea   : > { %v1447_v63 = vpop.permute.xlu0 %1446  ;;  %v2113_v36 = vsel %vm2091_vm7, %v2080_v8, %v1743_v46 }
 0x1eb   : > { %1562 = vrot.lane.b32.xlu1 %v8510_v28, %s10088_s10  ;;  %v2543_v13 = vpop.f32.mrb[12].mxu0  ;;  %v2013_v19 = vsel %vm1992_vm6, %v1980_v14, %v1447_v63 }
 0x1ec   : > { %v2544_v10 = vadd.f32 %v8287_v29, %v2543_v13  ;;  %v2545_v1 = vpop.f32.mrb[13].mxu0  ;;  %1658 = vrot.lane.b32.xlu0 %v8526_v60, %s10089_s2  ;;  %v2046_v43 = vsel %vm2025_vm8, %v2013_v19, %v1545_v48 }
 0x1ed   : > { %v1449_v15 = vpop.permute.xlu1 %1448  ;;  %v2546_v11 = vpop.f32.mrb[14].mxu0  ;;  %v2261_v3 = vmul.f32 %v2197_v47, %v2046_v43 }
 0x1ee   : > { %v2014_v26 = vsel %vm1992_vm6, %v1981_v58, %v1449_v15  ;;  %v2547_v27 = vadd.f32 %v8287_v29, %v2546_v11  ;;  %v2548_v31 = vpop.f32.mrb[15].mxu0  ;;  %v1839_v32 = vpop.permute.xlu0 %1838  ;;  %v2652_v24 = vmax.f32 %v2544_v10, 0.0 }
 0x1ef   : > { %v2047_v20 = vsel %vm2025_vm8, %v2014_v26, %v1547_v62  ;;  %1660 = vrot.lane.b32.xlu1 %v8537_v56, %s10089_s2  ;;  %v2145_v38 = vsel %vm2124_vm1, %v2112_v42, %v1839_v32  ;;  %v1015_v32 = vld [vmem:[#allocation2 + $0x11f] sm:$0xff] }
 0x1f0   : > { %v2653_v40 = vmax.f32 %v2547_v27, 0.0  ;;  %1364 = vrot.lane.b32.xlu0 %v8447_v51, %s10082_s0  ;;  %v2263_v61 = vmul.f32 %v2199_v50, %v2047_v20  ;;  %v2262_v33 = vmul.f32 %v2198_v12, %v2145_v38 }
 0x1f1   : > { %v1841_v45 = vpop.permute.xlu1 %1840 }
 0x1f2   : > { %v8569_v9 = vpack.c.bf16 %v2653_v40, %v2652_v24  ;;  %v2146_v18 = vsel %vm2124_vm1, %v2113_v36, %v1841_v45  ;;  %v1097_v62 = vpop.permute.xlu0 %1096  ;;  %v2305_v46 = vpack.c.bf16 %v2263_v61, %v2261_v3  ;;  %v2203_v36 = vld [vmem:[%s10085_s12 + $0x170] sm:$0xff]  ;;  %v2201_v3 = vld [vmem:[%s10085_s12 + $0x160] sm:$0xff] }
 0x1f3   : > { %v2264_v0 = vmul.f32 %v2200_v37, %v2146_v18  ;;  %1366 = vrot.lane.b32.xlu1 %v8458_v59, %s10082_s0  ;;  %v1916_v11 = vsel %vm873_vm0, %v8133_v52, %v1097_v62  ;;  %v2202_v18 = vld [vmem:[%s10085_s12 + $0x168] sm:$0xff] }
 0x1f4   : > { %1756 = vrot.lane.b32.xlu0 %v8567_v21, %s10083_s3 }
 0x1f5   : > { %v2306_v48 = vpack.c.bf16 %v2264_v0, %v2262_v33  ;;  %v1099_v44 = vpop.permute.xlu1 %1098  ;;  %v2204_v33 = vld [vmem:[%s10085_s12 + $0x178] sm:$0xff] }
 0x1f6   : > { %v1225_v6 = vpop.permute.xlu0 %1224  ;;  %v1917_v26 = vsel %vm873_vm0, %v8142_v35, %v1099_v44 }
 0x1f7   : > { %1758 = vrot.lane.b32.xlu1 %v8576_v54, %s10083_s3  ;;  %6274 = vmatprep.mubr.msk.bf16.mxu0 %vm2432_vm9, %v2306_v48 }
 0x1f8   : > { %2598 = vmatmul.mubr.bf16.gmra.mrb[40].mxu0 %v2305_v46  ;;  %1462 = vrot.lane.b32.xlu0 %v8488_v5, %s10084_s8 }
 0x1f9   : > { %v1227_v63 = vpop.permute.xlu1 %1226 }
 0x1fa   : > { %v1549_v13 = vpop.permute.xlu0 %1548  ;;  %v1950_v27 = vsel %vm1926_vm3, %v1917_v26, %v1227_v63 }
 0x1fb   : > { %1464 = vrot.lane.b32.xlu1 %v8497_v57, %s10084_s8 }
 0x1fc   : > { %1854 = vrot.lane.b32.xlu0 %v1012_v55, %s10090_s7 }
 0x1fd   : > { %v1551_v23 = vpop.permute.xlu1 %1550 }
 0x1fe   : > { %v1647_v10 = vpop.permute.xlu0 %1646 }
 0x1ff   : > { %1856 = vrot.lane.b32.xlu1 %v1013_v7, %s10090_s7  ;;  %v2081_v35 = vsel %vm2058_vm5, %v1549_v13, %v1647_v10 }
 0x200   : > { %1112 = vrot.lane.b32.xlu0 %v8488_v5, %s10086_s30  ;;  %v1014_v5 = vld [vmem:[#allocation2 + $0x117] sm:$0xff] }
 0x201   : > { %v1649_v1 = vpop.permute.xlu1 %1648 }
 0x202   : > { %v1353_v14 = vpop.permute.xlu0 %1352  ;;  %v2082_v43 = vsel %vm2058_vm5, %v1551_v23, %v1649_v1  ;;  %v1017_v1 = vld [vmem:[#allocation2 + $0x120] sm:$0xff] }
 0x203   : > { %1114 = vrot.lane.b32.xlu1 %v8497_v57, %s10086_s30  ;;  %s10095_s30 = sld [smem:[#allocation13_spill]] }
 0x204   : > { %1240 = vrot.lane.b32.xlu0 %v8504_v53, %s10087_s5  ;;  %v1949_v53 = vsel %vm1926_vm3, %v1916_v11, %v1225_v6  ;;  %v1016_v6 = vld [vmem:[#allocation2 + $0x118] sm:$0xff] }
 0x205   : > { %v1355_v58 = vpop.permute.xlu1 %1354  ;;  %v1982_v52 = vsel %vm1959_vm4, %v1949_v53, %v1353_v14 }
 0x206   : > { %v1745_v15 = vpop.permute.xlu0 %1744  ;;  %v1983_v42 = vsel %vm1959_vm4, %v1950_v27, %v1355_v58 }
 0x207   : > { %1242 = vrot.lane.b32.xlu1 %v8510_v28, %s10087_s5  ;;  %v2114_v37 = vsel %vm2091_vm7, %v2081_v35, %v1745_v15  ;;  %s10092_s5 = sld [smem:[#allocation11_spill]] }
 0x208   : > { %1564 = vrot.lane.b32.xlu0 %v1012_v55, %s10088_s10 }
 0x209   : > { %v1747_v16 = vpop.permute.xlu1 %1746 }
 0x20a   : > { %v1451_v19 = vpop.permute.xlu0 %1450  ;;  %v2115_v0 = vsel %vm2091_vm7, %v2082_v43, %v1747_v16  ;;  %v1018_v16 = vld [vmem:[#allocation2 + $0x119] sm:$0xff] }
 0x20b   : > { %1566 = vrot.lane.b32.xlu1 %v1013_v7, %s10088_s10  ;;  %v2551_v57 = vpop.f32.mrb[16].mxu0  ;;  %v2015_v8 = vsel %vm1992_vm6, %v1982_v52, %v1451_v19 }
 0x20c   : > { %v2552_v28 = vadd.f32 %v8287_v29, %v2551_v57  ;;  %v2553_v31 = vpop.f32.mrb[17].mxu0  ;;  %1662 = vrot.lane.b32.xlu0 %v1014_v5, %s10089_s2  ;;  %v2048_v48 = vsel %vm2025_vm8, %v2015_v8, %v1549_v13 }
 0x20d   : > { %v1453_v50 = vpop.permute.xlu1 %1452  ;;  %v2554_v20 = vpop.f32.mrb[18].mxu0 }
 0x20e   : > { %v2016_v24 = vsel %vm1992_vm6, %v1983_v42, %v1453_v50  ;;  %v2555_v40 = vadd.f32 %v8287_v29, %v2554_v20  ;;  %v2556_v12 = vpop.f32.mrb[19].mxu0  ;;  %v1843_v38 = vpop.permute.xlu0 %1842  ;;  %v2654_v45 = vmax.f32 %v2552_v28, 0.0 }
 0x20f   : > { %v2049_v47 = vsel %vm2025_vm8, %v2016_v24, %v1551_v23  ;;  %1664 = vrot.lane.b32.xlu1 %v1015_v32, %s10089_s2  ;;  %v2147_v62 = vsel %vm2124_vm1, %v2114_v37, %v1843_v38 }
 0x210   : > { %v2655_v61 = vmax.f32 %v2555_v40, 0.0  ;;  %1368 = vrot.lane.b32.xlu0 %v8526_v60, %s10082_s0  ;;  %v2267_v46 = vmul.f32 %v2203_v36, %v2049_v47  ;;  %v2266_v23 = vmul.f32 %v2202_v18, %v2147_v62  ;;  %v2265_v60 = vmul.f32 %v2201_v3, %v2048_v48  ;;  %v2208_v48 = vld [vmem:[%s10085_s12 + $0x198] sm:$0xff] }
 0x211   : > { %v1845_v44 = vpop.permute.xlu1 %1844 }
 0x212   : > { %v8632_v63 = vpack.c.bf16 %v2655_v61, %v2654_v45  ;;  %v2148_v55 = vsel %vm2124_vm1, %v2115_v0, %v1845_v44  ;;  %v1101_v7 = vpop.permute.xlu0 %1100  ;;  %v2307_v15 = vpack.c.bf16 %v2267_v46, %v2265_v60  ;;  %v2207_v45 = vld [vmem:[%s10085_s12 + $0x190] sm:$0xff]  ;;  %v2206_v0 = vld [vmem:[%s10085_s12 + $0x188] sm:$0xff] }
 0x213   : > { %v2268_v10 = vmul.f32 %v2204_v33, %v2148_v55  ;;  %1370 = vrot.lane.b32.xlu1 %v8537_v56, %s10082_s0  ;;  %v1019_v56 = vld [vmem:[#allocation2 + $0x121] sm:$0xff]  ;;  %s10093_s0 = sld [smem:[#allocation16_spill]] }
 0x214   : > { %1760 = vrot.lane.b32.xlu0 %v1016_v6, %s10083_s3  ;;  %v2205_v6 = vld [vmem:[%s10085_s12 + $0x180] sm:$0xff] }
 0x215   : > { %v2308_v14 = vpack.c.bf16 %v2268_v10, %v2266_v23  ;;  %v1103_v58 = vpop.permute.xlu1 %1102 }
 0x216   : > { %v1229_v13 = vpop.permute.xlu0 %1228  ;;  %v1919_v52 = vsel %vm873_vm0, %v8219_v41, %v1103_v58 }
 0x217   : > { %1762 = vrot.lane.b32.xlu1 %v1017_v1, %s10083_s3  ;;  %6275 = vmatprep.mubr.msk.bf16.mxu0 %vm2432_vm9, %v2308_v14  ;;  %s10099_s3 = sld [smem:[#allocation19_spill]] }
 0x218   : > { %2606 = vmatmul.mubr.bf16.gmra.mrb[44].mxu0 %v2307_v15  ;;  %1466 = vrot.lane.b32.xlu0 %v8567_v21, %s10084_s8  ;;  %v1918_v21 = vsel %vm873_vm0, %v8210_v30, %v1101_v7 }
 0x219   : > { %v1231_v11 = vpop.permute.xlu1 %1230  ;;  %v1951_v42 = vsel %vm1926_vm3, %v1918_v21, %v1229_v13 }
 0x21a   : > { %v1553_v5 = vpop.permute.xlu0 %1552  ;;  %v1952_v50 = vsel %vm1926_vm3, %v1919_v52, %v1231_v11 }
 0x21b   : > { %1468 = vrot.lane.b32.xlu1 %v8576_v54, %s10084_s8 }
 0x21c   : > { %1858 = vrot.lane.b32.xlu0 %v1018_v16, %s10090_s7 }
 0x21d   : > { %v1555_v19 = vpop.permute.xlu1 %1554 }
 0x21e   : > { %v1651_v26 = vpop.permute.xlu0 %1650 }
 0x21f   : > { %1860 = vrot.lane.b32.xlu1 %v1019_v56, %s10090_s7  ;;  %v2083_v30 = vsel %vm2058_vm5, %v1553_v5, %v1651_v26 }
 0x221   : > { %v1653_v57 = vpop.permute.xlu1 %1652 }
 0x222   : > { %v1357_v53 = vpop.permute.xlu0 %1356  ;;  %v2084_v18 = vsel %vm2058_vm5, %v1555_v19, %v1653_v57 }
 0x223   : > { %v1984_v8 = vsel %vm1959_vm4, %v1951_v42, %v1357_v53 }
 0x225   : > { %v1359_v27 = vpop.permute.xlu1 %1358 }
 0x226   : > { %v1749_v28 = vpop.permute.xlu0 %1748  ;;  %v1985_v24 = vsel %vm1959_vm4, %v1952_v50, %v1359_v27 }
 0x227   : > { %v2116_v43 = vsel %vm2091_vm7, %v2083_v30, %v1749_v28 }
 0x229   : > { %v1751_v31 = vpop.permute.xlu1 %1750 }
 0x22a   : > { %v1455_v32 = vpop.permute.xlu0 %1454  ;;  %v2117_v44 = vsel %vm2091_vm7, %v2084_v18, %v1751_v31 }
 0x22b   : > { %v2559_v54 = vpop.f32.mrb[20].mxu0  ;;  %v2017_v38 = vsel %vm1992_vm6, %v1984_v8, %v1455_v32 }
 0x22c   : > { %v2560_v20 = vadd.f32 %v8287_v29, %v2559_v54  ;;  %v2561_v35 = vpop.f32.mrb[21].mxu0  ;;  %v2050_v46 = vsel %vm2025_vm8, %v2017_v38, %v1553_v5 }
 0x22d   : > { %v1457_v40 = vpop.permute.xlu1 %1456  ;;  %v2562_v12 = vpop.f32.mrb[22].mxu0  ;;  %v2269_v58 = vmul.f32 %v2205_v6, %v2050_v46 }
 0x22e   : > { %v2018_v41 = vsel %vm1992_vm6, %v1985_v24, %v1457_v40  ;;  %v2563_v37 = vadd.f32 %v8287_v29, %v2562_v12  ;;  %v2564_v36 = vpop.f32.mrb[23].mxu0  ;;  %v1847_v47 = vpop.permute.xlu0 %1846  ;;  %v2656_v62 = vmax.f32 %v2560_v20, 0.0 }
 0x22f   : > { %v2051_v61 = vsel %vm2025_vm8, %v2018_v41, %v1555_v19  ;;  %v2149_v3 = vsel %vm2124_vm1, %v2116_v43, %v1847_v47  ;;  %v2211_v47 = vld [vmem:[%s10085_s12 + $0x1b0] sm:$0xff] }
 0x230   : > { %v2657_v33 = vmax.f32 %v2563_v37, 0.0  ;;  %v2271_v7 = vmul.f32 %v2207_v45, %v2051_v61  ;;  %v2270_v1 = vmul.f32 %v2206_v0, %v2149_v3  ;;  %v2212_v0 = vld [vmem:[%s10085_s12 + $0x1b8] sm:$0xff] }
 0x231   : > { %v1849_v55 = vpop.permute.xlu1 %1848 }
 0x232   : > { %v8677_v23 = vpack.c.bf16 %v2657_v33, %v2656_v62  ;;  %v2150_v10 = vsel %vm2124_vm1, %v2117_v44, %v1849_v55  ;;  %v1105_v60 = vpop.permute.xlu0 %1104  ;;  %v2309_v16 = vpack.c.bf16 %v2271_v7, %v2269_v58  ;;  %v2210_v62 = vld [vmem:[%s10085_s12 + $0x1a8] sm:$0xff] }
 0x233   : > { %v2272_v14 = vmul.f32 %v2208_v48, %v2150_v10  ;;  %v1920_v21 = vsel %vm873_vm0, %v8289_v22, %v1105_v60  ;;  %v2209_v48 = vld [vmem:[%s10085_s12 + $0x1a0] sm:$0xff] }
 0x235   : > { %v2310_v13 = vpack.c.bf16 %v2272_v14, %v2270_v1  ;;  %v1107_v15 = vpop.permute.xlu1 %1106 }
 0x236   : > { %v1233_v11 = vpop.permute.xlu0 %1232  ;;  %v1921_v52 = vsel %vm873_vm0, %v8300_v39, %v1107_v15 }
 0x237   : > { %6276 = vmatprep.mubr.msk.bf16.mxu0 %vm2432_vm9, %v2310_v13  ;;  %v1953_v42 = vsel %vm1926_vm3, %v1920_v21, %v1233_v11 }
 0x238   : > { %2614 = vmatmul.mubr.bf16.gmra.mrb[48].mxu0 %v2309_v16 }
 0x239   : > { %v1235_v56 = vpop.permute.xlu1 %1234 }
 0x23a   : > { %v1557_v19 = vpop.permute.xlu0 %1556  ;;  %v1954_v50 = vsel %vm1926_vm3, %v1921_v52, %v1235_v56 }
 0x23d   : > { %v1559_v5 = vpop.permute.xlu1 %1558 }
 0x23e   : > { %v1655_v26 = vpop.permute.xlu0 %1654 }
 0x23f   : > { %v2085_v22 = vsel %vm2058_vm5, %v1557_v19, %v1655_v26 }
 0x241   : > { %v1657_v57 = vpop.permute.xlu1 %1656 }
 0x242   : > { %v1361_v53 = vpop.permute.xlu0 %1360  ;;  %v2086_v45 = vsel %vm2058_vm5, %v1559_v5, %v1657_v57 }
 0x243   : > { %v1986_v8 = vsel %vm1959_vm4, %v1953_v42, %v1361_v53 }
 0x245   : > { %v1363_v27 = vpop.permute.xlu1 %1362 }
 0x246   : > { %v1753_v28 = vpop.permute.xlu0 %1752  ;;  %v1987_v24 = vsel %vm1959_vm4, %v1954_v50, %v1363_v27 }
 0x247   : > { %v2118_v36 = vsel %vm2091_vm7, %v2085_v22, %v1753_v28 }
 0x249   : > { %v1755_v31 = vpop.permute.xlu1 %1754 }
 0x24a   : > { %v1459_v32 = vpop.permute.xlu0 %1458  ;;  %v2119_v3 = vsel %vm2091_vm7, %v2086_v45, %v1755_v31  ;;  %v2214_v45 = vld [vmem:[%s10085_s12 + $0x1c8] sm:$0xff] }
 0x24b   : > { %v2567_v54 = vpop.f32.mrb[24].mxu0  ;;  %v2019_v30 = vsel %vm1992_vm6, %v1986_v8, %v1459_v32 }
 0x24c   : > { %v2568_v20 = vadd.f32 %v8287_v29, %v2567_v54  ;;  %v2569_v35 = vpop.f32.mrb[25].mxu0  ;;  %v2052_v44 = vsel %vm2025_vm8, %v2019_v30, %v1557_v19 }
 0x24d   : > { %v1461_v40 = vpop.permute.xlu1 %1460  ;;  %v2570_v12 = vpop.f32.mrb[26].mxu0  ;;  %v2273_v14 = vmul.f32 %v2209_v48, %v2052_v44 }
 0x24e   : > { %v2020_v39 = vsel %vm1992_vm6, %v1987_v24, %v1461_v40  ;;  %v2571_v38 = vadd.f32 %v8287_v29, %v2570_v12  ;;  %v2572_v41 = vpop.f32.mrb[27].mxu0  ;;  %v1851_v37 = vpop.permute.xlu0 %1850  ;;  %v2658_v61 = vmax.f32 %v2568_v20, 0.0 }
 0x24f   : > { %v2053_v43 = vsel %vm2025_vm8, %v2020_v39, %v1559_v5  ;;  %v2151_v33 = vsel %vm2124_vm1, %v2118_v36, %v1851_v37  ;;  %v2215_v41 = vld [vmem:[%s10085_s12 + $0x1d0] sm:$0xff] }
 0x250   : > { %v2659_v18 = vmax.f32 %v2571_v38, 0.0  ;;  %v2275_v46 = vmul.f32 %v2211_v47, %v2053_v43  ;;  %v2274_v60 = vmul.f32 %v2210_v62, %v2151_v33  ;;  %v2213_v62 = vld [vmem:[%s10085_s12 + $0x1c0] sm:$0xff] }
 0x251   : > { %v1853_v6 = vpop.permute.xlu1 %1852 }
 0x252   : > { %v8712_v55 = vpack.c.bf16 %v2659_v18, %v2658_v61  ;;  %v2152_v7 = vsel %vm2124_vm1, %v2119_v3, %v1853_v6  ;;  %v1109_v10 = vpop.permute.xlu0 %1108  ;;  %v2311_v11 = vpack.c.bf16 %v2275_v46, %v2273_v14  ;;  %v2216_v61 = vld [vmem:[%s10085_s12 + $0x1d8] sm:$0xff] }
 0x253   : > { %v2276_v1 = vmul.f32 %v2212_v0, %v2152_v7  ;;  %v1922_v28 = vsel %vm873_vm0, %v8368_v17, %v1109_v10 }
 0x255   : > { %v2312_v58 = vpack.c.bf16 %v2276_v1, %v2274_v60  ;;  %v1111_v13 = vpop.permute.xlu1 %1110 }
 0x256   : > { %v1237_v15 = vpop.permute.xlu0 %1236  ;;  %v1923_v32 = vsel %vm873_vm0, %v8379_v4, %v1111_v13 }
 0x257   : > { %6277 = vmatprep.mubr.msk.bf16.mxu0 %vm2432_vm9, %v2312_v58  ;;  %v1955_v54 = vsel %vm1926_vm3, %v1922_v28, %v1237_v15 }
 0x258   : > { %2622 = vmatmul.mubr.bf16.gmra.mrb[52].mxu0 %v2311_v11 }
 0x259   : > { %v1239_v16 = vpop.permute.xlu1 %1238 }
 0x25a   : > { %v1561_v56 = vpop.permute.xlu0 %1560  ;;  %v1956_v42 = vsel %vm1926_vm3, %v1923_v32, %v1239_v16 }
 0x25d   : > { %v1563_v19 = vpop.permute.xlu1 %1562 }
 0x25e   : > { %v1659_v5 = vpop.permute.xlu0 %1658 }
 0x25f   : > { %v2087_v17 = vsel %vm2058_vm5, %v1561_v56, %v1659_v5 }
 0x261   : > { %v1661_v26 = vpop.permute.xlu1 %1660 }
 0x262   : > { %v1365_v57 = vpop.permute.xlu0 %1364  ;;  %v2088_v36 = vsel %vm2058_vm5, %v1563_v19, %v1661_v26 }
 0x263   : > { %v1988_v35 = vsel %vm1959_vm4, %v1955_v54, %v1365_v57 }
 0x265   : > { %v1367_v53 = vpop.permute.xlu1 %1366 }
 0x266   : > { %v1757_v27 = vpop.permute.xlu0 %1756  ;;  %v1989_v8 = vsel %vm1959_vm4, %v1956_v42, %v1367_v53 }
 0x267   : > { %v2120_v38 = vsel %vm2091_vm7, %v2087_v17, %v1757_v27 }
 0x269   : > { %v1759_v21 = vpop.permute.xlu1 %1758 }
 0x26a   : > { %v1463_v31 = vpop.permute.xlu0 %1462  ;;  %v2121_v18 = vsel %vm2091_vm7, %v2088_v36, %v1759_v21 }
 0x26b   : > { %v2575_v52 = vpop.f32.mrb[28].mxu0  ;;  %v2021_v12 = vsel %vm1992_vm6, %v1988_v35, %v1463_v31 }
 0x26c   : > { %v2576_v50 = vadd.f32 %v8287_v29, %v2575_v52  ;;  %v2577_v20 = vpop.f32.mrb[29].mxu0  ;;  %v2054_v33 = vsel %vm2025_vm8, %v2021_v12, %v1561_v56  ;;  %v8760_v52 = vld [vmem:[%s10091_s29] ss:$0 sm:$0xff] }
 0x26d   : > { %v1465_v24 = vpop.permute.xlu1 %1464  ;;  %v2578_v40 = vpop.f32.mrb[30].mxu0  ;;  %v2277_v10 = vmul.f32 %v2213_v62, %v2054_v33 }
 0x26e   : > { %v2022_v4 = vsel %vm1992_vm6, %v1989_v8, %v1465_v24  ;;  %v2579_v22 = vadd.f32 %v8287_v29, %v2578_v40  ;;  %v2580_v30 = vpop.f32.mrb[31].mxu0  ;;  %v1855_v39 = vpop.permute.xlu0 %1854  ;;  %v2660_v47 = vmax.f32 %v2576_v50, 0.0 }
 0x26f   : > { %v2055_v37 = vsel %vm2025_vm8, %v2022_v4, %v1563_v19  ;;  %v2153_v29 = vsel %vm2124_vm1, %v2120_v38, %v1855_v39 }
 0x270   : > { %v2661_v43 = vmax.f32 %v2579_v22, 0.0  ;;  %v2279_v3 = vmul.f32 %v2215_v41, %v2055_v37  ;;  %v2278_v46 = vmul.f32 %v2214_v45, %v2153_v29  ;;  %v2219_v22 = vld [vmem:[%s10085_s12 + $0x1f0] sm:$0xff]  ;;  %v2218_v37 = vld [vmem:[%s10085_s12 + $0x1e8] sm:$0xff]  ;;  %v2217_v45 = vld [vmem:[%s10085_s12 + $0x1e0] sm:$0xff] }
 0x271   : > { %v1857_v0 = vpop.permute.xlu1 %1856 }
 0x272   : > { %v8747_v48 = vpack.c.bf16 %v2661_v43, %v2660_v47  ;;  %v2154_v44 = vsel %vm2124_vm1, %v2121_v18, %v1857_v0  ;;  %v1113_v6 = vpop.permute.xlu0 %1112  ;;  %v2313_v58 = vpack.c.bf16 %v2279_v3, %v2277_v10  ;;  %v2220_v47 = vld [vmem:[%s10085_s12 + $0x1f8] sm:$0xff] }
 0x273   : > { %v2280_v7 = vmul.f32 %v2216_v61, %v2154_v44  ;;  %v1924_v57 = vsel %vm873_vm0, %v8447_v51, %v1113_v6 }
 0x275   : > { %v2314_v60 = vpack.c.bf16 %v2280_v7, %v2278_v46  ;;  %v1115_v1 = vpop.permute.xlu1 %1114 }
 0x276   : > { %v1241_v14 = vpop.permute.xlu0 %1240  ;;  %v1925_v28 = vsel %vm873_vm0, %v8458_v59, %v1115_v1 }
 0x277   : > { %6278 = vmatprep.mubr.msk.bf16.mxu0 %vm2432_vm9, %v2314_v60  ;;  %v1957_v31 = vsel %vm1926_vm3, %v1924_v57, %v1241_v14 }
 0x278   : > { %2630 = vmatmul.mubr.bf16.gmra.mrb[56].mxu0 %v2313_v58 }
 0x279   : > { %v1243_v13 = vpop.permute.xlu1 %1242 }
 0x27a   : > { %v1565_v15 = vpop.permute.xlu0 %1564  ;;  %v1958_v32 = vsel %vm1926_vm3, %v1925_v28, %v1243_v13 }
 0x27d   : > { %v1567_v11 = vpop.permute.xlu1 %1566 }
 0x27e   : > { %v1663_v16 = vpop.permute.xlu0 %1662 }
 0x27f   : > { %v2089_v59 = vsel %vm2058_vm5, %v1565_v15, %v1663_v16 }
 0x281   : > { %v1665_v56 = vpop.permute.xlu1 %1664 }
 0x282   : > { %v1369_v19 = vpop.permute.xlu0 %1368  ;;  %v2090_v39 = vsel %vm2058_vm5, %v1567_v11, %v1665_v56 }
 0x283   : > { %v1990_v51 = vsel %vm1959_vm4, %v1957_v31, %v1369_v19 }
 0x285   : > { %v1371_v5 = vpop.permute.xlu1 %1370 }
 0x286   : > { %v1761_v26 = vpop.permute.xlu0 %1760  ;;  %v1991_v50 = vsel %vm1959_vm4, %v1958_v32, %v1371_v5 }
 0x287   : > { %v2122_v4 = vsel %vm2091_vm7, %v2089_v59, %v1761_v26 }
 0x289   : > { %v1763_v53 = vpop.permute.xlu1 %1762 }
 0x28a   : > { %v1467_v27 = vpop.permute.xlu0 %1466  ;;  %v2123_v43 = vsel %vm2091_vm7, %v2090_v39, %v1763_v53 }
 0x28b   : > { %v2583_v21 = vpop.f32.mrb[32].mxu0  ;;  %v2023_v8 = vsel %vm1992_vm6, %v1990_v51, %v1467_v27 }
 0x28c   : > { %v2584_v54 = vadd.f32 %v8760_v52, %v2583_v21  ;;  %v2585_v42 = vpop.f32.mrb[33].mxu0  ;;  %v2056_v29 = vsel %vm2025_vm8, %v2023_v8, %v1565_v15 }
 0x28d   : > { %v1469_v20 = vpop.permute.xlu1 %1468  ;;  %v2586_v35 = vpop.f32.mrb[34].mxu0  ;;  %v2281_v44 = vmul.f32 %v2217_v45, %v2056_v29 }
 0x28e   : > { %v2024_v24 = vsel %vm1992_vm6, %v1991_v50, %v1469_v20  ;;  %v2587_v40 = vadd.f32 %v8760_v52, %v2586_v35  ;;  %v2588_v17 = vpop.f32.mrb[35].mxu0  ;;  %v1859_v12 = vpop.permute.xlu0 %1858  ;;  %v2662_v38 = vmax.f32 %v2584_v54, 0.0  ;;  %v7064_v20 = vld [vmem:[%s10027_s17 + $0x4] ss:$8 sps:$4 sm:$0xff]  }
 0x28f   : > { %v2057_v30 = vsel %vm2025_vm8, %v2024_v24, %v1567_v11  ;;  %v2155_v36 = vsel %vm2124_vm1, %v2122_v4, %v1859_v12 }
 0x290   : > { %v2663_v41 = vmax.f32 %v2587_v40, 0.0  ;;  %v2283_v18 = vmul.f32 %v2219_v22, %v2057_v30  ;;  %v2282_v0 = vmul.f32 %v2218_v37, %v2155_v36 }
 0x291   : > { %v1861_v61 = vpop.permute.xlu1 %1860 }
 0x292   : > { %v2718_v62 = vpack.c.bf16 %v2663_v41, %v2662_v38  ;;  %v2156_v33 = vsel %vm2124_vm1, %v2123_v43, %v1861_v61  ;;  %v2315_v46 = vpack.c.bf16 %v2283_v18, %v2281_v44 }
 0x293   : > { %v2284_v3 = vmul.f32 %v2220_v47, %v2156_v33 }
 0x294   : > { %6539 = vmatprep.subr.bf16.mxu0 %v2718_v62  ;;  %7002 = vmatprep.subr.bf16.mxu1 %v2718_v62 }
 0x295   : > { %v2316_v6 = vpack.c.bf16 %v2284_v3, %v2282_v0  ;;  %6540 = vmatpush3.bf16.msra.mxu0 %v8332_v25  ;;  %7010 = vmatpush3.bf16.msra.mxu1 %v8332_v25 }
 0x297   : > { %6279 = vmatprep.mubr.msk.bf16.mxu0 %vm2432_vm9, %v2316_v6 }
 0x298   : > { %2638 = vmatmul.mubr.bf16.gmra.mrb[60].mxu0 %v2315_v46 }
 0x299   : > { %2918 = vmatprep.mubr.bf16.mxu0 %v7064_v20  ;;  %v7095_v20 = vld [vmem:[%s10027_s17 + $0xe4] ss:$8 sps:$4 sm:$0xff]  }
 0x2ab   : > { %v2591_v7 = vpop.f32.mrb[36].mxu0 }
 0x2ac   : > { %v2592_v10 = vadd.f32 %v8760_v52, %v2591_v7  ;;  %v2593_v60 = vpop.f32.mrb[37].mxu0 }
 0x2ad   : > { %v2594_v1 = vpop.f32.mrb[38].mxu0 }
 0x2ae   : > { %v2595_v14 = vadd.f32 %v8760_v52, %v2594_v1  ;;  %v2596_v58 = vpop.f32.mrb[39].mxu0  ;;  %v2664_v13 = vmax.f32 %v2592_v10, 0.0 }
 0x2af   : > { %v7053_v58 = vld [vmem:[%s10027_s17 + $0x10] ss:$8 sps:$4 sm:$0xff]  }
 0x2b0   : > { %v2665_v15 = vmax.f32 %v2595_v14, 0.0 }
 0x2b2   : > { %v2719_v11 = vpack.c.bf16 %v2665_v15, %v2664_v13  ;;  %v7058_v13 = vld [vmem:[%s10027_s17 + $0x20] ss:$8 sps:$4 sm:$0xff]   ;;  %v7059_v15 = vld [vmem:[%s10027_s17 + $0x34] ss:$8 sps:$4 sm:$0xff]  }
 0x2b4   : > { %6541 = vmatprep.subr.bf16.mxu0 %v2719_v11  ;;  %7003 = vmatprep.subr.bf16.mxu1 %v2719_v11  ;;  %v7065_v11 = vld [vmem:[%s10027_s17 + $0x44] ss:$8 sps:$4 sm:$0xff]  }
 0x2b5   : > { %6542 = vmatpush3.bf16.msra.mxu0 %v8411_v49  ;;  %7011 = vmatpush3.bf16.msra.mxu1 %v8411_v49 }
 0x2cb   : > { %v2599_v25 = vpop.f32.mrb[40].mxu0 }
 0x2cc   : > { %v2600_v16 = vadd.f32 %v8760_v52, %v2599_v25  ;;  %v2601_v56 = vpop.f32.mrb[41].mxu0  ;;  %v7067_v25 = vld [vmem:[%s10027_s17 + $0x40] ss:$8 sps:$4 sm:$0xff]  }
 0x2cd   : > { %v2602_v19 = vpop.f32.mrb[42].mxu0  ;;  %v7070_v56 = vld [vmem:[%s10027_s17 + $0x50] ss:$8 sps:$4 sm:$0xff]  }
 0x2ce   : > { %v2603_v5 = vadd.f32 %v8760_v52, %v2602_v19  ;;  %v2604_v26 = vpop.f32.mrb[43].mxu0  ;;  %v2666_v57 = vmax.f32 %v2600_v16, 0.0  ;;  %v7068_v16 = vld [vmem:[%s10027_s17 + $0x54] ss:$8 sps:$4 sm:$0xff]   ;;  %v7071_v19 = vld [vmem:[%s10027_s17 + $0x64] ss:$8 sps:$4 sm:$0xff]  }
 0x2cf   : > { %v7074_v26 = vld [vmem:[%s10027_s17 + $0x74] ss:$8 sps:$4 sm:$0xff]  }
 0x2d0   : > { %v2667_v53 = vmax.f32 %v2603_v5, 0.0  ;;  %v7073_v5 = vld [vmem:[%s10027_s17 + $0x60] ss:$8 sps:$4 sm:$0xff]  }
 0x2d2   : > { %v2720_v27 = vpack.c.bf16 %v2667_v53, %v2666_v57  ;;  %v7076_v57 = vld [vmem:[%s10027_s17 + $0x70] ss:$8 sps:$4 sm:$0xff]   ;;  %v7077_v53 = vld [vmem:[%s10027_s17 + $0x84] ss:$8 sps:$4 sm:$0xff]  }
 0x2d4   : > { %6543 = vmatprep.subr.bf16.mxu0 %v2720_v27  ;;  %7004 = vmatprep.subr.bf16.mxu1 %v2720_v27  ;;  %v7079_v27 = vld [vmem:[%s10027_s17 + $0x80] ss:$8 sps:$4 sm:$0xff]  }
 0x2d5   : > { %6544 = vmatpush3.bf16.msra.mxu0 %v8490_v34  ;;  %7012 = vmatpush3.bf16.msra.mxu1 %v8490_v34  ;;  %v7055_v34 = vld [vmem:[%s10027_s17 + $0x14] ss:$8 sps:$4 sm:$0xff]  }
 0x2d6   : > { %2926 = vmatprep.mubr.bf16.mxu1 %v7055_v34  ;;  %v7094_v34 = vld [vmem:[%s10027_s17 + $0xd0] ss:$8 sps:$4 sm:$0xff]  }
 0x2eb   : > { %v2607_v28 = vpop.f32.mrb[44].mxu0 }
 0x2ec   : > { %v2608_v49 = vadd.f32 %v8760_v52, %v2607_v28  ;;  %v2609_v21 = vpop.f32.mrb[45].mxu0  ;;  %v7080_v28 = vld [vmem:[%s10027_s17 + $0x94] ss:$8 sps:$4 sm:$0xff]  }
 0x2ed   : > { %v2610_v31 = vpop.f32.mrb[46].mxu0  ;;  %v7083_v21 = vld [vmem:[%s10027_s17 + $0xa4] ss:$8 sps:$4 sm:$0xff]  }
 0x2ee   : > { %v2611_v32 = vadd.f32 %v8760_v52, %v2610_v31  ;;  %v2612_v54 = vpop.f32.mrb[47].mxu0  ;;  %v2668_v42 = vmax.f32 %v2608_v49, 0.0  ;;  %v7082_v49 = vld [vmem:[%s10027_s17 + $0x90] ss:$8 sps:$4 sm:$0xff]   ;;  %v7085_v31 = vld [vmem:[%s10027_s17 + $0xa0] ss:$8 sps:$4 sm:$0xff]  }
 0x2ef   : > { %v7088_v54 = vld [vmem:[%s10027_s17 + $0xb0] ss:$8 sps:$4 sm:$0xff]  }
 0x2f0   : > { %v2669_v51 = vmax.f32 %v2611_v32, 0.0  ;;  %v7086_v32 = vld [vmem:[%s10027_s17 + $0xb4] ss:$8 sps:$4 sm:$0xff]  }
 0x2f2   : > { %v2721_v50 = vpack.c.bf16 %v2669_v51, %v2668_v42  ;;  %v7089_v42 = vld [vmem:[%s10027_s17 + $0xc4] ss:$8 sps:$4 sm:$0xff]   ;;  %v7091_v51 = vld [vmem:[%s10027_s17 + $0xc0] ss:$8 sps:$4 sm:$0xff]  }
 0x2f4   : > { %6545 = vmatprep.subr.bf16.mxu0 %v2721_v50  ;;  %7005 = vmatprep.subr.bf16.mxu1 %v2721_v50  ;;  %v7092_v50 = vld [vmem:[%s10027_s17 + $0xd4] ss:$8 sps:$4 sm:$0xff]  }
 0x2f5   : > { %6546 = vmatpush3.bf16.msra.mxu0 %v8569_v9  ;;  %7013 = vmatpush3.bf16.msra.mxu1 %v8569_v9 }
 0x30b   : > { %v2615_v35 = vpop.f32.mrb[48].mxu0 }
 0x30c   : > { %v2616_v59 = vadd.f32 %v8760_v52, %v2615_v35  ;;  %v2617_v8 = vpop.f32.mrb[49].mxu0  ;;  %v7097_v35 = vld [vmem:[%s10027_s17 + $0xe0] ss:$8 sps:$4 sm:$0xff]  }
 0x30d   : > { %v2618_v24 = vpop.f32.mrb[50].mxu0  ;;  %v7100_v8 = vld [vmem:[%s10027_s17 + $0xf0] ss:$8 sps:$4 sm:$0xff]  }
 0x30e   : > { %v2619_v40 = vadd.f32 %v8760_v52, %v2618_v24  ;;  %v2620_v17 = vpop.f32.mrb[51].mxu0  ;;  %v2670_v12 = vmax.f32 %v2616_v59, 0.0  ;;  %v7098_v59 = vld [vmem:[%s10027_s17 + $0xf4] ss:$8 sps:$4 sm:$0xff]  }
 0x30f   : > { %v7336_v24 = vld [vmem:[#allocation5] sm:$0xff] }
 0x310   : > { %v2671_v9 = vmax.f32 %v2619_v40, 0.0  ;;  %3072 = vst.msk [vmem:[#allocation3] sm:$0xff] %vm3071_vm10, %v7336_v24  ;;  %3073 = vst.msk [vmem:[#allocation3 + $0x8] sm:$0xff] %vm3071_vm10, %v7336_v24 }
 0x311   : > { %3074 = vst.msk [vmem:[#allocation3 + $0x50] sm:$0xff] %vm3071_vm10, %v7336_v24  ;;  %3075 = vst.msk [vmem:[#allocation3 + $0x58] sm:$0xff] %vm3071_vm10, %v7336_v24  ;;  %v7105_v24 = vld [vmem:[%s10092_s5 + $0x48] sm:$0xff]  }
 0x312   : > { %v2722_v4 = vpack.c.bf16 %v2671_v9, %v2670_v12  ;;  %v7101_v12 = vld [vmem:[%s10092_s5 + $0x80] sm:$0xff]   ;;  %v7102_v9 = vld [vmem:[%s10092_s5 + $0x88] sm:$0xff]  }
 0x314   : > { %6547 = vmatprep.subr.bf16.mxu0 %v2722_v4  ;;  %7006 = vmatprep.subr.bf16.mxu1 %v2722_v4 }
 0x315   : > { %6548 = vmatpush3.bf16.msra.mxu0 %v8632_v63  ;;  %7014 = vmatpush3.bf16.msra.mxu1 %v8632_v63 }
 0x317   : > { %v3092_v17 = vld [vmem:[#allocation3 + $0x8] sm:$0xff] }
 0x318   : > { %v3112_v40 = vld [vmem:[#allocation3 + $0x50] sm:$0xff]  ;;  %3122 = vrot.lane.b32.xlu0 %v3092_v17, %s10062_s28 }
 0x319   : > { %3276 = vrot.lane.b32.xlu1 %v3112_v40, %s10084_s8  ;;  %v7106_v40 = vld [vmem:[%s10092_s5 + $0x8] sm:$0xff]  }
 0x32b   : > { %v2623_v22 = vpop.f32.mrb[52].mxu0 }
 0x32c   : > { %v2624_v30 = vadd.f32 %v8760_v52, %v2623_v22  ;;  %v2625_v39 = vpop.f32.mrb[53].mxu0 }
 0x32d   : > { %v2626_v38 = vpop.f32.mrb[54].mxu0 }
 0x32e   : > { %v2627_v41 = vadd.f32 %v8760_v52, %v2626_v38  ;;  %v2628_v37 = vpop.f32.mrb[55].mxu0  ;;  %v2672_v36 = vmax.f32 %v2624_v30, 0.0 }
 0x330   : > { %v2673_v47 = vmax.f32 %v2627_v41, 0.0 }
 0x332   : > { %v2723_v43 = vpack.c.bf16 %v2673_v47, %v2672_v36 }
 0x334   : > { %6549 = vmatprep.subr.bf16.mxu0 %v2723_v43  ;;  %7007 = vmatprep.subr.bf16.mxu1 %v2723_v43 }
 0x335   : > { %6550 = vmatpush3.bf16.msra.mxu0 %v8677_v23  ;;  %7015 = vmatpush3.bf16.msra.mxu1 %v8677_v23 }
 0x34b   : > { %v2631_v45 = vpop.f32.mrb[56].mxu0 }
 0x34c   : > { %v2632_v63 = vadd.f32 %v8760_v52, %v2631_v45  ;;  %v2633_v29 = vpop.f32.mrb[57].mxu0 }
 0x34d   : > { %v2634_v61 = vpop.f32.mrb[58].mxu0 }
 0x34e   : > { %v2635_v18 = vadd.f32 %v8760_v52, %v2634_v61  ;;  %v2636_v62 = vpop.f32.mrb[59].mxu0  ;;  %v2674_v33 = vmax.f32 %v2632_v63, 0.0 }
 0x350   : > { %v2675_v0 = vmax.f32 %v2635_v18, 0.0 }
 0x352   : > { %v2724_v3 = vpack.c.bf16 %v2675_v0, %v2674_v33 }
 0x354   : > { %6551 = vmatprep.subr.bf16.mxu0 %v2724_v3  ;;  %7008 = vmatprep.subr.bf16.mxu1 %v2724_v3 }
 0x355   : > { %6552 = vmatpush3.bf16.msra.mxu0 %v8712_v55  ;;  %7016 = vmatpush3.bf16.msra.mxu1 %v8712_v55  ;;  %v7062_v55 = vld [vmem:[%s10027_s17] ss:$8 sps:$4 sm:$0xff]  }
 0x36b   : > { %v2639_v44 = vpop.f32.mrb[60].mxu0 }
 0x36c   : > { %v2640_v23 = vadd.f32 %v8760_v52, %v2639_v44  ;;  %v2641_v6 = vpop.f32.mrb[61].mxu0 }
 0x36d   : > { %v2642_v46 = vpop.f32.mrb[62].mxu0 }
 0x36e   : > { %v2643_v7 = vadd.f32 %v8760_v52, %v2642_v46  ;;  %v2644_v10 = vpop.f32.mrb[63].mxu0  ;;  %v2676_v60 = vmax.f32 %v2640_v23, 0.0  ;;  %v7056_v52 = vld [vmem:[%s10027_s17 + $0x24] ss:$8 sps:$4 sm:$0xff]  }
 0x370   : > { %v2677_v1 = vmax.f32 %v2643_v7, 0.0 }
 0x372   : > { %v2725_v14 = vpack.c.bf16 %v2677_v1, %v2676_v60 }
 0x374   : > { %6553 = vmatprep.subr.bf16.mxu0 %v2725_v14  ;;  %7009 = vmatprep.subr.bf16.mxu1 %v2725_v14 }
 0x375   : > { %6554 = vmatpush3.bf16.msra.mxu0 %v8747_v48  ;;  %7017 = vmatpush3.bf16.msra.mxu1 %v8747_v48  ;;  %v7061_v48 = vld [vmem:[%s10027_s17 + $0x30] ss:$8 sps:$4 sm:$0xff]  }
 0x376   : > { %6924 = vmatprep.subr.bf16.mxu0 %v7101_v12 }
 0x378   : > { %2927 = vmatmul.mubr.bf16.vlgmr.msra.gmra.mrb[0].mxu1 %v7053_v58  ;;  %2919 = vmatmul.mubr.bf16.vlgmr.msra.gmra.mrb[64].mxu0 %v7062_v55 }
 0x379   : > { %2934 = vmatprep.mubr.bf16.mxu1 %v7056_v52  ;;  %6925 = vmatpush3.bf16.msra.mxu0 %v7101_v12 }
 0x37a   : > { %6926 = vmatprep.subr.bf16.mxu0 %v7102_v9 }
 0x37d   : > { %6927 = vmatpush3.bf16.msra.mxu0 %v7102_v9 }
 0x380   : > { %2935 = vmatmul.mubr.bf16.gmra.mrb[4].mxu1 %v7058_v13 }
 0x381   : > { %2942 = vmatprep.mubr.bf16.mxu1 %v7059_v15 }
 0x388   : > { %2943 = vmatmul.mubr.bf16.gmra.mrb[8].mxu1 %v7061_v48 }
 0x389   : > { %2950 = vmatprep.mubr.bf16.mxu1 %v7065_v11 }
 0x390   : > { %2951 = vmatmul.mubr.bf16.gmra.mrb[12].mxu1 %v7067_v25 }
 0x391   : > { %2958 = vmatprep.mubr.bf16.mxu1 %v7068_v16 }
 0x398   : > { %2959 = vmatmul.mubr.bf16.gmra.mrb[16].mxu1 %v7070_v56 }
 0x399   : > { %2966 = vmatprep.mubr.bf16.mxu1 %v7071_v19 }
 0x3a0   : > { %2967 = vmatmul.mubr.bf16.gmra.mrb[20].mxu1 %v7073_v5 }
 0x3a1   : > { %2974 = vmatprep.mubr.bf16.mxu1 %v7074_v26  ;;  %v7103_v26 = vld [vmem:[%s10092_s5 + $0x40] sm:$0xff]  }
 0x3a2   : > { %6651 = vmatprep.subr.bf16.mxu1 %v7103_v26 }
 0x3a8   : > { %2975 = vmatmul.mubr.bf16.gmra.mrb[24].mxu1 %v7076_v57 }
 0x3a9   : > { %2982 = vmatprep.mubr.bf16.mxu1 %v7077_v53 }
 0x3b0   : > { %2983 = vmatmul.mubr.bf16.gmra.mrb[28].mxu1 %v7079_v27 }
 0x3b1   : > { %2990 = vmatprep.mubr.bf16.mxu1 %v7080_v28 }
 0x3b8   : > { %2991 = vmatmul.mubr.bf16.gmra.mrb[32].mxu1 %v7082_v49  ;;  %v7104_v49 = vld [vmem:[%s10092_s5] sm:$0xff]  }
 0x3b9   : > { %2998 = vmatprep.mubr.bf16.mxu1 %v7083_v21  ;;  %6652 = vmatpush3.bf16.msra.mxu1 %v7104_v49  ;;  %v7111_v49 = vld [vmem:[%s10092_s5 + $0x60] sm:$0xff]  }
 0x3ba   : > { %6653 = vmatprep.subr.bf16.mxu1 %v7105_v24 }
 0x3bd   : > { %6654 = vmatpush3.bf16.msra.mxu1 %v7106_v40 }
 0x3c0   : > { %2999 = vmatmul.mubr.bf16.gmra.mrb[36].mxu1 %v7085_v31 }
 0x3c1   : > { %3006 = vmatprep.mubr.bf16.mxu1 %v7086_v32 }
 0x3c8   : > { %3007 = vmatmul.mubr.bf16.gmra.mrb[40].mxu1 %v7088_v54 }
 0x3c9   : > { %3014 = vmatprep.mubr.bf16.mxu1 %v7089_v42 }
 0x3d0   : > { %3015 = vmatmul.mubr.bf16.gmra.mrb[44].mxu1 %v7091_v51 }
 0x3d1   : > { %3022 = vmatprep.mubr.bf16.mxu1 %v7092_v50 }
 0x3d8   : > { %3023 = vmatmul.mubr.bf16.gmra.mrb[48].mxu1 %v7094_v34 }
 0x3d9   : > { %3030 = vmatprep.mubr.bf16.mxu1 %v7095_v20 }
 0x3e0   : > { %3031 = vmatmul.mubr.bf16.gmra.mrb[52].mxu1 %v7097_v35 }
 0x3e1   : > { %3038 = vmatprep.mubr.bf16.mxu1 %v7098_v59 }
 0x3e8   : > { %3039 = vmatmul.mubr.bf16.gmra.mrb[56].mxu1 %v7100_v8 }
 0x44b   : > { %v6561_v4 = vpop.f32.mrb[0].mxu1  ;;  %v6555_v22 = vpop.f32.mrb[64].mxu0 }
 0x44c   : > { %v6562_v30 = vpop.f32.mrb[1].mxu1  ;;  %v6556_v39 = vpop.f32.mrb[65].mxu0 }
 0x44d   : > { %v8927_v38 = vadd.f32 %v6562_v30, %v6561_v4  ;;  %v6564_v41 = vpop.f32.mrb[2].mxu1  ;;  %v8929_v37 = vadd.f32 %v6556_v39, %v6555_v22  ;;  %v6558_v36 = vpop.f32.mrb[66].mxu0 }
 0x44e   : > { %v6565_v47 = vpop.f32.mrb[3].mxu1  ;;  %v6559_v43 = vpop.f32.mrb[67].mxu0 }
 0x44f   : > { %v8931_v45 = vadd.f32 %v6565_v47, %v6564_v41  ;;  %v6560_v63 = vadd.f32 %v6559_v43, %v6558_v36  ;;  %v7107_v41 = vld [vmem:[%s10092_s5 + $0x50] sm:$0xff]   ;;  %v7109_v36 = vld [vmem:[%s10092_s5 + $0x58] sm:$0xff]  }
 0x450   : > { %6655 = vmatprep.subr.bf16.mxu1 %v7107_v41 }
 0x453   : > { %v6567_v29 = vpop.f32.mrb[4].mxu1 }
 0x454   : > { %v6568_v61 = vpop.f32.mrb[5].mxu1 }
 0x455   : > { %v8933_v18 = vadd.f32 %v6568_v61, %v6567_v29  ;;  %v6570_v62 = vpop.f32.mrb[6].mxu1 }
 0x456   : > { %v6571_v33 = vpop.f32.mrb[7].mxu1 }
 0x457   : > { %v8935_v0 = vadd.f32 %v6571_v33, %v6570_v62 }
 0x45b   : > { %v6573_v3 = vpop.f32.mrb[8].mxu1 }
 0x45c   : > { %v6574_v44 = vpop.f32.mrb[9].mxu1 }
 0x45d   : > { %v8937_v23 = vadd.f32 %v6574_v44, %v6573_v3  ;;  %v6576_v6 = vpop.f32.mrb[10].mxu1 }
 0x45e   : > { %v6577_v46 = vpop.f32.mrb[11].mxu1 }
 0x45f   : > { %v8939_v7 = vadd.f32 %v6577_v46, %v6576_v6 }
 0x463   : > { %v6579_v10 = vpop.f32.mrb[12].mxu1 }
 0x464   : > { %v6580_v60 = vpop.f32.mrb[13].mxu1 }
 0x465   : > { %v6581_v1 = vadd.f32 %v6580_v60, %v6579_v10  ;;  %v6582_v14 = vpop.f32.mrb[14].mxu1 }
 0x466   : > { %v6583_v58 = vpop.f32.mrb[15].mxu1 }
 0x467   : > { %v3047_v55 = vmax.f32 %v8929_v37, %v6581_v1  ;;  %v6584_v52 = vadd.f32 %v6583_v58, %v6582_v14  ;;  %v7108_v37 = vld [vmem:[%s10092_s5 + $0x10] sm:$0xff]  }
 0x468   : > { %6656 = vmatpush3.bf16.msra.mxu1 %v7108_v37  ;;  %v3339_v37 = vld [vmem:[%s10023_s13 + $0x28] sm:$0xff] }
 0x469   : > { %v3048_v13 = vmax.f32 %v6560_v63, %v6584_v52  ;;  %6657 = vmatprep.subr.bf16.mxu1 %v7109_v36 }
 0x46b   : > { %v6585_v15 = vpop.f32.mrb[16].mxu1 }
 0x46c   : > { %v6586_v48 = vpop.f32.mrb[17].mxu1 }
 0x46d   : > { %v6587_v11 = vadd.f32 %v6586_v48, %v6585_v15  ;;  %v6588_v25 = vpop.f32.mrb[18].mxu1 }
 0x46e   : > { %v6589_v16 = vpop.f32.mrb[19].mxu1 }
 0x46f   : > { %v3049_v56 = vmax.f32 %v8927_v38, %v6587_v11  ;;  %v6590_v19 = vadd.f32 %v6589_v16, %v6588_v25 }
 0x471   : > { %v3050_v5 = vmax.f32 %v8931_v45, %v6590_v19  ;;  %v7110_v45 = vld [vmem:[%s10092_s5 + $0x18] sm:$0xff]  }
 0x472   : > { %6658 = vmatpush3.bf16.msra.mxu1 %v7110_v45 }
 0x473   : > { %v6591_v57 = vpop.f32.mrb[20].mxu1  ;;  %6659 = vmatprep.subr.bf16.mxu1 %v7111_v49 }
 0x474   : > { %v6592_v53 = vpop.f32.mrb[21].mxu1 }
 0x475   : > { %v6593_v27 = vadd.f32 %v6592_v53, %v6591_v57  ;;  %v6594_v28 = vpop.f32.mrb[22].mxu1 }
 0x476   : > { %v6595_v21 = vpop.f32.mrb[23].mxu1 }
 0x477   : > { %v3051_v31 = vmax.f32 %v8933_v18, %v6593_v27  ;;  %v6596_v32 = vadd.f32 %v6595_v21, %v6594_v28 }
 0x479   : > { %v3052_v54 = vmax.f32 %v8935_v0, %v6596_v32 }
 0x47b   : > { %v6597_v42 = vpop.f32.mrb[24].mxu1 }
 0x47c   : > { %v6598_v51 = vpop.f32.mrb[25].mxu1 }
 0x47d   : > { %v6599_v50 = vadd.f32 %v6598_v51, %v6597_v42  ;;  %v6600_v34 = vpop.f32.mrb[26].mxu1 }
 0x47e   : > { %v6601_v20 = vpop.f32.mrb[27].mxu1 }
 0x47f   : > { %v3053_v35 = vmax.f32 %v8937_v23, %v6599_v50  ;;  %v6602_v59 = vadd.f32 %v6601_v20, %v6600_v34  ;;  %v7113_v34 = vld [vmem:[%s10092_s5 + $0x68] sm:$0xff]  }
 0x480   : > { %v7114_v20 = vld [vmem:[%s10092_s5 + $0x28] sm:$0xff]  }
 0x481   : > { %v3054_v8 = vmax.f32 %v8939_v7, %v6602_v59 }
 0x483   : > { %v6603_v17 = vpop.f32.mrb[28].mxu1 }
 0x484   : > { %v6604_v12 = vpop.f32.mrb[29].mxu1 }
 0x485   : > { %v6605_v9 = vadd.f32 %v6604_v12, %v6603_v17  ;;  %v6606_v4 = vpop.f32.mrb[30].mxu1  ;;  %v7115_v12 = vld [vmem:[%s10092_s5 + $0x70] sm:$0xff]  }
 0x486   : > { %v6607_v22 = vpop.f32.mrb[31].mxu1 }
 0x487   : > { %v3055_v30 = vmax.f32 %v3047_v55, %v6605_v9  ;;  %v6608_v39 = vadd.f32 %v6607_v22, %v6606_v4  ;;  %v7116_v9 = vld [vmem:[%s10092_s5 + $0x30] sm:$0xff]  }
 0x489   : > { %v3056_v38 = vmax.f32 %v3048_v13, %v6608_v39  ;;  %v3336_v39 = vld [vmem:[%s10023_s13 + $0x10] sm:$0xff] }
 0x48b   : > { %v6609_v47 = vpop.f32.mrb[32].mxu1 }
 0x48c   : > { %v6610_v43 = vpop.f32.mrb[33].mxu1 }
 0x48d   : > { %v6611_v63 = vadd.f32 %v6610_v43, %v6609_v47  ;;  %v6612_v29 = vpop.f32.mrb[34].mxu1  ;;  %v7117_v47 = vld [vmem:[%s10092_s5 + $0x78] sm:$0xff]  }
 0x48e   : > { %v6613_v61 = vpop.f32.mrb[35].mxu1  ;;  %v7118_v43 = vld [vmem:[%s10092_s5 + $0x38] sm:$0xff]  }
 0x48f   : > { %v3057_v18 = vmax.f32 %v3049_v56, %v6611_v63  ;;  %v6614_v62 = vadd.f32 %v6613_v61, %v6612_v29 }
 0x491   : > { %v3058_v33 = vmax.f32 %v3050_v5, %v6614_v62 }
 0x493   : > { %v6615_v0 = vpop.f32.mrb[36].mxu1 }
 0x494   : > { %v6616_v3 = vpop.f32.mrb[37].mxu1 }
 0x495   : > { %v6617_v44 = vadd.f32 %v6616_v3, %v6615_v0  ;;  %v6618_v23 = vpop.f32.mrb[38].mxu1 }
 0x496   : > { %v6619_v6 = vpop.f32.mrb[39].mxu1 }
 0x497   : > { %v8972_v46 = vmax.f32 %v3051_v31, %v6617_v44  ;;  %v6620_v7 = vadd.f32 %v6619_v6, %v6618_v23  ;;  %v7112_v31 = vld [vmem:[%s10092_s5 + $0x20] sm:$0xff]  }
 0x498   : > { %6660 = vmatpush3.bf16.msra.mxu1 %v7112_v31  ;;  %v3342_v6 = vld [vmem:[%s10023_s13 + $0x40] sm:$0xff] }
 0x499   : > { %v8974_v10 = vmax.f32 %v3052_v54, %v6620_v7  ;;  %6661 = vmatprep.subr.bf16.mxu1 %v7113_v34 }
 0x49b   : > { %v6621_v60 = vpop.f32.mrb[40].mxu1 }
 0x49c   : > { %v6622_v1 = vpop.f32.mrb[41].mxu1  ;;  %6662 = vmatpush3.bf16.msra.mxu1 %v7114_v20 }
 0x49d   : > { %v6623_v14 = vadd.f32 %v6622_v1, %v6621_v60  ;;  %v6624_v58 = vpop.f32.mrb[42].mxu1  ;;  %6663 = vmatprep.subr.bf16.mxu1 %v7115_v12 }
 0x49e   : > { %v6625_v55 = vpop.f32.mrb[43].mxu1 }
 0x49f   : > { %v8976_v52 = vmax.f32 %v3053_v35, %v6623_v14  ;;  %v6626_v13 = vadd.f32 %v6625_v55, %v6624_v58 }
 0x4a0   : > { %6664 = vmatpush3.bf16.msra.mxu1 %v7116_v9 }
 0x4a1   : > { %v8978_v15 = vmax.f32 %v3054_v8, %v6626_v13  ;;  %6665 = vmatprep.subr.bf16.mxu1 %v7117_v47 }
 0x4a3   : > { %v6627_v48 = vpop.f32.mrb[44].mxu1 }
 0x4a4   : > { %v6628_v11 = vpop.f32.mrb[45].mxu1  ;;  %6666 = vmatpush3.bf16.msra.mxu1 %v7118_v43 }
 0x4a5   : > { %v6629_v25 = vadd.f32 %v6628_v11, %v6627_v48  ;;  %v6630_v16 = vpop.f32.mrb[46].mxu1  ;;  %v3357_v48 = vld [vmem:[%s10023_s13 + $0xb8] sm:$0xff]  ;;  %v3348_v11 = vld [vmem:[%s10023_s13 + $0x70] sm:$0xff] }
 0x4a6   : > { %v6631_v56 = vpop.f32.mrb[47].mxu1 }
 0x4a7   : > { %v3063_v19 = vmax.f32 %v3055_v30, %v6629_v25  ;;  %v6632_v5 = vadd.f32 %v6631_v56, %v6630_v16  ;;  %v3351_v16 = vld [vmem:[%s10023_s13 + $0x88] sm:$0xff]  ;;  %v3354_v56 = vld [vmem:[%s10023_s13 + $0xa0] sm:$0xff] }
 0x4a9   : > { %3076 = vst.msk [vmem:[#allocation3 + $0x10] sm:$0xff] %vm3071_vm10, %v3063_v19  ;;  %v3064_v26 = vmax.f32 %v3056_v38, %v6632_v5 }
 0x4ab   : > { %3077 = vst.msk [vmem:[#allocation3 + $0x18] sm:$0xff] %vm3071_vm10, %v3064_v26  ;;  %v6633_v57 = vpop.f32.mrb[48].mxu1 }
 0x4ac   : > { %v6634_v53 = vpop.f32.mrb[49].mxu1 }
 0x4ad   : > { %v6635_v27 = vadd.f32 %v6634_v53, %v6633_v57  ;;  %v6636_v28 = vpop.f32.mrb[50].mxu1 }
 0x4ae   : > { %v6637_v21 = vpop.f32.mrb[51].mxu1 }
 0x4af   : > { %v3065_v32 = vmax.f32 %v3057_v18, %v6635_v27  ;;  %v6638_v54 = vadd.f32 %v6637_v21, %v6636_v28 }
 0x4b0   : > { %v3100_v42 = vld [vmem:[#allocation3 + $0x9] sm:$0xff] }
 0x4b1   : > { %v8988_v51 = vld [vmem:[#allocation3 + $0x10] sm:$0xff]  ;;  %3078 = vst.msk [vmem:[#allocation3 + $0x20] sm:$0xff] %vm3071_vm10, %v3065_v32  ;;  %v3066_v50 = vmax.f32 %v3058_v33, %v6638_v54  ;;  %3154 = vrot.lane.b32.xlu0 %v3100_v42, %s10090_s7 }
 0x4b2   : > { %3124 = vrot.lane.b32.xlu1 %v8988_v51, %s10062_s28  ;;  %v3101_v8 = vld [vmem:[#allocation3 + $0x11] sm:$0xff] }
 0x4b3   : > { %3079 = vst.msk [vmem:[#allocation3 + $0x28] sm:$0xff] %vm3071_vm10, %v3066_v50  ;;  %v6639_v35 = vpop.f32.mrb[52].mxu1  ;;  %v9001_v24 = vld [vmem:[#allocation3 + $0xf] sm:$0xff]  ;;  %v9016_v38 = vld [vmem:[#allocation3 + $0x17] sm:$0xff] }
 0x4b4   : > { %v6640_v59 = vpop.f32.mrb[53].mxu1 }
 0x4b5   : > { %v6641_v40 = vadd.f32 %v6640_v59, %v6639_v35  ;;  %v6642_v17 = vpop.f32.mrb[54].mxu1  ;;  %3186 = vrot.lane.b32.xlu0 %v9001_v24, %s10084_s8 }
 0x4b6   : > { %3156 = vrot.lane.b32.xlu1 %v3101_v8, %s10090_s7  ;;  %v6643_v4 = vpop.f32.mrb[55].mxu1 }
 0x4b7   : > { %v3067_v22 = vmax.f32 %v8972_v46, %v6641_v40  ;;  %v6644_v30 = vadd.f32 %v6643_v4, %v6642_v17  ;;  %v3345_v46 = vld [vmem:[%s10023_s13 + $0x58] sm:$0xff]  ;;  %v9147_v40 = vpop.permute.xlu1 %3276  ;;  %v3123_v17 = vpop.permute.xlu0 %3122 }
 0x4b8   : > { %v3102_v41 = vld [vmem:[#allocation3 + $0x19] sm:$0xff] }
 0x4b9   : > { %3080 = vst.msk [vmem:[#allocation3 + $0x30] sm:$0xff] %vm3071_vm10, %v3067_v22  ;;  %v3068_v36 = vmax.f32 %v8974_v10, %v6644_v30  ;;  %3211 = vrot.lane.b32.xlu0 %v3101_v8, %s10062_s28  ;;  %v3360_v29 = vmul.f32 %v3336_v39, %v3102_v41  ;;  %v9044_v7 = vld [vmem:[#allocation3 + $0x1f] sm:$0xff] }
 0x4ba   : > { %3188 = vrot.lane.b32.xlu1 %v9016_v38, %s10084_s8  ;;  %v3103_v45 = vld [vmem:[#allocation3 + $0x21] sm:$0xff]  ;;  %v9046_v10 = vld [vmem:[#allocation3 + $0x18] sm:$0xff] }
 0x4bb   : > { %3081 = vst.msk [vmem:[#allocation3 + $0x38] sm:$0xff] %vm3071_vm10, %v3068_v36  ;;  %v6645_v63 = vpop.f32.mrb[56].mxu1  ;;  %v3363_v61 = vmul.f32 %v3339_v37, %v3103_v45  ;;  %v9082_v21 = vld [vmem:[#allocation3 + $0x27] sm:$0xff] }
 0x4bc   : > { %v6646_v18 = vpop.f32.mrb[57].mxu1  ;;  %v9092_v32 = vld [vmem:[#allocation3 + $0x28] sm:$0xff] }
 0x4bd   : > { %v6647_v62 = vadd.f32 %v6646_v18, %v6645_v63  ;;  %v6648_v33 = vpop.f32.mrb[58].mxu1  ;;  %3236 = vrot.lane.b32.xlu0 %v9016_v38, %s10090_s7  ;;  %v3384_v0 = vpack.c.bf16 %v3363_v61, %v3360_v29  ;;  %v3084_v36 = vld [vmem:[#allocation3 + $0x7] sm:$0xff] }
 0x4be   : > { %3213 = vrot.lane.b32.xlu1 %v3102_v41, %s10062_s28  ;;  %v6649_v3 = vpop.f32.mrb[59].mxu1  ;;  %v3286_v61 = vsel %vm3071_vm10, %v3084_v36, %v3123_v17  ;;  %v3337_v18 = vld [vmem:[%s10023_s13 + $0x18] sm:$0xff]  ;;  %v3343_v17 = vld [vmem:[%s10023_s13 + $0x48] sm:$0xff] }
 0x4bf   : > { %v3069_v44 = vmax.f32 %v8976_v52, %v6647_v62  ;;  %v6650_v23 = vadd.f32 %v6649_v3, %v6648_v33  ;;  %6928 = vmatprep.mubr.msk.bf16.mxu0 %vm3071_vm10, %v3384_v0  ;;  %v9055_v52 = vld [vmem:[#allocation3 + $0x20] sm:$0xff]  ;;  %v3335_v3 = vld [vmem:[%s10023_s13 + $0x8] sm:$0xff] }
 0x4c0   : > { %v3104_v60 = vld [vmem:[#allocation3 + $0x29] sm:$0xff] }
 0x4c1   : > { %3082 = vst.msk [vmem:[#allocation3 + $0x40] sm:$0xff] %vm3071_vm10, %v3069_v44  ;;  %v3070_v1 = vmax.f32 %v8978_v15, %v6650_v23  ;;  %3262 = vrot.lane.b32.xlu0 %v9046_v10, %s10084_s8  ;;  %v3366_v58 = vmul.f32 %v3342_v6, %v3104_v60  ;;  %v3113_v15 = vld [vmem:[#allocation3 + $0x51] sm:$0xff] }
 0x4c2   : > { %3238 = vrot.lane.b32.xlu1 %v9044_v7, %s10090_s7  ;;  %v3105_v14 = vld [vmem:[#allocation3 + $0x31] sm:$0xff]  ;;  %v3381_v19 = vmul.f32 %v3357_v48, %v3113_v15 }
 0x4c3   : > { %3083 = vst.msk [vmem:[#allocation3 + $0x48] sm:$0xff] %vm3071_vm10, %v3070_v1  ;;  %v3369_v55 = vmul.f32 %v3345_v46, %v3105_v14  ;;  %v9090_v31 = vld [vmem:[#allocation3 + $0x2f] sm:$0xff]  ;;  %v9110_v42 = vld [vmem:[#allocation3 + $0x37] sm:$0xff] }
 0x4c4   : > { %v9098_v54 = vld [vmem:[#allocation3 + $0x30] sm:$0xff]  ;;  %v9120_v34 = vld [vmem:[#allocation3 + $0x38] sm:$0xff] }
 0x4c5   : > { %3126 = vrot.lane.b32.xlu0 %v9046_v10, %s10062_s28  ;;  %v3387_v13 = vpack.c.bf16 %v3369_v55, %v3366_v58  ;;  %v3338_v44 = vld [vmem:[%s10023_s13 + $0x20] sm:$0xff] }
 0x4c6   : > { %3264 = vrot.lane.b32.xlu1 %v9055_v52, %s10084_s8  ;;  %v3334_v23 = vld [vmem:[%s10023_s13] sm:$0xff] }
 0x4c7   : > { %6929 = vmatmul.mubr.msk.bf16.vlgmr.msra.gmra.mrb[68].mxu0 %vm3071_vm10, %v3387_v13 }
 0x4c8   : > { %v3106_v25 = vld [vmem:[#allocation3 + $0x39] sm:$0xff] }
 0x4c9   : > { %3158 = vrot.lane.b32.xlu0 %v3102_v41, %s10090_s7  ;;  %v3372_v57 = vmul.f32 %v3348_v11, %v3106_v25  ;;  %v9118_v50 = vld [vmem:[#allocation3 + $0x3f] sm:$0xff] }
 0x4ca   : > { %3128 = vrot.lane.b32.xlu1 %v9055_v52, %s10062_s28  ;;  %v3107_v5 = vld [vmem:[#allocation3 + $0x41] sm:$0xff]  ;;  %v3110_v26 = vld [vmem:[#allocation3 + $0x49] sm:$0xff] }
 0x4cb   : > { %v3375_v53 = vmul.f32 %v3351_v16, %v3107_v5  ;;  %v3378_v27 = vmul.f32 %v3354_v56, %v3110_v26  ;;  %v9126_v20 = vld [vmem:[#allocation3 + $0x40] sm:$0xff]  ;;  %v3111_v35 = vld [vmem:[#allocation3 + $0x4f] sm:$0xff] }
 0x4cc   : > { %v3108_v59 = vld [vmem:[#allocation3 + $0x47] sm:$0xff] }
 0x4cd   : > { %3190 = vrot.lane.b32.xlu0 %v9044_v7, %s10084_s8  ;;  %v3390_v28 = vpack.c.bf16 %v3375_v53, %v3372_v57  ;;  %v3393_v49 = vpack.c.bf16 %v3381_v19, %v3378_v27  ;;  %v9139_v8 = vld [vmem:[#allocation3 + $0x48] sm:$0xff] }
 0x4ce   : > { %3160 = vrot.lane.b32.xlu1 %v3103_v45, %s10090_s7 }
 0x4cf   : > { %6932 = vmatprep.mubr.msk.bf16.mxu0 %vm3071_vm10, %v3390_v28 }
 0x4d0   : > { %6933 = vmatmul.mubr.msk.bf16.gmra.mrb[72].mxu0 %vm3071_vm10, %v3393_v49 }
 0x4d1   : > { %3215 = vrot.lane.b32.xlu0 %v3103_v45, %s10062_s28 }
 0x4d2   : > { %3192 = vrot.lane.b32.xlu1 %v9082_v21, %s10084_s8 }
 0x4d5   : > { %3240 = vrot.lane.b32.xlu0 %v9082_v21, %s10090_s7 }
 0x4d6   : > { %3217 = vrot.lane.b32.xlu1 %v3104_v60, %s10062_s28 }
 0x4d9   : > { %3266 = vrot.lane.b32.xlu0 %v9092_v32, %s10084_s8 }
 0x4da   : > { %3242 = vrot.lane.b32.xlu1 %v9090_v31, %s10090_s7 }
 0x4dd   : > { %3130 = vrot.lane.b32.xlu0 %v9092_v32, %s10062_s28 }
 0x4de   : > { %3268 = vrot.lane.b32.xlu1 %v9098_v54, %s10084_s8 }
 0x4e1   : > { %3162 = vrot.lane.b32.xlu0 %v3104_v60, %s10090_s7 }
 0x4e2   : > { %3132 = vrot.lane.b32.xlu1 %v9098_v54, %s10062_s28 }
 0x4e5   : > { %3194 = vrot.lane.b32.xlu0 %v9090_v31, %s10084_s8 }
 0x4e6   : > { %3164 = vrot.lane.b32.xlu1 %v3105_v14, %s10090_s7 }
 0x4e9   : > { %3219 = vrot.lane.b32.xlu0 %v3105_v14, %s10062_s28 }
 0x4ea   : > { %3196 = vrot.lane.b32.xlu1 %v9110_v42, %s10084_s8 }
 0x4ed   : > { %3244 = vrot.lane.b32.xlu0 %v9110_v42, %s10090_s7 }
 0x4ee   : > { %3221 = vrot.lane.b32.xlu1 %v3106_v25, %s10062_s28 }
 0x4f1   : > { %3270 = vrot.lane.b32.xlu0 %v9120_v34, %s10084_s8 }
 0x4f2   : > { %3246 = vrot.lane.b32.xlu1 %v9118_v50, %s10090_s7 }
 0x4f5   : > { %3134 = vrot.lane.b32.xlu0 %v9120_v34, %s10062_s28 }
 0x4f6   : > { %3272 = vrot.lane.b32.xlu1 %v9126_v20, %s10084_s8 }
 0x4f9   : > { %3166 = vrot.lane.b32.xlu0 %v3106_v25, %s10090_s7 }
 0x4fa   : > { %3136 = vrot.lane.b32.xlu1 %v9126_v20, %s10062_s28 }
 0x4fd   : > { %3223 = vrot.lane.b32.xlu0 %v3107_v5, %s10062_s28 }
 0x4fe   : > { %3225 = vrot.lane.b32.xlu1 %v3110_v26, %s10062_s28  ;;  %s10097_s28 = sld [smem:[#allocation14_spill]] }
 0x501   : > { %3248 = vrot.lane.b32.xlu0 %v3108_v59, %s10090_s7 }
 0x502   : > { %3250 = vrot.lane.b32.xlu1 %v3111_v35, %s10090_s7 }
 0x505   : > { %3274 = vrot.lane.b32.xlu0 %v9139_v8, %s10084_s8 }
 0x506   : > { %3168 = vrot.lane.b32.xlu1 %v3107_v5, %s10090_s7 }
 0x509   : > { %3198 = vrot.lane.b32.xlu0 %v9118_v50, %s10084_s8 }
 0x50a   : > { %3200 = vrot.lane.b32.xlu1 %v3108_v59, %s10084_s8 }
 0x523   : > { %v3155_v9 = vpop.permute.xlu0 %3154 }
 0x524   : > { %v3125_v12 = vpop.permute.xlu1 %3124  ;;  %v3294_v0 = vsel %vm2124_vm1, %v3286_v61, %v3155_v9 }
 0x525   : > { %v3287_v47 = vsel %vm3071_vm10, %v9001_v24, %v3125_v12 }
 0x527   : > { %v3187_v22 = vpop.permute.xlu0 %3186 }
 0x528   : > { %v3157_v4 = vpop.permute.xlu1 %3156  ;;  %v3302_v6 = vsel %vm1992_vm6, %v3294_v0, %v3187_v22 }
 0x529   : > { %v3295_v63 = vsel %vm2124_vm1, %v3287_v47, %v3157_v4  ;;  %v3358_v13 = vmul.f32 %v3334_v23, %v3302_v6 }
 0x52b   : > { %v3212_v39 = vpop.permute.xlu0 %3211 }
 0x52c   : > { %v3189_v30 = vpop.permute.xlu1 %3188  ;;  %v3310_v29 = vsel %vm3071_vm10, %v8988_v51, %v3212_v39 }
 0x52d   : > { %v3303_v62 = vsel %vm1992_vm6, %v3295_v63, %v3189_v30  ;;  %v3340_v30 = vld [vmem:[%s10023_s13 + $0x30] sm:$0xff] }
 0x52e   : > { %v3361_v1 = vmul.f32 %v3337_v18, %v3303_v62 }
 0x52f   : > { %v3237_v37 = vpop.permute.xlu0 %3236 }
 0x530   : > { %v3214_v41 = vpop.permute.xlu1 %3213  ;;  %v3318_v33 = vsel %vm2124_vm1, %v3310_v29, %v3237_v37  ;;  %v3382_v25 = vpack.c.bf16 %v3361_v1, %v3358_v13 }
 0x531   : > { %v3311_v24 = vsel %vm3071_vm10, %v9046_v10, %v3214_v41 }
 0x533   : > { %v3263_v45 = vpop.permute.xlu0 %3262 }
 0x534   : > { %v3239_v43 = vpop.permute.xlu1 %3238  ;;  %v3326_v51 = vsel %vm1992_vm6, %v3318_v33, %v3263_v45 }
 0x535   : > { %v3319_v46 = vsel %vm2124_vm1, %v3311_v24, %v3239_v43  ;;  %v3359_v58 = vmul.f32 %v3335_v3, %v3326_v51 }
 0x537   : > { %v3127_v10 = vpop.permute.xlu0 %3126 }
 0x538   : > { %v3265_v60 = vpop.permute.xlu1 %3264  ;;  %v3288_v59 = vsel %vm3071_vm10, %v9016_v38, %v3127_v10  ;;  %v3344_v38 = vld [vmem:[%s10023_s13 + $0x50] sm:$0xff] }
 0x539   : > { %v3327_v14 = vsel %vm1992_vm6, %v3319_v46, %v3265_v60 }
 0x53a   : > { %v3362_v55 = vmul.f32 %v3338_v44, %v3327_v14  ;;  %v3349_v14 = vld [vmem:[%s10023_s13 + $0x78] sm:$0xff] }
 0x53b   : > { %v3159_v48 = vpop.permute.xlu0 %3158 }
 0x53c   : > { %v3129_v15 = vpop.permute.xlu1 %3128  ;;  %v3383_v11 = vpack.c.bf16 %v3362_v55, %v3359_v58 }
 0x53d   : > { %v3289_v53 = vsel %vm3071_vm10, %v9044_v7, %v3129_v15  ;;  %v3296_v7 = vsel %vm2124_vm1, %v3288_v59, %v3159_v48  ;;  %v3346_v48 = vld [vmem:[%s10023_s13 + $0x60] sm:$0xff] }
 0x53e   : > { %3589 = vmatprep.mubr.bf16.mxu1 %v3383_v11 }
 0x53f   : > { %3590 = vmatmul.mubr.bf16.vlgmr.msra.gmra.mrb[60].mxu1 %v3382_v25  ;;  %v3191_v56 = vpop.permute.xlu0 %3190 }
 0x540   : > { %v3161_v16 = vpop.permute.xlu1 %3160  ;;  %v3304_v39 = vsel %vm1992_vm6, %v3296_v7, %v3191_v56 }
 0x541   : > { %v3297_v49 = vsel %vm2124_vm1, %v3289_v53, %v3161_v16  ;;  %v3364_v63 = vmul.f32 %v3340_v30, %v3304_v39 }
 0x543   : > { %v3216_v5 = vpop.permute.xlu0 %3215 }
 0x544   : > { %v3193_v19 = vpop.permute.xlu1 %3192  ;;  %v3312_v35 = vsel %vm3071_vm10, %v9055_v52, %v3216_v5  ;;  %v3341_v52 = vld [vmem:[%s10023_s13 + $0x38] sm:$0xff] }
 0x545   : > { %v3305_v12 = vsel %vm1992_vm6, %v3297_v49, %v3193_v19 }
 0x546   : > { %v3367_v36 = vmul.f32 %v3343_v17, %v3305_v12 }
 0x547   : > { %v3241_v57 = vpop.permute.xlu0 %3240 }
 0x548   : > { %v3218_v26 = vpop.permute.xlu1 %3217  ;;  %v3320_v9 = vsel %vm2124_vm1, %v3312_v35, %v3241_v57  ;;  %v3385_v62 = vpack.c.bf16 %v3367_v36, %v3364_v63 }
 0x549   : > { %v3313_v4 = vsel %vm3071_vm10, %v9092_v32, %v3218_v26 }
 0x54b   : > { %v3267_v28 = vpop.permute.xlu0 %3266 }
 0x54c   : > { %v3243_v27 = vpop.permute.xlu1 %3242  ;;  %v3328_v22 = vsel %vm1992_vm6, %v3320_v9, %v3267_v28 }
 0x54d   : > { %v3321_v41 = vsel %vm2124_vm1, %v3313_v4, %v3243_v27  ;;  %v3365_v43 = vmul.f32 %v3341_v52, %v3328_v22  ;;  %v3356_v52 = vld [vmem:[%s10023_s13 + $0xb0] sm:$0xff] }
 0x54f   : > { %v3131_v32 = vpop.permute.xlu0 %3130 }
 0x550   : > { %v3269_v37 = vpop.permute.xlu1 %3268  ;;  %v3290_v1 = vsel %vm3071_vm10, %v9082_v21, %v3131_v32  ;;  %v3350_v21 = vld [vmem:[%s10023_s13 + $0x80] sm:$0xff] }
 0x551   : > { %v3329_v47 = vsel %vm1992_vm6, %v3321_v41, %v3269_v37 }
 0x552   : > { %v3368_v45 = vmul.f32 %v3344_v38, %v3329_v47  ;;  %v3353_v38 = vld [vmem:[%s10023_s13 + $0x98] sm:$0xff]  ;;  %v3352_v47 = vld [vmem:[%s10023_s13 + $0x90] sm:$0xff] }
 0x553   : > { %v3163_v61 = vpop.permute.xlu0 %3162 }
 0x554   : > { %v3133_v29 = vpop.permute.xlu1 %3132  ;;  %v3386_v18 = vpack.c.bf16 %v3368_v45, %v3365_v43 }
 0x555   : > { %v3291_v23 = vsel %vm3071_vm10, %v9090_v31, %v3133_v29  ;;  %v3298_v31 = vsel %vm2124_vm1, %v3290_v1, %v3163_v61  ;;  %v6312_v1 = vld [vmem:[%s10093_s0] ss:$0 sm:$0xff]  ;;  %s10102_s0 = sld [smem:[#allocation21_spill]] }
 0x556   : > { %3597 = vmatprep.mubr.bf16.mxu1 %v3386_v18 }
 0x557   : > { %3598 = vmatmul.mubr.bf16.gmra.mrb[64].mxu1 %v3385_v62  ;;  %v3195_v0 = vpop.permute.xlu0 %3194 }
 0x558   : > { %v3165_v33 = vpop.permute.xlu1 %3164  ;;  %v3306_v11 = vsel %vm1992_vm6, %v3298_v31, %v3195_v0 }
 0x559   : > { %v3299_v60 = vsel %vm2124_vm1, %v3291_v23, %v3165_v33  ;;  %v3370_v57 = vmul.f32 %v3346_v48, %v3306_v11 }
 0x55b   : > { %v3220_v3 = vpop.permute.xlu0 %3219 }
 0x55c   : > { %v3197_v24 = vpop.permute.xlu1 %3196  ;;  %v3314_v10 = vsel %vm3071_vm10, %v9098_v54, %v3220_v3  ;;  %v3347_v54 = vld [vmem:[%s10023_s13 + $0x68] sm:$0xff] }
 0x55d   : > { %v3307_v58 = vsel %vm1992_vm6, %v3299_v60, %v3197_v24  ;;  %v7119_v60 = vld [vmem:[%s10028_s18] sm:$0xff]  }
 0x55e   : > { %v3373_v56 = vmul.f32 %v3349_v14, %v3307_v58 }
 0x55f   : > { %v3245_v44 = vpop.permute.xlu0 %3244 }
 0x560   : > { %v3222_v51 = vpop.permute.xlu1 %3221  ;;  %v3322_v55 = vsel %vm2124_vm1, %v3314_v10, %v3245_v44  ;;  %v3388_v49 = vpack.c.bf16 %v3373_v56, %v3370_v57 }
 0x561   : > { %v3315_v13 = vsel %vm3071_vm10, %v9120_v34, %v3222_v51 }
 0x563   : > { %v3271_v46 = vpop.permute.xlu0 %3270 }
 0x564   : > { %v3247_v6 = vpop.permute.xlu1 %3246  ;;  %v3330_v15 = vsel %vm1992_vm6, %v3322_v55, %v3271_v46 }
 0x565   : > { %v3323_v25 = vsel %vm2124_vm1, %v3315_v13, %v3247_v6  ;;  %v3371_v5 = vmul.f32 %v3347_v54, %v3330_v15 }
 0x567   : > { %v3135_v34 = vpop.permute.xlu0 %3134 }
 0x568   : > { %v3273_v16 = vpop.permute.xlu1 %3272 }
 0x569   : > { %v3331_v19 = vsel %vm1992_vm6, %v3323_v25, %v3273_v16 }
 0x56a   : > { %v3374_v26 = vmul.f32 %v3350_v21, %v3331_v19 }
 0x56b   : > { %v3167_v27 = vpop.permute.xlu0 %3166 }
 0x56c   : > { %v3137_v53 = vpop.permute.xlu1 %3136  ;;  %v3389_v28 = vpack.c.bf16 %v3374_v26, %v3371_v5 }
 0x56d   : > { %v3293_v36 = vsel %vm3071_vm10, %v9118_v50, %v3137_v53 }
 0x56e   : > { %3605 = vmatprep.mubr.bf16.mxu1 %v3389_v28 }
 0x56f   : > { %3606 = vmatmul.mubr.bf16.gmra.mrb[68].mxu1 %v3388_v49  ;;  %v3224_v59 = vpop.permute.xlu0 %3223 }
 0x570   : > { %v3226_v35 = vpop.permute.xlu1 %3225  ;;  %v3316_v4 = vsel %vm3071_vm10, %v9126_v20, %v3224_v59  ;;  %v3292_v20 = vsel %vm3071_vm10, %v9110_v42, %v3135_v34 }
 0x571   : > { %v3317_v17 = vsel %vm3071_vm10, %v9139_v8, %v3226_v35  ;;  %v3300_v43 = vsel %vm2124_vm1, %v3292_v20, %v3167_v27 }
 0x573   : > { %v3249_v9 = vpop.permute.xlu0 %3248 }
 0x574   : > { %v3251_v12 = vpop.permute.xlu1 %3250  ;;  %v3324_v8 = vsel %vm2124_vm1, %v3316_v4, %v3249_v9 }
 0x575   : > { %v3325_v7 = vsel %vm2124_vm1, %v3317_v17, %v3251_v12 }
 0x576   : > { %v3333_v22 = vsel %vm1992_vm6, %v3325_v7, %v9147_v40  ;;  %v3355_v40 = vld [vmem:[%s10023_s13 + $0xa8] sm:$0xff] }
 0x577   : > { %v3275_v39 = vpop.permute.xlu0 %3274  ;;  %v3380_v37 = vmul.f32 %v3356_v52, %v3333_v22 }
 0x578   : > { %v3169_v30 = vpop.permute.xlu1 %3168  ;;  %v3332_v41 = vsel %vm1992_vm6, %v3324_v8, %v3275_v39 }
 0x579   : > { %v3377_v32 = vmul.f32 %v3353_v38, %v3332_v41  ;;  %v3301_v45 = vsel %vm2124_vm1, %v3293_v36, %v3169_v30 }
 0x57b   : > { %v3199_v29 = vpop.permute.xlu0 %3198  ;;  %v3392_v61 = vpack.c.bf16 %v3380_v37, %v3377_v32 }
 0x57c   : > { %v3201_v63 = vpop.permute.xlu1 %3200  ;;  %v3308_v18 = vsel %vm1992_vm6, %v3300_v43, %v3199_v29 }
 0x57d   : > { %v3309_v42 = vsel %vm1992_vm6, %v3301_v45, %v3201_v63  ;;  %v3376_v62 = vmul.f32 %v3352_v47, %v3308_v18  ;;  %3613 = vmatprep.mubr.bf16.mxu1 %v3392_v61 }
 0x57e   : > { %v3379_v50 = vmul.f32 %v3355_v40, %v3309_v42 }
 0x580   : > { %v3391_v33 = vpack.c.bf16 %v3379_v50, %v3376_v62 }
 0x582   : > { %3614 = vmatmul.mubr.bf16.gmra.mrb[72].mxu1 %v3391_v33  ;;  %v7120_v33 = vld [vmem:[%s10028_s18 + $0x8] sm:$0xff]  }
 0x583   : > { %6944 = vmatprep.mubr.msk.bf16.mxu1 %vm2124_vm1, %v7119_v60  ;;  %v7126_v60 = vld [vmem:[%s10094_s1 + $0x8] sm:$0xff]  }
 0x59a   : > { %v6930_v0 = vpop.f32.mrb[68].mxu0 }
 0x59b   : > { %v3656_v24 = vpop.f32.mrb[69].mxu0 }
 0x59c   : > { %v6931_v3 = vpop.f32.mrb[70].mxu0 }
 0x59d   : > { %v3659_v51 = vpop.f32.mrb[71].mxu0 }
 0x5a3   : > { %v6934_v44 = vpop.f32.mrb[72].mxu0 }
 0x5a4   : > { %v3672_v23 = vpop.f32.mrb[73].mxu0 }
 0x5a5   : > { %v6935_v6 = vpop.f32.mrb[74].mxu0 }
 0x5a6   : > { %v3675_v46 = vpop.f32.mrb[75].mxu0 }
 0x612   : > { %v6667_v10 = vpop.f32.mrb[60].mxu1 }
 0x613   : > { %v6668_v14 = vpop.f32.mrb[61].mxu1 }
 0x614   : > { %v6669_v58 = vadd.f32 %v6668_v14, %v6667_v10  ;;  %v6670_v55 = vpop.f32.mrb[62].mxu1  ;;  %v7128_v10 = vld [vmem:[%s10094_s1 + $0x50] sm:$0xff]  }
 0x615   : > { %v6671_v31 = vpop.f32.mrb[63].mxu1  ;;  %v7135_v14 = vld [vmem:[%s10094_s1 + $0xd0] sm:$0xff]  }
 0x616   : > { %v3592_v13 = vadd.f32 %v6669_v58, %v6312_v1  ;;  %v6672_v54 = vadd.f32 %v6671_v31, %v6670_v55  ;;  %v7130_v58 = vld [vmem:[%s10094_s1 + $0x10] sm:$0xff]   ;;  %v7132_v55 = vld [vmem:[%s10094_s1 + $0x58] sm:$0xff]  }
 0x617   : > { %v7137_v31 = vld [vmem:[%s10094_s1 + $0x90] sm:$0xff]  }
 0x618   : > { %v3657_v15 = vadd.f32 %v3656_v24, %v3592_v13  ;;  %v3595_v21 = vadd.f32 %v6672_v54, %v6312_v1  ;;  %v7122_v24 = vld [vmem:[%s10028_s18 + $0x18] sm:$0xff]  }
 0x619   : > { %v7139_v13 = vld [vmem:[%s10094_s1 + $0xd8] sm:$0xff]  }
 0x61a   : > { %v3660_v48 = vadd.f32 %v3659_v51, %v3595_v21  ;;  %v3687_v11 = vmax.f32 %v3657_v15, 0.0  ;;  %v7124_v51 = vld [vmem:[%s10094_s1] sm:$0xff]   ;;  %v7134_v54 = vld [vmem:[%s10094_s1 + $0x18] sm:$0xff]  }
 0x61b   : > { %v7136_v15 = vld [vmem:[%s10094_s1 + $0x60] sm:$0xff]   ;;  %v7141_v21 = vld [vmem:[%s10094_s1 + $0x98] sm:$0xff]  }
 0x61c   : > { %v3688_v25 = vmax.f32 %v3660_v48, 0.0  ;;  %v7138_v48 = vld [vmem:[%s10094_s1 + $0x20] sm:$0xff]  }
 0x61e   : > { %v3703_v16 = vpack.c.bf16 %v3688_v25, %v3687_v11  ;;  %v7140_v11 = vld [vmem:[%s10094_s1 + $0x68] sm:$0xff]  }
 0x61f   : > { %v7142_v25 = vld [vmem:[%s10094_s1 + $0x28] sm:$0xff]  }
 0x620   : > { %6936 = vmatprep.subr.bf16.mxu1 %v3703_v16 }
 0x621   : > { %6937 = vmatpush3.bf16.msra.mxu1 %v3703_v16 }
 0x62a   : > { %v6673_v34 = vpop.f32.mrb[64].mxu1 }
 0x62b   : > { %v6674_v56 = vpop.f32.mrb[65].mxu1 }
 0x62c   : > { %v6675_v19 = vadd.f32 %v6674_v56, %v6673_v34  ;;  %v6676_v5 = vpop.f32.mrb[66].mxu1 }
 0x62d   : > { %v6677_v26 = vpop.f32.mrb[67].mxu1 }
 0x62e   : > { %v3600_v57 = vadd.f32 %v6675_v19, %v6312_v1  ;;  %v6678_v53 = vadd.f32 %v6677_v26, %v6676_v5 }
 0x630   : > { %v3665_v27 = vadd.f32 %v6930_v0, %v3600_v57  ;;  %v3603_v28 = vadd.f32 %v6678_v53, %v6312_v1  ;;  %v7121_v0 = vld [vmem:[%s10028_s18 + $0x10] sm:$0xff]  }
 0x632   : > { %v3668_v49 = vadd.f32 %v6931_v3, %v3603_v28  ;;  %v3689_v35 = vmax.f32 %v3665_v27, 0.0  ;;  %v7123_v3 = vld [vmem:[%s10094_s1 + $0x40] sm:$0xff]  }
 0x633   : > { %6705 = vmatprep.subr.bf16.mxu0 %v7123_v3  ;;  %v7143_v27 = vld [vmem:[%s10094_s1 + $0xe0] sm:$0xff]  }
 0x634   : > { %v3690_v59 = vmax.f32 %v3668_v49, 0.0  ;;  %6706 = vmatpush3.bf16.msra.mxu0 %v7124_v51 }
 0x636   : > { %v3704_v17 = vpack.c.bf16 %v3690_v59, %v3689_v35  ;;  %v7144_v59 = vld [vmem:[%s10094_s1 + $0x70] sm:$0xff]  }
 0x638   : > { %6938 = vmatprep.subr.bf16.mxu1 %v3704_v17 }
 0x639   : > { %6939 = vmatpush3.bf16.msra.mxu1 %v3704_v17  ;;  %v7145_v17 = vld [vmem:[%s10094_s1 + $0xa0] sm:$0xff]  }
 0x642   : > { %v6679_v12 = vpop.f32.mrb[68].mxu1 }
 0x643   : > { %v6680_v9 = vpop.f32.mrb[69].mxu1 }
 0x644   : > { %v6681_v7 = vadd.f32 %v6680_v9, %v6679_v12  ;;  %v6682_v4 = vpop.f32.mrb[70].mxu1 }
 0x645   : > { %v6683_v52 = vpop.f32.mrb[71].mxu1 }
 0x646   : > { %v3608_v22 = vadd.f32 %v6681_v7, %v6312_v1  ;;  %v6684_v38 = vadd.f32 %v6683_v52, %v6682_v4  ;;  %v7146_v7 = vld [vmem:[%s10094_s1 + $0x30] sm:$0xff]   ;;  %v7147_v52 = vld [vmem:[%s10094_s1 + $0xe8] sm:$0xff]  }
 0x648   : > { %v3673_v8 = vadd.f32 %v3672_v23, %v3608_v22  ;;  %v3611_v30 = vadd.f32 %v6684_v38, %v6312_v1  ;;  %v7127_v23 = vld [vmem:[%s10094_s1 + $0xc0] sm:$0xff]   ;;  %v7148_v22 = vld [vmem:[%s10094_s1 + $0x78] sm:$0xff]   ;;  %v7149_v38 = vld [vmem:[%s10094_s1 + $0xa8] sm:$0xff]  }
 0x64a   : > { %v3676_v39 = vadd.f32 %v3675_v46, %v3611_v30  ;;  %v3691_v41 = vmax.f32 %v3673_v8, 0.0  ;;  %v7131_v46 = vld [vmem:[%s10094_s1 + $0xc8] sm:$0xff]   ;;  %v7150_v8 = vld [vmem:[%s10094_s1 + $0x38] sm:$0xff]   ;;  %v7151_v30 = vld [vmem:[%s10094_s1 + $0xf0] sm:$0xff]  }
 0x64c   : > { %v3692_v37 = vmax.f32 %v3676_v39, 0.0  ;;  %v7152_v39 = vld [vmem:[%s10094_s1 + $0xb0] sm:$0xff]  }
 0x64e   : > { %v3705_v32 = vpack.c.bf16 %v3692_v37, %v3691_v41  ;;  %v9372_v41 = vld [vmem:[#allocation5] sm:$0xff] }
 0x650   : > { %6940 = vmatprep.subr.bf16.mxu1 %v3705_v32 }
 0x651   : > { %6941 = vmatpush3.bf16.msra.mxu1 %v3705_v32 }
 0x655   : > { %v6685_v20 = vpop.f32.mrb[72].mxu1 }
 0x656   : > { %v6686_v36 = vpop.f32.mrb[73].mxu1 }
 0x657   : > { %v6687_v40 = vadd.f32 %v6686_v36, %v6685_v20  ;;  %v6688_v47 = vpop.f32.mrb[74].mxu1  ;;  %v7154_v36 = vld [vmem:[%s10094_s1 + $0xf8] sm:$0xff]  }
 0x658   : > { %v6689_v43 = vpop.f32.mrb[75].mxu1 }
 0x659   : > { %v3616_v45 = vadd.f32 %v6687_v40, %v6312_v1  ;;  %v6690_v63 = vadd.f32 %v6689_v43, %v6688_v47  ;;  %v7155_v40 = vld [vmem:[%s10094_s1 + $0xb8] sm:$0xff]  }
 0x65b   : > { %v3681_v29 = vadd.f32 %v6934_v44, %v3616_v45  ;;  %v3619_v61 = vadd.f32 %v6690_v63, %v6312_v1  ;;  %v7125_v44 = vld [vmem:[%s10094_s1 + $0x48] sm:$0xff]  }
 0x65c   : > { %6707 = vmatprep.subr.bf16.mxu0 %v7125_v44  ;;  %v7133_v1 = vld [vmem:[%s10094_s1 + $0x88] sm:$0xff]  }
 0x65d   : > { %v3684_v42 = vadd.f32 %v6935_v6, %v3619_v61  ;;  %v3693_v18 = vmax.f32 %v3681_v29, 0.0  ;;  %v7129_v6 = vld [vmem:[%s10094_s1 + $0x80] sm:$0xff]   ;;  %6708 = vmatpush3.bf16.msra.mxu0 %v7126_v60 }
 0x65e   : > { %6709 = vmatprep.subr.bf16.mxu0 %v7128_v10 }
 0x65f   : > { %v3694_v50 = vmax.f32 %v3684_v42, 0.0  ;;  %v3865_v42 = vld [vmem:[%s10024_s14 + $0x8] sm:$0xff] }
 0x661   : > { %v3706_v62 = vpack.c.bf16 %v3694_v50, %v3693_v18  ;;  %6710 = vmatpush3.bf16.msra.mxu0 %v7130_v58  ;;  %v3870_v50 = vld [vmem:[%s10024_s14 + $0x30] sm:$0xff] }
 0x662   : > { %6711 = vmatprep.subr.bf16.mxu0 %v7132_v55  ;;  %v3872_v55 = vld [vmem:[%s10024_s14 + $0x40] sm:$0xff] }
 0x663   : > { %6942 = vmatprep.subr.bf16.mxu1 %v3706_v62 }
 0x664   : > { %6943 = vmatpush3.bf16.msra.mxu1 %v3706_v62 }
 0x665   : > { %6727 = vmatprep.subr.bf16.mxu1 %v7127_v23  ;;  %6712 = vmatpush3.bf16.msra.mxu0 %v7134_v54  ;;  %v3864_v23 = vld [vmem:[%s10024_s14] sm:$0xff] }
 0x666   : > { %6713 = vmatprep.subr.bf16.mxu0 %v7136_v15 }
 0x667   : > { %6945 = vmatmul.mubr.msk.bf16.vlgmr.msra.gmra.mrb[76].mxu1 %vm2124_vm1, %v7120_v33 }
 0x668   : > { %6948 = vmatprep.mubr.msk.bf16.mxu1 %vm2124_vm1, %v7121_v0  ;;  %6728 = vmatpush3.bf16.msra.mxu1 %v7129_v6 }
 0x669   : > { %6729 = vmatprep.subr.bf16.mxu1 %v7131_v46  ;;  %6714 = vmatpush3.bf16.msra.mxu0 %v7138_v48  ;;  %v3869_v46 = vld [vmem:[%s10024_s14 + $0x28] sm:$0xff]  ;;  %v7153_v48 = vld [vmem:[%s10094_s1 + $0x100] sm:$0xff]  }
 0x66a   : > { %6715 = vmatprep.subr.bf16.mxu0 %v7140_v11 }
 0x66c   : > { %6730 = vmatpush3.bf16.msra.mxu1 %v7133_v1 }
 0x66d   : > { %6731 = vmatprep.subr.bf16.mxu1 %v7135_v14  ;;  %6716 = vmatpush3.bf16.msra.mxu0 %v7142_v25  ;;  %v3867_v14 = vld [vmem:[%s10024_s14 + $0x18] sm:$0xff] }
 0x66e   : > { %6717 = vmatprep.subr.bf16.mxu0 %v7144_v59 }
 0x66f   : > { %6949 = vmatmul.mubr.msk.bf16.gmra.mrb[80].mxu1 %vm2124_vm1, %v7122_v24 }
 0x670   : > { %6732 = vmatpush3.bf16.msra.mxu1 %v7137_v31 }
 0x671   : > { %6733 = vmatprep.subr.bf16.mxu1 %v7139_v13  ;;  %6718 = vmatpush3.bf16.msra.mxu0 %v7146_v7  ;;  %v3868_v7 = vld [vmem:[%s10024_s14 + $0x20] sm:$0xff] }
 0x672   : > { %6719 = vmatprep.subr.bf16.mxu0 %v7148_v22 }
 0x674   : > { %6734 = vmatpush3.bf16.msra.mxu1 %v7141_v21 }
 0x675   : > { %6735 = vmatprep.subr.bf16.mxu1 %v7143_v27  ;;  %6720 = vmatpush3.bf16.msra.mxu0 %v7150_v8 }
 0x676   : > { %6952 = vmatprep.subr.bf16.mxu0 %v9372_v41 }
 0x678   : > { %6736 = vmatpush3.bf16.msra.mxu1 %v7145_v17 }
 0x679   : > { %6737 = vmatprep.subr.bf16.mxu1 %v7147_v52  ;;  %v7158_v52 = vld [vmem:[%s10094_s1 + $0x118] sm:$0xff]  }
 0x67c   : > { %6738 = vmatpush3.bf16.msra.mxu1 %v7149_v38 }
 0x67d   : > { %6739 = vmatprep.subr.bf16.mxu1 %v7151_v30  ;;  %v7160_v30 = vld [vmem:[%s10095_s30 + $0x40] sm:$0xff]  }
 0x680   : > { %6740 = vmatpush3.bf16.msra.mxu1 %v7152_v39  ;;  %v7162_v39 = vld [vmem:[%s10095_s30] sm:$0xff]  }
 0x681   : > { %6741 = vmatprep.subr.bf16.mxu1 %v7154_v36  ;;  %v7170_v36 = vld [vmem:[%s10095_s30 + $0x10] sm:$0xff]  }
 0x684   : > { %6742 = vmatpush3.bf16.msra.mxu1 %v7155_v40 }
 0x685   : > { %6964 = vmatprep.subr.bf16.mxu1 %v9372_v41 }
 0x73a   : > { %v6946_v16 = vpop.f32.mrb[76].mxu1 }
 0x73b   : > { %v3773_v34 = vpop.f32.mrb[77].mxu1 }
 0x73c   : > { %v3804_v56 = vmax.f32 %v3773_v34, %v6946_v16  ;;  %v6947_v19 = vpop.f32.mrb[78].mxu1 }
 0x73d   : > { %v3776_v5 = vpop.f32.mrb[79].mxu1 }
 0x73e   : > { %v3805_v26 = vmax.f32 %v3776_v5, %v6947_v19  ;;  %v3866_v19 = vld [vmem:[%s10024_s14 + $0x10] sm:$0xff] }
 0x742   : > { %v6950_v57 = vpop.f32.mrb[80].mxu1 }
 0x743   : > { %v3789_v53 = vpop.f32.mrb[81].mxu1 }
 0x744   : > { %v3806_v28 = vmax.f32 %v3804_v56, %v3789_v53  ;;  %v6951_v49 = vpop.f32.mrb[82].mxu1 }
 0x745   : > { %v3792_v35 = vpop.f32.mrb[83].mxu1 }
 0x746   : > { %v3808_v12 = vmax.f32 %v3806_v28, %v6950_v57  ;;  %v3807_v9 = vmax.f32 %v3805_v26, %v3792_v35  ;;  %v3871_v26 = vld [vmem:[%s10024_s14 + $0x38] sm:$0xff] }
 0x748   : > { %3812 = vst.msk [vmem:[#allocation4 + $0x8] sm:$0xff] %vm2124_vm1, %v3808_v12  ;;  %v3809_v4 = vmax.f32 %v3807_v9, %v6951_v49  ;;  %v7156_v49 = vld [vmem:[%s10094_s1 + $0x108] sm:$0xff]   ;;  %v7157_v12 = vld [vmem:[%s10094_s1 + $0x110] sm:$0xff]  }
 0x74a   : > { %3813 = vst.msk [vmem:[#allocation4 + $0x10] sm:$0xff] %vm2124_vm1, %v3809_v4  ;;  %v3873_v4 = vld [vmem:[%s10024_s14 + $0x48] sm:$0xff] }
 0x74f   : > { %v3820_v37 = vld [vmem:[#allocation4 + $0x7] sm:$0xff] }
 0x750   : > { %3839 = vrot.lane.b32.xlu0 %v3820_v37, %s10090_s7  ;;  %v3816_v20 = vld [vmem:[#allocation4 + $0x4] sm:$0xff]  ;;  %v7164_v37 = vld [vmem:[%s10095_s30 + $0x48] sm:$0xff]  }
 0x751   : > { %v3821_v32 = vld [vmem:[#allocation4 + $0xf] sm:$0xff]  ;;  %v3818_v61 = vld [vmem:[#allocation4 + $0x5] sm:$0xff] }
 0x752   : > { %3841 = vrot.lane.b32.xlu1 %v3821_v32, %s10090_s7  ;;  %v3817_v47 = vld [vmem:[#allocation4 + $0xc] sm:$0xff]  ;;  %v3827_v43 = vld [vmem:[#allocation4 + $0x14] sm:$0xff]  ;;  %v3814_v44 = vld [vmem:[#allocation4 + $0x3] sm:$0xff] }
 0x753   : > { %v3824_v45 = vld [vmem:[#allocation4 + $0x9] sm:$0xff]  ;;  %v3825_v63 = vld [vmem:[#allocation4 + $0x11] sm:$0xff] }
 0x754   : > { %3831 = vrot.lane.b32.xlu0 %v3816_v20, %s10090_s7  ;;  %v3819_v33 = vld [vmem:[#allocation4 + $0xd] sm:$0xff]  ;;  %v3828_v9 = vld [vmem:[#allocation4 + $0x15] sm:$0xff]  ;;  %v7168_v20 = vld [vmem:[%s10095_s30 + $0x50] sm:$0xff]  }
 0x755   : > { %v3815_v10 = vld [vmem:[#allocation4 + $0xb] sm:$0xff]  ;;  %v3826_v15 = vld [vmem:[#allocation4 + $0x13] sm:$0xff]  ;;  %v3883_v22 = vmul.f32 %v3873_v4, %v3828_v9  ;;  %v3878_v38 = vmul.f32 %v3868_v7, %v3819_v33 }
 0x756   : > { %3833 = vrot.lane.b32.xlu1 %v3817_v47, %s10090_s7  ;;  %v3822_v34 = vld [vmem:[#allocation4 + $0x8] sm:$0xff]  ;;  %v3823_v53 = vld [vmem:[#allocation4 + $0x10] sm:$0xff]  ;;  %v7166_v32 = vld [vmem:[%s10095_s30 + $0x8] sm:$0xff]  }
 0x757   : > { %v3888_v8 = vpack.c.bf16 %v3883_v22, %v3878_v38  ;;  %v7188_v9 = vld [vmem:[%s10095_s30 + $0x78] sm:$0xff]   ;;  %v7194_v22 = vld [vmem:[%s10095_s30 + $0x140] sm:$0xff]  }
 0x758   : > { %3854 = vrot.lane.b32.xlu0 %v3827_v43, %s10090_s7  ;;  %v7189_v7 = vld [vmem:[%s10095_s30 + $0xf8] sm:$0xff]   ;;  %v7195_v38 = vld [vmem:[%s10095_s30 + $0x1c0] sm:$0xff]  }
 0x759   : > { %v7190_v4 = vld [vmem:[%s10095_s30 + $0x38] sm:$0xff]  }
 0x75a   : > { %3847 = vrot.lane.b32.xlu1 %v3824_v45, %s10090_s7 }
 0x75c   : > { %3849 = vrot.lane.b32.xlu0 %v3825_v63, %s10090_s7 }
 0x7c2   : > { %v3840_v29 = vpop.permute.xlu0 %3839 }
 0x7c3   : > { %v3859_v18 = vsel %vm2124_vm1, %v3818_v61, %v3840_v29  ;;  %v6343_v61 = vld [vmem:[%s10096_s11] ss:$0 sm:$0xff] }
 0x7c4   : > { %v3842_v62 = vpop.permute.xlu1 %3841  ;;  %v3875_v24 = vmul.f32 %v3865_v42, %v3859_v18 }
 0x7c5   : > { %v3860_v0 = vsel %vm2124_vm1, %v3819_v33, %v3842_v62 }
 0x7c6   : > { %v3880_v3 = vmul.f32 %v3870_v50, %v3860_v0  ;;  %v3832_v51 = vpop.permute.xlu0 %3831 }
 0x7c7   : > { %v3857_v6 = vsel %vm2124_vm1, %v3814_v44, %v3832_v51 }
 0x7c8   : > { %v3834_v60 = vpop.permute.xlu1 %3833  ;;  %v3885_v1 = vpack.c.bf16 %v3880_v3, %v3875_v24  ;;  %v3874_v31 = vmul.f32 %v3864_v23, %v3857_v6 }
 0x7c9   : > { %v3858_v58 = vsel %vm2124_vm1, %v3815_v10, %v3834_v60 }
 0x7ca   : > { %v3879_v13 = vmul.f32 %v3869_v46, %v3858_v58  ;;  %v3855_v54 = vpop.permute.xlu0 %3854  ;;  %4219 = vmatprep.mubr.bf16.mxu0 %v3885_v1  ;;  %v3877_v11 = vmul.f32 %v3867_v14, %v3858_v58 }
 0x7cb   : > { %v3863_v21 = vsel %vm2124_vm1, %v3826_v15, %v3855_v54  ;;  %v7163_v54 = vld [vmem:[%s10095_s30 + $0x80] sm:$0xff]   ;;  %v7165_v15 = vld [vmem:[%s10095_s30 + $0xc8] sm:$0xff]  }
 0x7cc   : > { %v3884_v25 = vpack.c.bf16 %v3879_v13, %v3874_v31  ;;  %v3882_v16 = vmul.f32 %v3872_v55, %v3863_v21  ;;  %v3848_v56 = vpop.permute.xlu1 %3847  ;;  %v7161_v55 = vld [vmem:[%s10095_s30 + $0xc0] sm:$0xff]   ;;  %v7167_v21 = vld [vmem:[%s10095_s30 + $0x88] sm:$0xff]  }
 0x7cd   : > { %v3861_v5 = vsel %vm2124_vm1, %v3822_v34, %v3848_v56  ;;  %v7159_v13 = vld [vmem:[%s10029_s19] sm:$0xff]   ;;  %v7174_v34 = vld [vmem:[%s10095_s30 + $0x18] sm:$0xff]  }
 0x7ce   : > { %v3850_v57 = vpop.permute.xlu0 %3849  ;;  %4220 = vmatmul.mubr.bf16.vlgmr.msra.gmra.mrb[76].mxu0 %v3884_v25  ;;  %v3887_v27 = vpack.c.bf16 %v3882_v16, %v3877_v11  ;;  %v3876_v35 = vmul.f32 %v3866_v19, %v3861_v5  ;;  %v7171_v11 = vld [vmem:[%s10095_s30 + $0x90] sm:$0xff]   ;;  %v7172_v25 = vld [vmem:[%s10095_s30 + $0x58] sm:$0xff]   ;;  %v7176_v19 = vld [vmem:[%s10095_s30 + $0x60] sm:$0xff]  }
 0x7cf   : > { %v3862_v28 = vsel %vm2124_vm1, %v3823_v53, %v3850_v57  ;;  %6953 = vmatpush3.bf16.msra.mxu0 %v7153_v48  ;;  %6960 = vmatprep.mubr.msk.bf16.mxu0 %vm7357_vm11, %v9372_v41  ;;  %v7169_v48 = vld [vmem:[%s10095_s30 + $0xd0] sm:$0xff]   ;;  %v7173_v16 = vld [vmem:[%s10095_s30 + $0xd8] sm:$0xff]   ;;  %v7177_v5 = vld [vmem:[%s10095_s30 + $0xe0] sm:$0xff]  }
 0x7d0   : > { %v3881_v59 = vmul.f32 %v3871_v26, %v3862_v28  ;;  %4260 = vmatprep.mubr.bf16.mxu1 %v3887_v27  ;;  %6954 = vmatprep.subr.bf16.mxu0 %v9372_v41  ;;  %v7175_v56 = vld [vmem:[%s10095_s30 + $0x98] sm:$0xff]   ;;  %v7178_v26 = vld [vmem:[%s10095_s30 + $0x20] sm:$0xff]   ;;  %v7180_v53 = vld [vmem:[%s10095_s30 + $0x68] sm:$0xff]  }
 0x7d1   : > { %v7179_v57 = vld [vmem:[%s10095_s30 + $0xa0] sm:$0xff]   ;;  %v7181_v27 = vld [vmem:[%s10095_s30 + $0xe8] sm:$0xff]  }
 0x7d2   : > { %v3886_v17 = vpack.c.bf16 %v3881_v59, %v3876_v35  ;;  %v7182_v28 = vld [vmem:[%s10095_s30 + $0x28] sm:$0xff]   ;;  %v7184_v35 = vld [vmem:[%s10095_s30 + $0x70] sm:$0xff]  }
 0x7d3   : > { %6955 = vmatpush3.bf16.msra.mxu0 %v7156_v49  ;;  %v7183_v49 = vld [vmem:[%s10095_s30 + $0xa8] sm:$0xff]   ;;  %v7185_v59 = vld [vmem:[%s10095_s30 + $0xf0] sm:$0xff]  }
 0x7d4   : > { %4261 = vmatmul.mubr.bf16.vlgmr.msra.gmra.mrb[84].mxu1 %v3886_v17  ;;  %6956 = vmatprep.subr.bf16.mxu0 %v9372_v41  ;;  %v7186_v17 = vld [vmem:[%s10095_s30 + $0x30] sm:$0xff]  }
 0x7d5   : > { %6966 = vmatprep.mubr.msk.bf16.mxu1 %vm7357_vm11, %v9372_v41 }
 0x7d7   : > { %6957 = vmatpush3.bf16.msra.mxu0 %v7157_v12  ;;  %v7187_v12 = vld [vmem:[%s10095_s30 + $0xb0] sm:$0xff]  }
 0x7d8   : > { %6958 = vmatprep.subr.bf16.mxu0 %v9372_v41 }
 0x7db   : > { %6959 = vmatpush3.bf16.msra.mxu0 %v7158_v52  ;;  %v7191_v52 = vld [vmem:[%s10095_s30 + $0xb8] sm:$0xff]  }
 0x7dc   : > { %6756 = vmatprep.subr.bf16.mxu0 %v7160_v30 }
 0x7de   : > { %6961 = vmatmul.mubr.msk.bf16.vlgmr.msra.gmra.mrb[80].mxu0 %vm2124_vm1, %v3888_v8 }
 0x7df   : > { %6757 = vmatpush3.bf16.msra.mxu0 %v7162_v39 }
 0x7e0   : > { %6758 = vmatprep.subr.bf16.mxu0 %v7164_v37 }
 0x7e3   : > { %6759 = vmatpush3.bf16.msra.mxu0 %v7166_v32 }
 0x7e4   : > { %6760 = vmatprep.subr.bf16.mxu0 %v7168_v20 }
 0x7e7   : > { %6761 = vmatpush3.bf16.msra.mxu0 %v7170_v36 }
 0x7e8   : > { %6762 = vmatprep.subr.bf16.mxu0 %v7172_v25  ;;  %v7204_v25 = vld [vmem:[%s10095_s30 + $0x150] sm:$0xff]  }
 0x7eb   : > { %6763 = vmatpush3.bf16.msra.mxu0 %v7174_v34  ;;  %v7206_v34 = vld [vmem:[%s10095_s30 + $0x110] sm:$0xff]  }
 0x7ec   : > { %6764 = vmatprep.subr.bf16.mxu0 %v7176_v19  ;;  %v7208_v19 = vld [vmem:[%s10095_s30 + $0x158] sm:$0xff]  }
 0x7ef   : > { %6765 = vmatpush3.bf16.msra.mxu0 %v7178_v26  ;;  %v7210_v26 = vld [vmem:[%s10095_s30 + $0x118] sm:$0xff]  }
 0x7f0   : > { %6766 = vmatprep.subr.bf16.mxu0 %v7180_v53  ;;  %v7212_v53 = vld [vmem:[%s10095_s30 + $0x160] sm:$0xff]  }
 0x7f3   : > { %6767 = vmatpush3.bf16.msra.mxu0 %v7182_v28  ;;  %v7214_v28 = vld [vmem:[%s10095_s30 + $0x120] sm:$0xff]  }
 0x7f4   : > { %6768 = vmatprep.subr.bf16.mxu0 %v7184_v35  ;;  %v7216_v35 = vld [vmem:[%s10095_s30 + $0x168] sm:$0xff]  }
 0x7f7   : > { %6769 = vmatpush3.bf16.msra.mxu0 %v7186_v17  ;;  %v7218_v17 = vld [vmem:[%s10095_s30 + $0x128] sm:$0xff]  }
 0x7f8   : > { %6770 = vmatprep.subr.bf16.mxu0 %v7188_v9  ;;  %v7220_v9 = vld [vmem:[%s10095_s30 + $0x170] sm:$0xff]  }
 0x7fb   : > { %6771 = vmatpush3.bf16.msra.mxu0 %v7190_v4  ;;  %v7222_v4 = vld [vmem:[%s10095_s30 + $0x130] sm:$0xff]  }
 0x7fc   : > { %6800 = vmatprep.subr.bf16.mxu0 %v7194_v22  ;;  %v7224_v22 = vld [vmem:[%s10095_s30 + $0x178] sm:$0xff]  }
 0x8a1   : > { %v6721_v40 = vpop.f32.mrb[76].mxu0 }
 0x8a2   : > { %v6722_v47 = vpop.f32.mrb[77].mxu0 }
 0x8a3   : > { %v6723_v43 = vadd.f32 %v6722_v47, %v6721_v40  ;;  %v6724_v45 = vpop.f32.mrb[78].mxu0 }
 0x8a4   : > { %v6725_v63 = vpop.f32.mrb[79].mxu0 }
 0x8a5   : > { %v6726_v29 = vadd.f32 %v6725_v63, %v6724_v45  ;;  %v4222_v50 = vadd.f32 %v6723_v43, %v6343_v61  ;;  %v4383_v43 = vld [vmem:[%s10025_s15] sm:$0xff]  ;;  %v4384_v45 = vld [vmem:[%s10025_s15 + $0x8] sm:$0xff]  ;;  %v9564_v63 = vld [vmem:[%s10025_s15 + $0x10] sm:$0xff] }
 0x8a7   : > { %v6743_v42 = vpop.f32.mrb[84].mxu1  ;;  %v4225_v24 = vadd.f32 %v6726_v29, %v6343_v61  ;;  %v9569_v29 = vld [vmem:[%s10025_s15 + $0x18] sm:$0xff]  ;;  %v4392_v61 = vcombine.high %v4383_v43, %v4383_v43 }
 0x8a8   : > { %v6744_v18 = vpop.f32.mrb[85].mxu1 }
 0x8a9   : > { %v6745_v62 = vadd.f32 %v6744_v18, %v6743_v42  ;;  %v6746_v33 = vpop.f32.mrb[86].mxu1  ;;  %v4393_v42 = vcombine.high %v4384_v45, %v4384_v45  ;;  %v4394_v18 = vcombine.high %v9564_v63, %v9564_v63 }
 0x8aa   : > { %v6747_v0 = vpop.f32.mrb[87].mxu1 }
 0x8ab   : > { %v6748_v3 = vadd.f32 %v6747_v0, %v6746_v33  ;;  %v4263_v51 = vadd.f32 %v6745_v62, %v4222_v50  ;;  %v4395_v50 = vcombine.high %v9569_v29, %v9569_v29 }
 0x8ad   : > { %v4266_v44 = vadd.f32 %v6748_v3, %v4225_v24 }
 0x8b1   : > { %v4303_v23 = vpop.f32.mrb[80].mxu0 }
 0x8b2   : > { %v4304_v6 = vadd.f32 %v4303_v23, %v4263_v51  ;;  %v6962_v46 = vpop.f32.mrb[81].mxu0 }
 0x8b3   : > { %v4306_v60 = vpop.f32.mrb[82].mxu0 }
 0x8b4   : > { %v4307_v10 = vadd.f32 %v4306_v60, %v4266_v44  ;;  %v6963_v1 = vpop.f32.mrb[83].mxu0  ;;  %v4310_v14 = vmax.f32 %v4304_v6, 0.0 }
 0x8b6   : > { %v4311_v58 = vmax.f32 %v4307_v10, 0.0 }
 0x8b8   : > { %v4314_v31 = vpack.c.bf16 %v4311_v58, %v4310_v14 }
 0x8ba   : > { %6965 = vmatpush3.bf16.msra.mxu1 %v4314_v31  ;;  %v7197_v31 = vld [vmem:[%s10095_s30 + $0x180] sm:$0xff]  }
 0x8bb   : > { %6778 = vmatprep.subr.bf16.mxu1 %v7161_v55  ;;  %v7196_v55 = vld [vmem:[%s10095_s30 + $0x100] sm:$0xff]  }
 0x8bd   : > { %6967 = vmatmul.mubr.msk.bf16.vlgmr.msra.gmra.mrb[88].mxu1 %vm2058_vm5, %v7159_v13  ;;  %v7200_v13 = vld [vmem:[%s10095_s30 + $0x148] sm:$0xff]  }
 0x8be   : > { %6779 = vmatpush3.bf16.msra.mxu1 %v7163_v54  ;;  %v7201_v54 = vld [vmem:[%s10095_s30 + $0x1c8] sm:$0xff]  }
 0x8bf   : > { %6780 = vmatprep.subr.bf16.mxu1 %v7165_v15 }
 0x8c2   : > { %6781 = vmatpush3.bf16.msra.mxu1 %v7167_v21 }
 0x8c3   : > { %6782 = vmatprep.subr.bf16.mxu1 %v7169_v48  ;;  %v7202_v48 = vld [vmem:[%s10095_s30 + $0x108] sm:$0xff]  }
 0x8c6   : > { %6783 = vmatpush3.bf16.msra.mxu1 %v7171_v11  ;;  %v7203_v11 = vld [vmem:[%s10095_s30 + $0x188] sm:$0xff]  }
 0x8c7   : > { %6784 = vmatprep.subr.bf16.mxu1 %v7173_v16  ;;  %v7205_v16 = vld [vmem:[%s10095_s30 + $0x1d0] sm:$0xff]  }
 0x8ca   : > { %6785 = vmatpush3.bf16.msra.mxu1 %v7175_v56  ;;  %v7207_v56 = vld [vmem:[%s10095_s30 + $0x190] sm:$0xff]  }
 0x8cb   : > { %6786 = vmatprep.subr.bf16.mxu1 %v7177_v5  ;;  %v7209_v5 = vld [vmem:[%s10095_s30 + $0x1d8] sm:$0xff]  }
 0x8ce   : > { %6787 = vmatpush3.bf16.msra.mxu1 %v7179_v57  ;;  %v7211_v57 = vld [vmem:[%s10095_s30 + $0x198] sm:$0xff]  }
 0x8cf   : > { %6788 = vmatprep.subr.bf16.mxu1 %v7181_v27  ;;  %v7213_v27 = vld [vmem:[%s10095_s30 + $0x1e0] sm:$0xff]  }
 0x8d2   : > { %6789 = vmatpush3.bf16.msra.mxu1 %v7183_v49  ;;  %v7215_v49 = vld [vmem:[%s10095_s30 + $0x1a0] sm:$0xff]  }
 0x8d3   : > { %6790 = vmatprep.subr.bf16.mxu1 %v7185_v59  ;;  %v7217_v59 = vld [vmem:[%s10095_s30 + $0x1e8] sm:$0xff]  }
 0x8d6   : > { %6791 = vmatpush3.bf16.msra.mxu1 %v7187_v12  ;;  %v7219_v12 = vld [vmem:[%s10095_s30 + $0x1a8] sm:$0xff]  }
 0x8d7   : > { %6792 = vmatprep.subr.bf16.mxu1 %v7189_v7  ;;  %v7221_v7 = vld [vmem:[%s10095_s30 + $0x1f0] sm:$0xff]  }
 0x8da   : > { %6793 = vmatpush3.bf16.msra.mxu1 %v7191_v52  ;;  %v7223_v52 = vld [vmem:[%s10095_s30 + $0x1b0] sm:$0xff]  }
 0x8db   : > { %6822 = vmatprep.subr.bf16.mxu1 %v7195_v38  ;;  %v7225_v38 = vld [vmem:[%s10095_s30 + $0x1f8] sm:$0xff]  }
 0x990   : > { %v4357_v8 = vpop.f32.mrb[88].mxu1 }
 0x991   : > { %v4365_v30 = vrot.slane %v4357_v8, 4  ;;  %v6968_v39 = vpop.f32.mrb[89].mxu1 }
 0x992   : > { %v4360_v37 = vpop.f32.mrb[90].mxu1  ;;  %v7227_v39 = vld [vmem:[%s10095_s30 + $0x1b8] sm:$0xff]  }
 0x993   : > { %v4367_v32 = vmax.f32 %v4357_v8, %v4365_v30  ;;  %v6969_v20 = vpop.f32.mrb[91].mxu1  ;;  %v4370_v40 = vrot.slane %v4360_v37, 4  ;;  %v7226_v30 = vld [vmem:[%s10095_s30 + $0x138] sm:$0xff]  }
 0x994   : > { %v7228_v20 = vld [vmem:[%s10095_s30 + $0x200] sm:$0xff]  }
 0x995   : > { %v4368_v36 = vmax.f32 %v4367_v32, %v4360_v37 }
 0x997   : > { %v4372_v47 = vmax.f32 %v4368_v36, %v4370_v40 }
 0x999   : > { %4375 = vst [vmem:[#allocation5 + $0x8] sm:$0xf] %v4372_v47  ;;  %v7229_v47 = vld [vmem:[%s10095_s30 + $0x208] sm:$0xff]  }
 0x9a0   : > { %v4377_v62 = vld [vmem:[#allocation5 + $0x6] sm:$0xf]  ;;  %v4381_v6 = vld [vmem:[#allocation5 + $0xa] sm:$0xf] }
 0x9a1   : > { %v4378_v33 = vld [vmem:[#allocation5 + $0x7] sm:$0xf]  ;;  %v4401_v24 = vmul.f32 %v4392_v61, %v4377_v62  ;;  %v4407_v60 = vmul.f32 %v4395_v50, %v4381_v6  ;;  %v7239_v6 = vld [vmem:[%s10097_s28 + $0x8] sm:$0xff]  }
 0x9a2   : > { %v4376_v0 = vld [vmem:[#allocation5 + $0x5] sm:$0xf]  ;;  %v4402_v3 = vmul.f32 %v4384_v45, %v4378_v33  ;;  %v4403_v51 = vmul.f32 %v4393_v42, %v4378_v33  ;;  %v9575_v23 = vld [vmem:[#allocation5 + $0x9] sm:$0xf] }
 0x9a3   : > { %v4400_v44 = vmul.f32 %v4383_v43, %v4376_v0  ;;  %v4405_v46 = vmul.f32 %v4394_v18, %v9575_v23  ;;  %v4410_v10 = vpack.c.bf16 %v4401_v24, %v4401_v24  ;;  %v4416_v21 = vpack.c.bf16 %v4407_v60, %v4407_v60  ;;  %v4379_v8 = vld [vmem:[#allocation5 + $0x8] sm:$0xf]  ;;  %v7230_v43 = vld [vmem:[%s10095_s30 + $0x210] sm:$0xff]   ;;  %v4387_v18 = vld [vmem:[%s10025_s15 + $0x20] sm:$0xf] }
 0x9a4   : > { %v4411_v1 = vpack.c.bf16 %v4402_v3, %v4402_v3  ;;  %v4412_v14 = vpack.c.bf16 %v4403_v51, %v4403_v51  ;;  %v4406_v37 = vmul.f32 %v9569_v29, %v9575_v23  ;;  %v4404_v32 = vmul.f32 %v9564_v63, %v4379_v8  ;;  %v7231_v45 = vld [vmem:[%s10095_s30 + $0x218] sm:$0xff]   ;;  %v7232_v63 = vld [vmem:[%s10095_s30 + $0x220] sm:$0xff]   ;;  %v7233_v29 = vld [vmem:[%s10095_s30 + $0x228] sm:$0xff]  }
 0x9a5   : > { %v4409_v58 = vpack.c.bf16 %v4400_v44, %v4400_v44  ;;  %5033 = vmatprep.mubr.bf16.mxu0 %v4410_v10  ;;  %v4414_v15 = vpack.c.bf16 %v4405_v46, %v4405_v46  ;;  %v7234_v61 = vld [vmem:[%s10095_s30 + $0x230] sm:$0xff]   ;;  %v4382_v42 = vld [vmem:[#allocation5 + $0xb] sm:$0xf]  ;;  %v7236_v0 = vld [vmem:[%s10097_s28 + $0x40] sm:$0xff]  }
 0x9a6   : > { %5073 = vmatprep.mubr.bf16.mxu1 %v4412_v14  ;;  %v4415_v36 = vpack.c.bf16 %v4406_v37, %v4406_v37  ;;  %v4413_v40 = vpack.c.bf16 %v4404_v32, %v4404_v32  ;;  %v7235_v50 = vld [vmem:[%s10095_s30 + $0x238] sm:$0xff]   ;;  %v4408_v62 = vmul.f32 %v4387_v18, %v4382_v42  ;;  %v7237_v24 = vld [vmem:[%s10097_s28] sm:$0xff]   ;;  %v7238_v3 = vld [vmem:[%s10097_s28 + $0x48] sm:$0xff]  }
 0x9a7   : > { %5034 = vmatmul.mubr.bf16.vlgmr.msra.gmra.mrb[84].mxu0 %v4409_v58  ;;  %5074 = vmatmul.mubr.bf16.vlgmr.msra.gmra.mrb[92].mxu1 %v4411_v1  ;;  %v7240_v51 = vld [vmem:[%s10097_s28 + $0xc0] sm:$0xff]   ;;  %v7244_v23 = vld [vmem:[%s10097_s28 + $0xc8] sm:$0xff]   ;;  %v7242_v46 = vld [vmem:[%s10097_s28 + $0x50] sm:$0xff]  }
 0x9a8   : > { %6801 = vmatpush3.bf16.msra.mxu0 %v7196_v55  ;;  %6823 = vmatpush3.bf16.msra.mxu1 %v7197_v31  ;;  %v4417_v33 = vpack.c.bf16 %v4408_v62, %v4408_v62  ;;  %v7241_v44 = vld [vmem:[%s10097_s28 + $0x80] sm:$0xff]   ;;  %v7245_v60 = vld [vmem:[%s10097_s28 + $0x88] sm:$0xff]   ;;  %v7248_v10 = vld [vmem:[%s10097_s28 + $0xd0] sm:$0xff]  }
 0x9a9   : > { %5113 = vmatprep.mubr.bf16.mxu0 %v4414_v15  ;;  %5153 = vmatprep.mubr.bf16.mxu1 %v4416_v21  ;;  %v7243_v1 = vld [vmem:[%s10097_s28 + $0x10] sm:$0xff]   ;;  %v7246_v14 = vld [vmem:[%s10097_s28 + $0x58] sm:$0xff]   ;;  %v7256_v15 = vld [vmem:[%s10097_s28 + $0xe0] sm:$0xff]  }
 0x9aa   : > { %6802 = vmatprep.subr.bf16.mxu0 %v7200_v13  ;;  %6824 = vmatprep.subr.bf16.mxu1 %v7201_v54  ;;  %v7249_v58 = vld [vmem:[%s10097_s28 + $0x90] sm:$0xff]   ;;  %v7252_v55 = vld [vmem:[%s10097_s28 + $0xd8] sm:$0xff]   ;;  %v7250_v13 = vld [vmem:[%s10097_s28 + $0x60] sm:$0xff]  }
 0x9ab   : > { %v7247_v31 = vld [vmem:[%s10097_s28 + $0x18] sm:$0xff]   ;;  %v7251_v21 = vld [vmem:[%s10097_s28 + $0x20] sm:$0xff]   ;;  %v7266_v62 = vld [vmem:[%s10097_s28 + $0xb0] sm:$0xff]  }
 0x9ac   : > { %6803 = vmatpush3.bf16.msra.mxu0 %v7202_v48  ;;  %6825 = vmatpush3.bf16.msra.mxu1 %v7203_v11  ;;  %v7253_v54 = vld [vmem:[%s10097_s28 + $0x98] sm:$0xff]   ;;  %v7254_v48 = vld [vmem:[%s10097_s28 + $0x68] sm:$0xff]   ;;  %v7257_v11 = vld [vmem:[%s10097_s28 + $0xa0] sm:$0xff]  }
 0x9ad   : > { %6804 = vmatprep.subr.bf16.mxu0 %v7204_v25  ;;  %6826 = vmatprep.subr.bf16.mxu1 %v7205_v16  ;;  %v7260_v25 = vld [vmem:[%s10097_s28 + $0xe8] sm:$0xff]   ;;  %v7264_v18 = vld [vmem:[%s10097_s28 + $0x38] sm:$0xff]  }
 0x9ae   : > { %v7255_v16 = vld [vmem:[%s10097_s28 + $0x28] sm:$0xff]  }
 0x9b0   : > { %6805 = vmatpush3.bf16.msra.mxu0 %v7206_v34  ;;  %6827 = vmatpush3.bf16.msra.mxu1 %v7207_v56  ;;  %v7258_v34 = vld [vmem:[%s10097_s28 + $0x70] sm:$0xff]   ;;  %v7261_v56 = vld [vmem:[%s10097_s28 + $0xa8] sm:$0xff]  }
 0x9b1   : > { %6806 = vmatprep.subr.bf16.mxu0 %v7208_v19  ;;  %6828 = vmatprep.subr.bf16.mxu1 %v7209_v5  ;;  %v7259_v19 = vld [vmem:[%s10097_s28 + $0x30] sm:$0xff]  }
 0x9b4   : > { %6807 = vmatpush3.bf16.msra.mxu0 %v7210_v26  ;;  %6829 = vmatpush3.bf16.msra.mxu1 %v7211_v57  ;;  %v6383_v57 = vld [vmem:[%s10098_s9] ss:$0 sm:$0xff] }
 0x9b5   : > { %6808 = vmatprep.subr.bf16.mxu0 %v7212_v53  ;;  %6830 = vmatprep.subr.bf16.mxu1 %v7213_v27 }
 0x9b8   : > { %6809 = vmatpush3.bf16.msra.mxu0 %v7214_v28  ;;  %6831 = vmatpush3.bf16.msra.mxu1 %v7215_v49 }
 0x9b9   : > { %6810 = vmatprep.subr.bf16.mxu0 %v7216_v35  ;;  %6832 = vmatprep.subr.bf16.mxu1 %v7217_v59 }
 0x9bc   : > { %6811 = vmatpush3.bf16.msra.mxu0 %v7218_v17  ;;  %6833 = vmatpush3.bf16.msra.mxu1 %v7219_v12 }
 0x9bd   : > { %6812 = vmatprep.subr.bf16.mxu0 %v7220_v9  ;;  %6834 = vmatprep.subr.bf16.mxu1 %v7221_v7 }
 0x9c0   : > { %6813 = vmatpush3.bf16.msra.mxu0 %v7222_v4  ;;  %6835 = vmatpush3.bf16.msra.mxu1 %v7223_v52 }
 0x9c1   : > { %6814 = vmatprep.subr.bf16.mxu0 %v7224_v22  ;;  %6836 = vmatprep.subr.bf16.mxu1 %v7225_v38 }
 0x9c4   : > { %6815 = vmatpush3.bf16.msra.mxu0 %v7226_v30  ;;  %6837 = vmatpush3.bf16.msra.mxu1 %v7227_v39 }
 0x9c5   : > { %6970 = vmatprep.subr.bf16.mxu0 %v9372_v41  ;;  %6853 = vmatprep.subr.bf16.mxu1 %v7236_v0  ;;  %v7270_v0 = vld [vmem:[%s10097_s28 + $0xb8] sm:$0xff]  }
 0x9c7   : > { %5114 = vmatmul.mubr.bf16.vlgmr.msra.gmra.mrb[88].mxu0 %v4413_v40  ;;  %5154 = vmatmul.mubr.bf16.vlgmr.msra.gmra.mrb[96].mxu1 %v4415_v36 }
 0x9c8   : > { %6971 = vmatpush3.bf16.msra.mxu0 %v7228_v20  ;;  %6986 = vmatprep.mubr.msk.bf16.mxu0 %vm7357_vm11, %v9372_v41 }
 0x9c9   : > { %6972 = vmatprep.subr.bf16.mxu0 %v9372_v41  ;;  %6854 = vmatpush3.bf16.msra.mxu1 %v7237_v24 }
 0x9ca   : > { %6855 = vmatprep.subr.bf16.mxu1 %v7238_v3 }
 0x9cc   : > { %6973 = vmatpush3.bf16.msra.mxu0 %v7229_v47 }
 0x9cd   : > { %6974 = vmatprep.subr.bf16.mxu0 %v9372_v41  ;;  %6856 = vmatpush3.bf16.msra.mxu1 %v7239_v6 }
 0x9ce   : > { %6857 = vmatprep.subr.bf16.mxu1 %v7242_v46  ;;  %v5234_v46 = vld [vmem:[%s10026_s16 + $0x8] sm:$0xff] }
 0x9d0   : > { %6975 = vmatpush3.bf16.msra.mxu0 %v7230_v43 }
 0x9d1   : > { %6976 = vmatprep.subr.bf16.mxu0 %v9372_v41  ;;  %6858 = vmatpush3.bf16.msra.mxu1 %v7243_v1 }
 0x9d2   : > { %6859 = vmatprep.subr.bf16.mxu1 %v7246_v14 }
 0x9d4   : > { %6977 = vmatpush3.bf16.msra.mxu0 %v7231_v45 }
 0x9d5   : > { %6978 = vmatprep.subr.bf16.mxu0 %v9372_v41  ;;  %6860 = vmatpush3.bf16.msra.mxu1 %v7247_v31 }
 0x9d6   : > { %6861 = vmatprep.subr.bf16.mxu1 %v7250_v13  ;;  %v5239_v13 = vcombine.high %v5234_v46, %v5234_v46 }
 0x9d8   : > { %6979 = vmatpush3.bf16.msra.mxu0 %v7232_v63 }
 0x9d9   : > { %6980 = vmatprep.subr.bf16.mxu0 %v9372_v41  ;;  %6862 = vmatpush3.bf16.msra.mxu1 %v7251_v21 }
 0x9da   : > { %6863 = vmatprep.subr.bf16.mxu1 %v7254_v48 }
 0x9dc   : > { %6981 = vmatpush3.bf16.msra.mxu0 %v7233_v29  ;;  %v7263_v29 = vld [vmem:[%s10097_s28 + $0x78] sm:$0xff]  }
 0x9dd   : > { %6982 = vmatprep.subr.bf16.mxu0 %v9372_v41  ;;  %6864 = vmatpush3.bf16.msra.mxu1 %v7255_v16 }
 0x9de   : > { %6865 = vmatprep.subr.bf16.mxu1 %v7258_v34 }
 0x9e0   : > { %6983 = vmatpush3.bf16.msra.mxu0 %v7234_v61 }
 0x9e1   : > { %6984 = vmatprep.subr.bf16.mxu0 %v9372_v41  ;;  %6866 = vmatpush3.bf16.msra.mxu1 %v7259_v19 }
 0x9e2   : > { %6867 = vmatprep.subr.bf16.mxu1 %v7263_v29  ;;  %v7282_v29 = vld [vmem:[%s10030_s20 + $0x40] sm:$0xff]  }
 0x9e4   : > { %6985 = vmatpush3.bf16.msra.mxu0 %v7235_v50  ;;  %v7265_v50 = vld [vmem:[%s10097_s28 + $0xf0] sm:$0xff]  }
 0x9e5   : > { %6875 = vmatprep.subr.bf16.mxu0 %v7240_v51  ;;  %6868 = vmatpush3.bf16.msra.mxu1 %v7264_v18 }
 0x9e6   : > { %6990 = vmatprep.subr.bf16.mxu1 %v9372_v41 }
 0x9e7   : > { %6987 = vmatmul.mubr.bf16.vlgmr.msra.gmra.mrb[92].mxu0 %v4417_v33  ;;  %v7268_v33 = vld [vmem:[%s10097_s28 + $0xf8] sm:$0xff]  }
 0x9e8   : > { %6876 = vmatpush3.bf16.msra.mxu0 %v7241_v44 }
 0x9e9   : > { %6877 = vmatprep.subr.bf16.mxu0 %v7244_v23  ;;  %v5233_v23 = vld [vmem:[%s10026_s16] sm:$0xff] }
 0x9ea   : > { %v5238_v6 = vcombine.high %v5233_v23, %v5233_v23 }
 0x9ec   : > { %6878 = vmatpush3.bf16.msra.mxu0 %v7245_v60 }
 0x9ed   : > { %6879 = vmatprep.subr.bf16.mxu0 %v7248_v10 }
 0x9f0   : > { %6880 = vmatpush3.bf16.msra.mxu0 %v7249_v58 }
 0x9f1   : > { %6881 = vmatprep.subr.bf16.mxu0 %v7252_v55 }
 0x9f4   : > { %6882 = vmatpush3.bf16.msra.mxu0 %v7253_v54 }
 0x9f5   : > { %6883 = vmatprep.subr.bf16.mxu0 %v7256_v15 }
 0x9f8   : > { %6884 = vmatpush3.bf16.msra.mxu0 %v7257_v11 }
 0x9f9   : > { %6885 = vmatprep.subr.bf16.mxu0 %v7260_v25  ;;  %v7269_v25 = vld [vmem:[%s10097_s28 + $0x100] sm:$0xff]  }
 0x9fc   : > { %6886 = vmatpush3.bf16.msra.mxu0 %v7261_v56 }
 0x9fd   : > { %6887 = vmatprep.subr.bf16.mxu0 %v7265_v50 }
 0xa00   : > { %6888 = vmatpush3.bf16.msra.mxu0 %v7266_v62 }
 0xa01   : > { %6889 = vmatprep.subr.bf16.mxu0 %v7268_v33  ;;  %v7283_v33 = vld [vmem:[%s10032_s22] ss:$8 sps:$4 sm:$0xff]  }
 0xa04   : > { %6890 = vmatpush3.bf16.msra.mxu0 %v7270_v0 }
 0xa7a   : > { %v6772_v5 = vpop.f32.mrb[84].mxu0  ;;  %v6794_v26 = vpop.f32.mrb[92].mxu1 }
 0xa7b   : > { %v6773_v53 = vpop.f32.mrb[85].mxu0  ;;  %v6795_v27 = vpop.f32.mrb[93].mxu1 }
 0xa7c   : > { %v6774_v28 = vadd.f32 %v6773_v53, %v6772_v5  ;;  %v6796_v49 = vadd.f32 %v6795_v27, %v6794_v26  ;;  %v6775_v35 = vpop.f32.mrb[86].mxu0  ;;  %v6797_v59 = vpop.f32.mrb[94].mxu1  ;;  %v7272_v53 = vld [vmem:[%s10097_s28 + $0x110] sm:$0xff]  }
 0xa7d   : > { %v6776_v17 = vpop.f32.mrb[87].mxu0  ;;  %v6798_v12 = vpop.f32.mrb[95].mxu1 }
 0xa7e   : > { %v5036_v9 = vadd.f32 %v6774_v28, %v6383_v57  ;;  %v7271_v57 = vld [vmem:[%s10097_s28 + $0x108] sm:$0xff]   ;;  %v5235_v28 = vld [vmem:[%s10026_s16 + $0x10] sm:$0xf]  ;;  %v7274_v17 = vld [vmem:[%s10030_s20] sm:$0xff]  }
 0xa7f   : > { %v7275_v12 = vld [vmem:[%s10030_s20 + $0x8] sm:$0xff]  }
 0xa80   : > { %v5076_v7 = vadd.f32 %v6796_v49, %v5036_v9  ;;  %v7273_v49 = vld [vmem:[%s10097_s28 + $0x118] sm:$0xff]  }
 0xa81   : > { %v7277_v9 = vld [vmem:[%s10030_s20 + $0x18] sm:$0xff]  }
 0xa9a   : > { %v6816_v4 = vpop.f32.mrb[88].mxu0  ;;  %v6838_v52 = vpop.f32.mrb[96].mxu1 }
 0xa9b   : > { %v6817_v22 = vpop.f32.mrb[89].mxu0  ;;  %v6839_v38 = vpop.f32.mrb[97].mxu1 }
 0xa9c   : > { %v6818_v8 = vadd.f32 %v6817_v22, %v6816_v4  ;;  %v6840_v30 = vadd.f32 %v6839_v38, %v6838_v52  ;;  %v6819_v39 = vpop.f32.mrb[90].mxu0  ;;  %v6841_v37 = vpop.f32.mrb[98].mxu1  ;;  %v7279_v4 = vld [vmem:[%s10030_s20 + $0x28] sm:$0xff]   ;;  %v7280_v52 = vld [vmem:[%s10030_s20 + $0x30] sm:$0xff]  }
 0xa9d   : > { %v6820_v32 = vpop.f32.mrb[91].mxu0  ;;  %v6842_v20 = vpop.f32.mrb[99].mxu1  ;;  %v6456_v39 = vld [vmem:[%s10099_s3] ss:$0 sm:$0xff]  ;;  %s839_s3 = scalar_lea.vmem %s10102_s0, %s10105_s4 }
 0xa9e   : > { %v5116_v36 = vadd.f32 %v6818_v8, %v5076_v7  ;;  %v7278_v7 = vld [vmem:[%s10030_s20 + $0x20] sm:$0xff]  }
 0xaa0   : > { %v5156_v40 = vadd.f32 %v6840_v30, %v5116_v36 }
 0xaba   : > { %v5195_v47 = vpop.f32.mrb[92].mxu0 }
 0xabb   : > { %v5196_v43 = vadd.f32 %v5195_v47, %v5156_v40  ;;  %v6988_v45 = vpop.f32.mrb[93].mxu0 }
 0xabc   : > { %v5198_v63 = vpop.f32.mrb[94].mxu0 }
 0xabd   : > { %v5201_v61 = vmax.f32 %v5196_v43, 0.0  ;;  %v6989_v42 = vpop.f32.mrb[95].mxu0  ;;  %v7281_v63 = vld [vmem:[%s10030_s20 + $0x38] sm:$0xff]  }
 0xabf   : > { %5205 = vst.msk [vmem:[#allocation6 + $0x8] sm:$0xf] %vm5204_vm12, %v5201_v61  ;;  %v5671_v61 = vld [vmem:[%s832_s27] sm:$0x1]  ;;  %s10101_s27 = smov 32  }
 0xac0   : > { %v5689_v18 = vpack.c.bf16 %v5671_v61, %v5671_v61 }
 0xac6   : > { %v5208_v24 = vld [vmem:[#allocation6 + $0x7] sm:$0xf]  ;;  %v5212_v27 = vld [vmem:[#allocation6 + $0xb] sm:$0xf] }
 0xac7   : > { %v5207_v3 = vld [vmem:[#allocation6 + $0x6] sm:$0xf]  ;;  %5218 = vrot.lane.b32.xlu1 %v5208_v24, %s10090_s7  ;;  %v5211_v51 = vld [vmem:[#allocation6 + $0xa] sm:$0xf]  ;;  %v5246_v35 = vmul.f32 %v5235_v28, %v5212_v27 }
 0xac8   : > { %5214 = vrot.lane.b32.xlu0 %v5207_v3, %s10090_s7  ;;  %v5210_v44 = vld [vmem:[#allocation6 + $0x9] sm:$0xf]  ;;  %v5206_v1 = vld [vmem:[#allocation6 + $0x5] sm:$0xf] }
 0xac9   : > { %v5209_v48 = vld [vmem:[#allocation6 + $0x8] sm:$0xf]  ;;  %v5251_v59 = vpack.c.bf16 %v5246_v35, %v5246_v35  ;;  %v7310_v27 = vld [vmem:[%s10034_s24 + $0x8] sm:$0xff]   ;;  %v7313_v35 = vld [vmem:[%s10034_s24 + $0x58] sm:$0xff]  }
 0xaca   : > { %v7311_v28 = vld [vmem:[%s10034_s24 + $0x50] sm:$0xff]  }
 0xacb   : > { %5226 = vrot.lane.b32.xlu1 %v5211_v51, %s10090_s7 }
 0xacc   : > { %5222 = vrot.lane.b32.xlu0 %v5210_v44, %s10090_s7 }
 0xb39   : > { %v5219_v60 = vpop.permute.xlu1 %5218 }
 0xb3a   : > { %v5215_v10 = vpop.permute.xlu0 %5214  ;;  %v5230_v14 = vsel %vm2124_vm1, %v5208_v24, %v5219_v60  ;;  %v7288_v24 = vld [vmem:[%s10032_s22 + $0x14] ss:$8 sps:$4 sm:$0xff]   ;;  %v7289_v60 = vld [vmem:[%s10032_s22 + $0x20] ss:$8 sps:$4 sm:$0xff]  }
 0xb3b   : > { %v5229_v58 = vsel %vm2124_vm1, %v5206_v1, %v5215_v10  ;;  %v5243_v55 = vmul.f32 %v5238_v6, %v5230_v14  ;;  %v7294_v1 = vld [vmem:[%s10032_s22 + $0x34] ss:$8 sps:$4 sm:$0xff]   ;;  %v7292_v14 = vld [vmem:[%s10032_s22 + $0x30] ss:$8 sps:$4 sm:$0xff]  }
 0xb3c   : > { %v5242_v31 = vmul.f32 %v5233_v23, %v5229_v58  ;;  %v7297_v58 = vld [vmem:[%s10032_s22 + $0x44] ss:$8 sps:$4 sm:$0xff]  }
 0xb3d   : > { %v5248_v54 = vpack.c.bf16 %v5243_v55, %v5243_v55  ;;  %v5227_v21 = vpop.permute.xlu1 %5226  ;;  %v7295_v55 = vld [vmem:[%s10032_s22 + $0x40] ss:$8 sps:$4 sm:$0xff]  }
 0xb3e   : > { %v5247_v15 = vpack.c.bf16 %v5242_v31, %v5242_v31  ;;  %v5223_v11 = vpop.permute.xlu0 %5222  ;;  %v5232_v16 = vsel %vm2124_vm1, %v5210_v44, %v5227_v21  ;;  %v7286_v44 = vld [vmem:[%s10032_s22 + $0x10] ss:$8 sps:$4 sm:$0xff]   ;;  %v7300_v31 = vld [vmem:[%s10032_s22 + $0x54] ss:$8 sps:$4 sm:$0xff]  }
 0xb3f   : > { %v5231_v34 = vsel %vm2124_vm1, %v5209_v48, %v5223_v11  ;;  %v5245_v56 = vmul.f32 %v5239_v13, %v5232_v16  ;;  %5582 = vmatprep.mubr.bf16.mxu1 %v5248_v54  ;;  %v7298_v13 = vld [vmem:[%s10032_s22 + $0x50] ss:$8 sps:$4 sm:$0xff]   ;;  %v7303_v54 = vld [vmem:[%s10032_s22 + $0x64] ss:$8 sps:$4 sm:$0xff]  }
 0xb40   : > { %v5244_v19 = vmul.f32 %v5234_v46, %v5231_v34  ;;  %5583 = vmatmul.mubr.bf16.vlgmr.msra.gmra.mrb[100].mxu1 %v5247_v15  ;;  %v7291_v46 = vld [vmem:[%s10032_s22 + $0x24] ss:$8 sps:$4 sm:$0xff]   ;;  %v7301_v15 = vld [vmem:[%s10032_s22 + $0x60] ss:$8 sps:$4 sm:$0xff]  }
 0xb41   : > { %v5250_v5 = vpack.c.bf16 %v5245_v56, %v5245_v56  ;;  %6991 = vmatpush3.bf16.msra.mxu1 %v7269_v25  ;;  %6998 = vmatprep.mubr.msk.bf16.mxu1 %vm7357_vm11, %v9372_v41 }
 0xb42   : > { %v5249_v26 = vpack.c.bf16 %v5244_v19, %v5244_v19  ;;  %6992 = vmatprep.subr.bf16.mxu1 %v9372_v41  ;;  %v7306_v19 = vld [vmem:[%s10032_s22 + $0x74] ss:$8 sps:$4 sm:$0xff]  }
 0xb43   : > { %5622 = vmatprep.mubr.bf16.mxu0 %v5250_v5  ;;  %v7304_v5 = vld [vmem:[%s10032_s22 + $0x70] ss:$8 sps:$4 sm:$0xff]  }
 0xb44   : > { %5623 = vmatmul.mubr.bf16.vlgmr.msra.gmra.mrb[96].mxu0 %v5249_v26  ;;  %v7307_v26 = vld [vmem:[%s10034_s24 + $0x40] sm:$0xff]  }
 0xb45   : > { %6993 = vmatpush3.bf16.msra.mxu1 %v7271_v57  ;;  %5948 = vmatprep.mubr.bf16.mxu0 %v7347_v2  ;;  %v7308_v57 = vld [vmem:[%s10034_s24] sm:$0xff]  }
 0xb46   : > { %6994 = vmatprep.subr.bf16.mxu1 %v9372_v41 }
 0xb49   : > { %6995 = vmatpush3.bf16.msra.mxu1 %v7272_v53  ;;  %v7309_v53 = vld [vmem:[%s10034_s24 + $0x48] sm:$0xff]  }
 0xb4a   : > { %6996 = vmatprep.subr.bf16.mxu1 %v9372_v41  ;;  %v7276_v41 = vld [vmem:[%s10030_s20 + $0x10] sm:$0xff]  }
 0xb4d   : > { %6997 = vmatpush3.bf16.msra.mxu1 %v7273_v49  ;;  %v7312_v49 = vld [vmem:[%s10034_s24 + $0x10] sm:$0xff]  }
 0xb4e   : > { %5766 = vmatprep.subr.bf16.mxu1 %v7347_v2 }
 0xb50   : > { %6999 = vmatmul.mubr.msk.bf16.vlgmr.msra.gmra.mrb[104].mxu1 %vm2124_vm1, %v5251_v59  ;;  %v7314_v59 = vld [vmem:[%s10034_s24 + $0x18] sm:$0xff]  }
 0xb51   : > { %5767 = vmatpush1.bf16.msra.mxu1 %v7274_v17  ;;  %6503 = vmatprep.mubr.msk.bf16.mxu1 %vm2058_vm5, %v5689_v18  ;;  %v7315_v17 = vld [vmem:[%s10034_s24 + $0x60] sm:$0xff]  }
 0xb52   : > { %5768 = vmatprep.subr.bf16.mxu1 %v7347_v2 }
 0xb55   : > { %5769 = vmatpush1.bf16.msra.mxu1 %v7275_v12  ;;  %v7316_v12 = vld [vmem:[%s10034_s24 + $0x20] sm:$0xff]  }
 0xb56   : > { %5770 = vmatprep.subr.bf16.mxu1 %v7347_v2 }
 0xb59   : > { %5771 = vmatpush1.bf16.msra.mxu1 %v7276_v41  ;;  %v7317_v41 = vld [vmem:[%s10034_s24 + $0x68] sm:$0xff]  }
 0xb5a   : > { %5772 = vmatprep.subr.bf16.mxu1 %v7347_v2 }
 0xb5d   : > { %5773 = vmatpush1.bf16.msra.mxu1 %v7277_v9  ;;  %v7318_v9 = vld [vmem:[%s10034_s24 + $0x28] sm:$0xff]  }
 0xb5e   : > { %5774 = vmatprep.subr.bf16.mxu1 %v7347_v2 }
 0xb61   : > { %5775 = vmatpush1.bf16.msra.mxu1 %v7278_v7  ;;  %v5708_v7 = vld [vmem:[%s10031_s21] sm:$0x1] }
 0xb62   : > { %5776 = vmatprep.subr.bf16.mxu1 %v7347_v2 }
 0xb65   : > { %5777 = vmatpush1.bf16.msra.mxu1 %v7279_v4 }
 0xb66   : > { %5778 = vmatprep.subr.bf16.mxu1 %v7347_v2 }
 0xb69   : > { %5779 = vmatpush1.bf16.msra.mxu1 %v7280_v52 }
 0xb6a   : > { %5780 = vmatprep.subr.bf16.mxu1 %v7347_v2 }
 0xb6d   : > { %5781 = vmatpush1.bf16.msra.mxu1 %v7281_v63 }
 0xb6e   : > { %5782 = vmatprep.subr.bf16.mxu1 %v7347_v2  ;;  %v7285_v2 = vld [vmem:[%s10032_s22 + $0x4] ss:$8 sps:$4 sm:$0xff]  }
 0xb6f   : > { %5916 = vmatprep.subr.bf16.mxu0 %v7285_v2 }
 0xb70   : > { %5917 = vmatpush1.bf16.msra.mxu0 %v7283_v33 }
 0xb71   : > { %5783 = vmatpush1.bf16.msra.mxu1 %v7282_v29  ;;  %5918 = vmatprep.subr.bf16.mxu0 %v7288_v24  ;;  %v7358_v29 = vmov 1966171168  }
 0xb72   : > { %6902 = vmatprep.subr.bf16.mxu1 %v7307_v26  ;;  %v6134_v61 = vunpack.c.l.s4 %v7358_v29 }
 0xb74   : > { %5919 = vmatpush1.bf16.msra.mxu0 %v7286_v44 }
 0xb75   : > { %5920 = vmatprep.subr.bf16.mxu0 %v7291_v46 }
 0xb78   : > { %5921 = vmatpush1.bf16.msra.mxu0 %v7289_v60 }
 0xb79   : > { %5922 = vmatprep.subr.bf16.mxu0 %v7294_v1 }
 0xb7c   : > { %5923 = vmatpush1.bf16.msra.mxu0 %v7292_v14 }
 0xb7d   : > { %5924 = vmatprep.subr.bf16.mxu0 %v7297_v58  ;;  %v5993_v58 = vld [vmem:[%s10035_s25] sm:$0x1] }
 0xb80   : > { %5925 = vmatpush1.bf16.msra.mxu0 %v7295_v55 }
 0xb81   : > { %5926 = vmatprep.subr.bf16.mxu0 %v7300_v31 }
 0xb84   : > { %5927 = vmatpush1.bf16.msra.mxu0 %v7298_v13 }
 0xb85   : > { %5928 = vmatprep.subr.bf16.mxu0 %v7303_v54 }
 0xb88   : > { %5929 = vmatpush1.bf16.msra.mxu0 %v7301_v15 }
 0xb89   : > { %5930 = vmatprep.subr.bf16.mxu0 %v7306_v19 }
 0xb8c   : > { %5931 = vmatpush1.bf16.msra.mxu0 %v7304_v5 }
 0xc13   : > { %v6869_v22 = vpop.f32.mrb[100].mxu1 }
 0xc14   : > { %v6870_v38 = vpop.f32.mrb[101].mxu1 }
 0xc15   : > { %v6871_v8 = vadd.f32 %v6870_v38, %v6869_v22  ;;  %v6872_v30 = vpop.f32.mrb[102].mxu1 }
 0xc16   : > { %v6873_v37 = vpop.f32.mrb[103].mxu1 }
 0xc17   : > { %v6891_v32 = vpop.f32.mrb[96].mxu0  ;;  %v5585_v36 = vadd.f32 %v6871_v8, %v6456_v39  ;;  %v7319_v37 = vld [vmem:[%s10034_s24 + $0x70] sm:$0xff]  }
 0xc18   : > { %v6892_v20 = vpop.f32.mrb[97].mxu0 }
 0xc19   : > { %v6893_v40 = vadd.f32 %v6892_v20, %v6891_v32  ;;  %v6894_v47 = vpop.f32.mrb[98].mxu0  ;;  %v7320_v32 = vld [vmem:[%s10034_s24 + $0x30] sm:$0xff]   ;;  %v7321_v20 = vld [vmem:[%s10034_s24 + $0x78] sm:$0xff]  }
 0xc1a   : > { %v6895_v43 = vpop.f32.mrb[99].mxu0 }
 0xc1b   : > { %v5625_v45 = vadd.f32 %v6893_v40, %v5585_v36  ;;  %v7322_v36 = vld [vmem:[%s10034_s24 + $0x38] sm:$0xff]   ;;  %v5906_v40 = vlaneseq }
 0xc1d   : > { %v5907_v47 = vshrl.u32 %v5906_v40, 7  ;;  %vm6150_vm13 = vcmp.lt.s32.totalorder %v5906_v40, 256 }
 0xc1f   : > { %v5908_v43 = vsub.s32 0, %v5907_v47  ;;  %v5912_v63 = vsub.s32 1, %v5907_v47 }
 0xc23   : > { %v5664_v42 = vpop.f32.mrb[104].mxu1 }
 0xc24   : > { %v5665_v50 = vadd.f32 %v5664_v42, %v5625_v45  ;;  %v7000_v62 = vpop.f32.mrb[105].mxu1  ;;  %v5824_v45 = vld [vmem:[%s10033_s23] sm:$0x3] }
 0xc25   : > { %v5667_v0 = vpop.f32.mrb[106].mxu1  ;;  %v5909_v42 = vrot.slane %v5824_v45, %v5908_v43  ;;  %v5913_v18 = vrot.slane %v5824_v45, %v5912_v63  ;;  %v6135_v62 = vunpack.c.0.s8 %v6134_v61 }
 0xc26   : > { %v5670_v3 = vmax.f32 %v5665_v50, 0.0  ;;  %v7001_v51 = vpop.f32.mrb[107].mxu1 }
 0xc28   : > { %v5677_v23 = vrot.slane %v5670_v3, 2  ;;  %v5673_v6 = vrot.slane %v5670_v3, 1  ;;  %v5681_v10 = vrot.slane %v5670_v3, 3 }
 0xc2a   : > { %5678 = vrot.lane.b32.xlu0 %v5677_v23, %s10090_s7  ;;  %5674 = vrot.lane.b32.xlu1 %v5673_v6, %s10101_s27  ;;  %v6138_v23 = vsub.s32 %v6135_v62, %v5907_v47  ;;  %s6248_s7 = sshll.u32 %s10105_s4, 1 }
 0xc2b   : > { %s836_s11 = scalar_lea.vmem %s10036_s26, %s6248_s7 }
 0xc2e   : > { %5682 = vrot.lane.b32.xlu1 %v5681_v10, %s10084_s8 }
 0xc9c   : > { %v5675_v21 = vpop.permute.xlu1 %5674  ;;  %v5679_v48 = vpop.permute.xlu0 %5678 }
 0xc9d   : > { %v5685_v11 = vsel %vm3071_vm10, %v5670_v3, %v5675_v21 }
 0xc9e   : > { %v5686_v25 = vsel %vm2124_vm1, %v5685_v11, %v5679_v48 }
 0xca0   : > { %v5683_v16 = vpop.permute.xlu1 %5682 }
 0xca1   : > { %v5687_v34 = vsel %vm1992_vm6, %v5686_v25, %v5683_v16 }
 0xca2   : > { %v5688_v56 = vpack.c.bf16 %v5687_v34, %v5687_v34 }
 0xca4   : > { %5799 = vmatmul.mubr.bf16.vlgmr.msra.gmra.mrb[108].mxu1 %v5688_v56 }
 0xca5   : > { %6903 = vmatpush3.bf16.msra.mxu1 %v7308_v57 }
 0xca6   : > { %6904 = vmatprep.subr.bf16.mxu1 %v7309_v53 }
 0xca9   : > { %6905 = vmatpush3.bf16.msra.mxu1 %v7310_v27 }
 0xcaa   : > { %6906 = vmatprep.subr.bf16.mxu1 %v7311_v28 }
 0xcad   : > { %6907 = vmatpush3.bf16.msra.mxu1 %v7312_v49 }
 0xcae   : > { %6908 = vmatprep.subr.bf16.mxu1 %v7313_v35 }
 0xcb1   : > { %6909 = vmatpush3.bf16.msra.mxu1 %v7314_v59 }
 0xcb2   : > { %6910 = vmatprep.subr.bf16.mxu1 %v7315_v17 }
 0xcb5   : > { %6911 = vmatpush3.bf16.msra.mxu1 %v7316_v12 }
 0xcb6   : > { %6912 = vmatprep.subr.bf16.mxu1 %v7317_v41 }
 0xcb9   : > { %6913 = vmatpush3.bf16.msra.mxu1 %v7318_v9 }
 0xcba   : > { %6914 = vmatprep.subr.bf16.mxu1 %v7319_v37 }
 0xcbd   : > { %6915 = vmatpush3.bf16.msra.mxu1 %v7320_v32 }
 0xcbe   : > { %6916 = vmatprep.subr.bf16.mxu1 %v7321_v20 }
 0xcc1   : > { %6917 = vmatpush3.bf16.msra.mxu1 %v7322_v36 }
 0xd77   : > { %v5800_v4 = vpop.f32.mrb[108].mxu1 }
 0xd78   : > { %v5801_v52 = vadd.f32 %v5800_v4, %v5708_v7  ;;  %v5802_v22 = vpop.f32.mrb[109].mxu1 }
 0xd79   : > { %v5803_v38 = vpop.f32.mrb[110].mxu1 }
 0xd7a   : > { %v5806_v8 = vmax.f32 %v5801_v52, 0.0  ;;  %v5804_v30 = vpop.f32.mrb[111].mxu1 }
 0xd7c   : > { %v5807_v39 = vpack.c.bf16 %v5806_v8, %v5806_v8 }
 0xd7e   : > { %5949 = vmatmul.mubr.bf16.vlgmr.msra.gmra.mrb[100].mxu0 %v5807_v39 }
 0xe51   : > { %v5950_v50 = vpop.f32.mrb[100].mxu0 }
 0xe52   : > { %v5951_v33 = vadd.f32 %v5950_v50, %v5909_v42  ;;  %v5952_v2 = vpop.f32.mrb[101].mxu0 }
 0xe53   : > { %v5953_v0 = vadd.f32 %v5952_v2, %v5913_v18  ;;  %v5954_v24 = vpop.f32.mrb[102].mxu0 }
 0xe54   : > { %v5957_v3 = vmax.f32 %v5951_v33, 0.0  ;;  %v5955_v51 = vpop.f32.mrb[103].mxu0 }
 0xe55   : > { %v5958_v44 = vmax.f32 %v5953_v0, 0.0 }
 0xe56   : > { %v5959_v60 = vpack.c.bf16 %v5957_v3, %v5957_v3 }
 0xe57   : > { %v5960_v6 = vpack.c.bf16 %v5958_v44, %v5958_v44  ;;  %v6132_v46 = vcombine.low %v5957_v3, %v5958_v44 }
 0xe59   : > { %v6139_v10 = vrot.slane %v6132_v46, %v6138_v23  ;;  %6122 = vmatprep.mubr.bf16.mxu1 %v5960_v6 }
 0xe5a   : > { %6123 = vmatmul.mubr.bf16.vlgmr.msra.gmra.mrb[112].mxu1 %v5959_v60 }
 0xe5b   : > { %v6146_v1 = vrot.slane %v6139_v10, %v6138_v23 }
 0xe5d   : > { %6152 = vst.msk [vmem:[%s836_s11] sm:$0x3] %vm6150_vm13, %v6146_v1 }
 0xf2d   : > { %v6918_v14 = vpop.f32.mrb[112].mxu1 }
 0xf2e   : > { %v6919_v55 = vpop.f32.mrb[113].mxu1 }
 0xf2f   : > { %v6920_v31 = vadd.f32 %v6919_v55, %v6918_v14  ;;  %v6921_v13 = vpop.f32.mrb[114].mxu1 }
 0xf30   : > { %v6922_v54 = vpop.f32.mrb[115].mxu1 }
 0xf31   : > { %v6125_v15 = vadd.f32 %v6920_v31, %v5993_v58 }
 0xf33   : > { %6153 = vst [vmem:[%s839_s3] sm:$0x1] %v6125_v15 }
 0xf34 PF: > { %s10103_s9 = sld [smem:[#allocation7_spill]] }
 0xf3a   : > { %s38_s7 = sadd.s32 1, %s10103_s9  }
 0xf3b   : > { %p35_p4 = scmp.ge.s32.totalorder %s38_s7, 4  }
 0xf3d   :  { %37 = sbr.rel (!%p35_p4) target bundleno = 15 (0xf), region = 169 }

</bundles_post_ra>
